<compile_context>
chip_gen: v5e
topology: v5e:2x2
jax: 0.10.0
libtpu: 0.0.40
codegen_flags: <defaults>
</compile_context>

<pallas_src>
import numpy as np

import jax
import jax.numpy as jnp
from jax.experimental import pallas as pl
from jax.experimental.pallas import tpu as pltpu


# ----------------------------------------------------------------------------
# Fused forward kernel
# ----------------------------------------------------------------------------
def _fused_forward_kernel(x_ref, t1_ref, w1_ref, b1_ref,
                          t2_ref, w2_ref, b2_ref,
                          f1w_ref, f1b_ref, f2w_ref, f2b_ref,
                          out_ref, flat_ref):
    """Whole ConvNetwork forward on VMEM-resident data.

    Conv activation layout: rows = channel*B + batch, lanes = flattened spatial.
    Patch extraction (im2col) = right-multiply by 0/1 selection matrices T*.
    Channel mixing = left-multiply by batch-block-diagonal weight matrices W*.
    """
    f32 = jnp.float32
    kk1 = t1_ref.shape[0]            # 9 taps of conv1
    kk2 = t2_ref.shape[0]            # 9 taps of conv2
    batch = out_ref.shape[0]
    s2 = t2_ref.shape[2]             # conv2 output spatial size (Ho2*Wo2)
    n_c2 = w2_ref.shape[1] // batch  # conv2 output channels

    x = x_ref[...]                   # (B*C0, H*W)

    # ---- conv1 + ReLU:  h1[(c1*B + b), s1] ----
    h1 = jnp.zeros((w1_ref.shape[1], t1_ref.shape[2]), f32)
    for p in range(kk1):
        patch = jnp.dot(x, t1_ref[p], preferred_element_type=f32)        # (B*C0, S1)
        h1 = h1 + jnp.dot(w1_ref[p], patch, preferred_element_type=f32)  # (C1*B, S1)
    h1 = jnp.maximum(h1 + b1_ref[...], 0.0)

    # ---- conv2 (stride 2) + ReLU:  h2[(c2*B + b), s2] ----
    h2 = jnp.zeros((w2_ref.shape[1], s2), f32)
    for p in range(kk2):
        patch = jnp.dot(h1, t2_ref[p], preferred_element_type=f32)       # (C1*B, S2)
        h2 = h2 + jnp.dot(w2_ref[p], patch, preferred_element_type=f32)  # (C2*B, S2)
    h2 = jnp.maximum(h2 + b2_ref[...], 0.0)

    # ---- .view(B, -1) in PyTorch NCHW order: flat[b, c*S2 + s] = h2[c*B+b, s] ----
    for c in range(n_c2):
        flat_ref[:, c * s2:(c + 1) * s2] = h2[c * batch:(c + 1) * batch, :]

    # ---- fc1 + ReLU, fc2 ----
    flat = flat_ref[...]                                                  # (B, conv_out)
    y1 = jnp.dot(flat, f1w_ref[...], preferred_element_type=f32) + f1b_ref[...]
    y1 = jnp.maximum(y1, 0.0)
    y2 = jnp.dot(y1, f2w_ref[...], preferred_element_type=f32) + f2b_ref[...]
    out_ref[...] = y2.astype(out_ref.dtype)


def _full_block(arr):
    nd = arr.ndim
    return pl.BlockSpec(arr.shape, lambda i, _nd=nd: (0,) * _nd)


@jax.jit
def conv_network_forward(prep, x):
    """Mirrors ConvNetwork.forward: conv(x).view(B, -1) -> fc(...)."""
    B, C, H, W = x.shape
    x2 = x.reshape(B * C, H * W)          # free row-major NCHW flatten, no transpose
    n_actions = prep["f2w"].shape[1]
    conv_out = prep["f1w"].shape[0]
    operands = (x2, prep["t1"], prep["w1m"], prep["b1col"],
                prep["t2"], prep["w2m"], prep["b2col"],
                prep["f1w"], prep["f1b"], prep["f2w"], prep["f2b"])
    return pl.pallas_call(
        _fused_forward_kernel,
        out_shape=jax.ShapeDtypeStruct((B, n_actions), jnp.float32),
        grid=(1,),
        in_specs=[_full_block(a) for a in operands],
        out_specs=pl.BlockSpec((B, n_actions), lambda i: (0, 0)),
        scratch_shapes=[pltpu.VMEM((B, conv_out), jnp.float32)],
        compiler_params=pltpu.CompilerParams(
            dimension_semantics=("arbitrary",)),
    )(*operands)


# ----------------------------------------------------------------------------
# Parameters (deterministic, shapes implied by the module) + one-time prep
# ----------------------------------------------------------------------------
def make_params(key, in_channels=4, n_actions=4, hidden=32, spatial=16):
    ks = jax.random.split(key, 8)

    def uniform(k, shape, fan_in):
        bound = 1.0 / jnp.sqrt(jnp.float32(fan_in))
        return jax.random.uniform(k, shape, jnp.float32, -bound, bound)

    # conv1: Conv2d(in, 8, 3, stride=1); conv2: Conv2d(8, 16, 3, stride=2)
    c1_w = uniform(ks[0], (8, in_channels, 3, 3), in_channels * 9)
    c1_b = uniform(ks[1], (8,), in_channels * 9)
    c2_w = uniform(ks[2], (16, 8, 3, 3), 8 * 9)
    c2_b = uniform(ks[3], (16,), 8 * 9)

    # _get_conv_out equivalent (static arithmetic, no zero pass needed)
    h1 = spatial - 3 + 1                  # conv1, stride 1
    h2 = (h1 - 3) // 2 + 1                # conv2, stride 2
    conv_out = 16 * h2 * h2

    f1_w = uniform(ks[4], (conv_out, hidden), conv_out)
    f1_b = uniform(ks[5], (hidden,), conv_out)
    f2_w = uniform(ks[6], (hidden, n_actions), hidden)
    f2_b = uniform(ks[7], (n_actions,), hidden)

    return dict(c1_w=c1_w, c1_b=c1_b, c2_w=c2_w, c2_b=c2_b,
                f1_w=f1_w, f1_b=f1_b, f2_w=f2_w, f2_b=f2_b)


def prepare_fused(params, batch, spatial):
    """Precompute (once, at init) the constant matrices the fused kernel consumes."""
    c1w = np.asarray(params["c1_w"]); c1b = np.asarray(params["c1_b"])
    c2w = np.asarray(params["c2_w"]); c2b = np.asarray(params["c2_b"])
    C1, C0, k1, _ = c1w.shape            # (8, 4, 3, 3)
    C2, _, k2, _ = c2w.shape             # (16, 8, 3, 3)
    H = W = spatial
    st1, st2 = 1, 2
    H1 = (H - k1) // st1 + 1             # 14
    H2 = (H1 - k2) // st2 + 1            # 6
    S0, S1, S2 = H * W, H1 * H1, H2 * H2

    # conv1: spatial selection T1[p, h*W+w, ho*H1+wo]; channel mix W1m (block-diag in b).
    # x2 rows are (b*C0 + ci) (NCHW flatten); h1 rows are (c1*B + b).
    t1 = np.zeros((k1 * k1, S0, S1), np.float32)
    w1m = np.zeros((k1 * k1, C1 * batch, batch * C0), np.float32)
    for kh in range(k1):
        for kw in range(k1):
            p = kh * k1 + kw
            for ho in range(H1):
                for wo in range(H1):
                    t1[p, (ho * st1 + kh) * W + (wo * st1 + kw), ho * H1 + wo] = 1.0
            for b in range(batch):
                for co in range(C1):
                    for ci in range(C0):
                        w1m[p, co * batch + b, b * C0 + ci] = c1w[co, ci, kh, kw]
    b1col = np.repeat(c1b, batch).reshape(C1 * batch, 1)

    # conv2 (stride 2): h1 rows (c1*B + b) -> h2 rows (c2*B + b)
    t2 = np.zeros((k2 * k2, S1, S2), np.float32)
    w2m = np.zeros((k2 * k2, C2 * batch, C1 * batch), np.float32)
    for kh in range(k2):
        for kw in range(k2):
            p = kh * k2 + kw
            for ho in range(H2):
                for wo in range(H2):
                    t2[p, (ho * st2 + kh) * H1 + (wo * st2 + kw), ho * H2 + wo] = 1.0
            for b in range(batch):
                for co in range(C2):
                    for ci in range(C1):
                        w2m[p, co * batch + b, ci * batch + b] = c2w[co, ci, kh, kw]
    b2col = np.repeat(c2b, batch).reshape(C2 * batch, 1)

    return dict(
        t1=jnp.asarray(t1), w1m=jnp.asarray(w1m), b1col=jnp.asarray(b1col),
        t2=jnp.asarray(t2), w2m=jnp.asarray(w2m), b2col=jnp.asarray(b2col),
        f1w=params["f1_w"], f1b=params["f1_b"].reshape(1, -1),
        f2w=params["f2_w"], f2b=params["f2_b"].reshape(1, -1),
    )


# ----------------------------------------------------------------------------
# Pure-JAX reference (PyTorch semantics) for a correctness self-check
# ----------------------------------------------------------------------------
def reference_forward(params, x):
    dn = ('NCHW', 'OIHW', 'NCHW')
    h = jax.lax.conv_general_dilated(x, params["c1_w"], window_strides=(1, 1),
                                     padding='VALID', dimension_numbers=dn)
    h = jnp.maximum(h + params["c1_b"][None, :, None, None], 0.0)
    h = jax.lax.conv_general_dilated(h, params["c2_w"], window_strides=(2, 2),
                                     padding='VALID', dimension_numbers=dn)
    h = jnp.maximum(h + params["c2_b"][None, :, None, None], 0.0)
    flat = h.reshape(x.shape[0], -1)
    y = jnp.maximum(flat @ params["f1_w"] + params["f1_b"], 0.0)
    return y @ params["f2_w"] + params["f2_b"]


if __name__ == "__main__":
    B, C, H, W = 2, 4, 16, 16
    n_actions, hidden = 4, 32

    x = jax.random.normal(jax.random.PRNGKey(0), (B, C, H, W), dtype=jnp.float32)
    params = make_params(jax.random.PRNGKey(42), in_channels=C,
                         n_actions=n_actions, hidden=hidden, spatial=H)
    prep = prepare_fused(params, batch=B, spatial=H)

    out = conv_network_forward(prep, x)
    out = jax.block_until_ready(out)
    assert out.shape == (B, n_actions), out.shape

    ref = reference_forward(params, x)
    np.testing.assert_allclose(np.asarray(out), np.asarray(ref), rtol=3e-2, atol=3e-2)

    print("KERNEL_OK")
</pallas_src>

<mosaic_0001>
module attributes {stable_mosaic.version = 11 : i64} {
  func.func @_fused_forward_kernel(%arg0: i32, %arg1: memref<8x256xf32, #tpu.memory_space<vmem>>, %arg2: memref<9x256x196xf32, #tpu.memory_space<vmem>>, %arg3: memref<9x16x8xf32, #tpu.memory_space<vmem>>, %arg4: memref<16x1xf32, #tpu.memory_space<vmem>>, %arg5: memref<9x196x36xf32, #tpu.memory_space<vmem>>, %arg6: memref<9x32x16xf32, #tpu.memory_space<vmem>>, %arg7: memref<32x1xf32, #tpu.memory_space<vmem>>, %arg8: memref<576x32xf32, #tpu.memory_space<vmem>>, %arg9: memref<1x32xf32, #tpu.memory_space<vmem>>, %arg10: memref<32x4xf32, #tpu.memory_space<vmem>>, %arg11: memref<1x4xf32, #tpu.memory_space<vmem>>, %arg12: memref<2x4xf32, #tpu.memory_space<vmem>>, %arg13: memref<2x576xf32, #tpu.memory_space<vmem>>) attributes {dimension_semantics = [#tpu.dimension_semantics<arbitrary>], iteration_bounds = array<i64: 1>, scalar_prefetch = 0 : i64, scratch_operands = 1 : i64, tpu.core_type = #tpu.core_type<tc>, window_params = [{pipeline_mode = #tpu.pipeline_mode<synchronous>, transform_indices = @transform_0, window_bounds = array<i64: 8, 256>}, {pipeline_mode = #tpu.pipeline_mode<synchronous>, transform_indices = @transform_1, window_bounds = array<i64: 9, 256, 196>}, {pipeline_mode = #tpu.pipeline_mode<synchronous>, transform_indices = @transform_2, window_bounds = array<i64: 9, 16, 8>}, {pipeline_mode = #tpu.pipeline_mode<synchronous>, transform_indices = @transform_3, window_bounds = array<i64: 16, 1>}, {pipeline_mode = #tpu.pipeline_mode<synchronous>, transform_indices = @transform_4, window_bounds = array<i64: 9, 196, 36>}, {pipeline_mode = #tpu.pipeline_mode<synchronous>, transform_indices = @transform_5, window_bounds = array<i64: 9, 32, 16>}, {pipeline_mode = #tpu.pipeline_mode<synchronous>, transform_indices = @transform_6, window_bounds = array<i64: 32, 1>}, {pipeline_mode = #tpu.pipeline_mode<synchronous>, transform_indices = @transform_7, window_bounds = array<i64: 576, 32>}, {pipeline_mode = #tpu.pipeline_mode<synchronous>, transform_indices = @transform_8, window_bounds = array<i64: 1, 32>}, {pipeline_mode = #tpu.pipeline_mode<synchronous>, transform_indices = @transform_9, window_bounds = array<i64: 32, 4>}, {pipeline_mode = #tpu.pipeline_mode<synchronous>, transform_indices = @transform_10, window_bounds = array<i64: 1, 4>}, {pipeline_mode = #tpu.pipeline_mode<synchronous>, transform_indices = @transform_11, window_bounds = array<i64: 2, 4>}]} {
    %c0 = arith.constant 0 : index
    %c0_0 = arith.constant 0 : index
    %0 = vector.load %arg1[%c0, %c0_0] : memref<8x256xf32, #tpu.memory_space<vmem>>, vector<8x256xf32>
    %cst = arith.constant 0.000000e+00 : f32
    %1 = vector.broadcast %cst : f32 to vector<16x196xf32>
    %c0_1 = arith.constant 0 : index
    %c0_2 = arith.constant 0 : index
    %c0_3 = arith.constant 0 : index
    %2 = vector.load %arg2[%c0_1, %c0_2, %c0_3] : memref<9x256x196xf32, #tpu.memory_space<vmem>>, vector<1x256x196xf32>
    %3 = vector.shape_cast %2 : vector<1x256x196xf32> to vector<256x196xf32>
    %cst_4 = arith.constant dense<0.000000e+00> : vector<8x196xf32>
    %4 = tpu.matmul %0, %3, %cst_4 {dimension_numbers = #tpu.dot_dimension_numbers<[1], [0], [0], [1], [0, 0, 1, 1], [], []>} : vector<8x256xf32>, vector<256x196xf32>, vector<8x196xf32> -> vector<8x196xf32>
    %c0_5 = arith.constant 0 : index
    %c0_6 = arith.constant 0 : index
    %c0_7 = arith.constant 0 : index
    %5 = vector.load %arg3[%c0_5, %c0_6, %c0_7] : memref<9x16x8xf32, #tpu.memory_space<vmem>>, vector<1x16x8xf32>
    %6 = vector.shape_cast %5 : vector<1x16x8xf32> to vector<16x8xf32>
    %cst_8 = arith.constant dense<0.000000e+00> : vector<16x196xf32>
    %7 = tpu.matmul %6, %4, %cst_8 {dimension_numbers = #tpu.dot_dimension_numbers<[1], [0], [0], [1], [0, 0, 1, 1], [], []>} : vector<16x8xf32>, vector<8x196xf32>, vector<16x196xf32> -> vector<16x196xf32>
    %8 = arith.addf %1, %7 : vector<16x196xf32>
    %c1 = arith.constant 1 : index
    %c0_9 = arith.constant 0 : index
    %c0_10 = arith.constant 0 : index
    %9 = vector.load %arg2[%c1, %c0_9, %c0_10] : memref<9x256x196xf32, #tpu.memory_space<vmem>>, vector<1x256x196xf32>
    %10 = vector.shape_cast %9 : vector<1x256x196xf32> to vector<256x196xf32>
    %cst_11 = arith.constant dense<0.000000e+00> : vector<8x196xf32>
    %11 = tpu.matmul %0, %10, %cst_11 {dimension_numbers = #tpu.dot_dimension_numbers<[1], [0], [0], [1], [0, 0, 1, 1], [], []>} : vector<8x256xf32>, vector<256x196xf32>, vector<8x196xf32> -> vector<8x196xf32>
    %c1_12 = arith.constant 1 : index
    %c0_13 = arith.constant 0 : index
    %c0_14 = arith.constant 0 : index
    %12 = vector.load %arg3[%c1_12, %c0_13, %c0_14] : memref<9x16x8xf32, #tpu.memory_space<vmem>>, vector<1x16x8xf32>
    %13 = vector.shape_cast %12 : vector<1x16x8xf32> to vector<16x8xf32>
    %cst_15 = arith.constant dense<0.000000e+00> : vector<16x196xf32>
    %14 = tpu.matmul %13, %11, %cst_15 {dimension_numbers = #tpu.dot_dimension_numbers<[1], [0], [0], [1], [0, 0, 1, 1], [], []>} : vector<16x8xf32>, vector<8x196xf32>, vector<16x196xf32> -> vector<16x196xf32>
    %15 = arith.addf %8, %14 : vector<16x196xf32>
    %c2 = arith.constant 2 : index
    %c0_16 = arith.constant 0 : index
    %c0_17 = arith.constant 0 : index
    %16 = vector.load %arg2[%c2, %c0_16, %c0_17] : memref<9x256x196xf32, #tpu.memory_space<vmem>>, vector<1x256x196xf32>
    %17 = vector.shape_cast %16 : vector<1x256x196xf32> to vector<256x196xf32>
    %cst_18 = arith.constant dense<0.000000e+00> : vector<8x196xf32>
    %18 = tpu.matmul %0, %17, %cst_18 {dimension_numbers = #tpu.dot_dimension_numbers<[1], [0], [0], [1], [0, 0, 1, 1], [], []>} : vector<8x256xf32>, vector<256x196xf32>, vector<8x196xf32> -> vector<8x196xf32>
    %c2_19 = arith.constant 2 : index
    %c0_20 = arith.constant 0 : index
    %c0_21 = arith.constant 0 : index
    %19 = vector.load %arg3[%c2_19, %c0_20, %c0_21] : memref<9x16x8xf32, #tpu.memory_space<vmem>>, vector<1x16x8xf32>
    %20 = vector.shape_cast %19 : vector<1x16x8xf32> to vector<16x8xf32>
    %cst_22 = arith.constant dense<0.000000e+00> : vector<16x196xf32>
    %21 = tpu.matmul %20, %18, %cst_22 {dimension_numbers = #tpu.dot_dimension_numbers<[1], [0], [0], [1], [0, 0, 1, 1], [], []>} : vector<16x8xf32>, vector<8x196xf32>, vector<16x196xf32> -> vector<16x196xf32>
    %22 = arith.addf %15, %21 : vector<16x196xf32>
    %c3 = arith.constant 3 : index
    %c0_23 = arith.constant 0 : index
    %c0_24 = arith.constant 0 : index
    %23 = vector.load %arg2[%c3, %c0_23, %c0_24] : memref<9x256x196xf32, #tpu.memory_space<vmem>>, vector<1x256x196xf32>
    %24 = vector.shape_cast %23 : vector<1x256x196xf32> to vector<256x196xf32>
    %cst_25 = arith.constant dense<0.000000e+00> : vector<8x196xf32>
    %25 = tpu.matmul %0, %24, %cst_25 {dimension_numbers = #tpu.dot_dimension_numbers<[1], [0], [0], [1], [0, 0, 1, 1], [], []>} : vector<8x256xf32>, vector<256x196xf32>, vector<8x196xf32> -> vector<8x196xf32>
    %c3_26 = arith.constant 3 : index
    %c0_27 = arith.constant 0 : index
    %c0_28 = arith.constant 0 : index
    %26 = vector.load %arg3[%c3_26, %c0_27, %c0_28] : memref<9x16x8xf32, #tpu.memory_space<vmem>>, vector<1x16x8xf32>
    %27 = vector.shape_cast %26 : vector<1x16x8xf32> to vector<16x8xf32>
    %cst_29 = arith.constant dense<0.000000e+00> : vector<16x196xf32>
    %28 = tpu.matmul %27, %25, %cst_29 {dimension_numbers = #tpu.dot_dimension_numbers<[1], [0], [0], [1], [0, 0, 1, 1], [], []>} : vector<16x8xf32>, vector<8x196xf32>, vector<16x196xf32> -> vector<16x196xf32>
    %29 = arith.addf %22, %28 : vector<16x196xf32>
    %c4 = arith.constant 4 : index
    %c0_30 = arith.constant 0 : index
    %c0_31 = arith.constant 0 : index
    %30 = vector.load %arg2[%c4, %c0_30, %c0_31] : memref<9x256x196xf32, #tpu.memory_space<vmem>>, vector<1x256x196xf32>
    %31 = vector.shape_cast %30 : vector<1x256x196xf32> to vector<256x196xf32>
    %cst_32 = arith.constant dense<0.000000e+00> : vector<8x196xf32>
    %32 = tpu.matmul %0, %31, %cst_32 {dimension_numbers = #tpu.dot_dimension_numbers<[1], [0], [0], [1], [0, 0, 1, 1], [], []>} : vector<8x256xf32>, vector<256x196xf32>, vector<8x196xf32> -> vector<8x196xf32>
    %c4_33 = arith.constant 4 : index
    %c0_34 = arith.constant 0 : index
    %c0_35 = arith.constant 0 : index
    %33 = vector.load %arg3[%c4_33, %c0_34, %c0_35] : memref<9x16x8xf32, #tpu.memory_space<vmem>>, vector<1x16x8xf32>
    %34 = vector.shape_cast %33 : vector<1x16x8xf32> to vector<16x8xf32>
    %cst_36 = arith.constant dense<0.000000e+00> : vector<16x196xf32>
    %35 = tpu.matmul %34, %32, %cst_36 {dimension_numbers = #tpu.dot_dimension_numbers<[1], [0], [0], [1], [0, 0, 1, 1], [], []>} : vector<16x8xf32>, vector<8x196xf32>, vector<16x196xf32> -> vector<16x196xf32>
    %36 = arith.addf %29, %35 : vector<16x196xf32>
    %c5 = arith.constant 5 : index
    %c0_37 = arith.constant 0 : index
    %c0_38 = arith.constant 0 : index
    %37 = vector.load %arg2[%c5, %c0_37, %c0_38] : memref<9x256x196xf32, #tpu.memory_space<vmem>>, vector<1x256x196xf32>
    %38 = vector.shape_cast %37 : vector<1x256x196xf32> to vector<256x196xf32>
    %cst_39 = arith.constant dense<0.000000e+00> : vector<8x196xf32>
    %39 = tpu.matmul %0, %38, %cst_39 {dimension_numbers = #tpu.dot_dimension_numbers<[1], [0], [0], [1], [0, 0, 1, 1], [], []>} : vector<8x256xf32>, vector<256x196xf32>, vector<8x196xf32> -> vector<8x196xf32>
    %c5_40 = arith.constant 5 : index
    %c0_41 = arith.constant 0 : index
    %c0_42 = arith.constant 0 : index
    %40 = vector.load %arg3[%c5_40, %c0_41, %c0_42] : memref<9x16x8xf32, #tpu.memory_space<vmem>>, vector<1x16x8xf32>
    %41 = vector.shape_cast %40 : vector<1x16x8xf32> to vector<16x8xf32>
    %cst_43 = arith.constant dense<0.000000e+00> : vector<16x196xf32>
    %42 = tpu.matmul %41, %39, %cst_43 {dimension_numbers = #tpu.dot_dimension_numbers<[1], [0], [0], [1], [0, 0, 1, 1], [], []>} : vector<16x8xf32>, vector<8x196xf32>, vector<16x196xf32> -> vector<16x196xf32>
    %43 = arith.addf %36, %42 : vector<16x196xf32>
    %c6 = arith.constant 6 : index
    %c0_44 = arith.constant 0 : index
    %c0_45 = arith.constant 0 : index
    %44 = vector.load %arg2[%c6, %c0_44, %c0_45] : memref<9x256x196xf32, #tpu.memory_space<vmem>>, vector<1x256x196xf32>
    %45 = vector.shape_cast %44 : vector<1x256x196xf32> to vector<256x196xf32>
    %cst_46 = arith.constant dense<0.000000e+00> : vector<8x196xf32>
    %46 = tpu.matmul %0, %45, %cst_46 {dimension_numbers = #tpu.dot_dimension_numbers<[1], [0], [0], [1], [0, 0, 1, 1], [], []>} : vector<8x256xf32>, vector<256x196xf32>, vector<8x196xf32> -> vector<8x196xf32>
    %c6_47 = arith.constant 6 : index
    %c0_48 = arith.constant 0 : index
    %c0_49 = arith.constant 0 : index
    %47 = vector.load %arg3[%c6_47, %c0_48, %c0_49] : memref<9x16x8xf32, #tpu.memory_space<vmem>>, vector<1x16x8xf32>
    %48 = vector.shape_cast %47 : vector<1x16x8xf32> to vector<16x8xf32>
    %cst_50 = arith.constant dense<0.000000e+00> : vector<16x196xf32>
    %49 = tpu.matmul %48, %46, %cst_50 {dimension_numbers = #tpu.dot_dimension_numbers<[1], [0], [0], [1], [0, 0, 1, 1], [], []>} : vector<16x8xf32>, vector<8x196xf32>, vector<16x196xf32> -> vector<16x196xf32>
    %50 = arith.addf %43, %49 : vector<16x196xf32>
    %c7 = arith.constant 7 : index
    %c0_51 = arith.constant 0 : index
    %c0_52 = arith.constant 0 : index
    %51 = vector.load %arg2[%c7, %c0_51, %c0_52] : memref<9x256x196xf32, #tpu.memory_space<vmem>>, vector<1x256x196xf32>
    %52 = vector.shape_cast %51 : vector<1x256x196xf32> to vector<256x196xf32>
    %cst_53 = arith.constant dense<0.000000e+00> : vector<8x196xf32>
    %53 = tpu.matmul %0, %52, %cst_53 {dimension_numbers = #tpu.dot_dimension_numbers<[1], [0], [0], [1], [0, 0, 1, 1], [], []>} : vector<8x256xf32>, vector<256x196xf32>, vector<8x196xf32> -> vector<8x196xf32>
    %c7_54 = arith.constant 7 : index
    %c0_55 = arith.constant 0 : index
    %c0_56 = arith.constant 0 : index
    %54 = vector.load %arg3[%c7_54, %c0_55, %c0_56] : memref<9x16x8xf32, #tpu.memory_space<vmem>>, vector<1x16x8xf32>
    %55 = vector.shape_cast %54 : vector<1x16x8xf32> to vector<16x8xf32>
    %cst_57 = arith.constant dense<0.000000e+00> : vector<16x196xf32>
    %56 = tpu.matmul %55, %53, %cst_57 {dimension_numbers = #tpu.dot_dimension_numbers<[1], [0], [0], [1], [0, 0, 1, 1], [], []>} : vector<16x8xf32>, vector<8x196xf32>, vector<16x196xf32> -> vector<16x196xf32>
    %57 = arith.addf %50, %56 : vector<16x196xf32>
    %c8 = arith.constant 8 : index
    %c0_58 = arith.constant 0 : index
    %c0_59 = arith.constant 0 : index
    %58 = vector.load %arg2[%c8, %c0_58, %c0_59] : memref<9x256x196xf32, #tpu.memory_space<vmem>>, vector<1x256x196xf32>
    %59 = vector.shape_cast %58 : vector<1x256x196xf32> to vector<256x196xf32>
    %cst_60 = arith.constant dense<0.000000e+00> : vector<8x196xf32>
    %60 = tpu.matmul %0, %59, %cst_60 {dimension_numbers = #tpu.dot_dimension_numbers<[1], [0], [0], [1], [0, 0, 1, 1], [], []>} : vector<8x256xf32>, vector<256x196xf32>, vector<8x196xf32> -> vector<8x196xf32>
    %c8_61 = arith.constant 8 : index
    %c0_62 = arith.constant 0 : index
    %c0_63 = arith.constant 0 : index
    %61 = vector.load %arg3[%c8_61, %c0_62, %c0_63] : memref<9x16x8xf32, #tpu.memory_space<vmem>>, vector<1x16x8xf32>
    %62 = vector.shape_cast %61 : vector<1x16x8xf32> to vector<16x8xf32>
    %cst_64 = arith.constant dense<0.000000e+00> : vector<16x196xf32>
    %63 = tpu.matmul %62, %60, %cst_64 {dimension_numbers = #tpu.dot_dimension_numbers<[1], [0], [0], [1], [0, 0, 1, 1], [], []>} : vector<16x8xf32>, vector<8x196xf32>, vector<16x196xf32> -> vector<16x196xf32>
    %64 = arith.addf %57, %63 : vector<16x196xf32>
    %c0_65 = arith.constant 0 : index
    %c0_66 = arith.constant 0 : index
    %65 = vector.load %arg4[%c0_65, %c0_66] : memref<16x1xf32, #tpu.memory_space<vmem>>, vector<16x1xf32>
    %66 = vector.broadcast %65 : vector<16x1xf32> to vector<16x196xf32>
    %67 = arith.addf %64, %66 : vector<16x196xf32>
    %cst_67 = arith.constant 0.000000e+00 : f32
    %68 = vector.broadcast %cst_67 : f32 to vector<16x196xf32>
    %69 = arith.maximumf %67, %68 : vector<16x196xf32>
    %cst_68 = arith.constant 0.000000e+00 : f32
    %70 = vector.broadcast %cst_68 : f32 to vector<32x36xf32>
    %c0_69 = arith.constant 0 : index
    %c0_70 = arith.constant 0 : index
    %c0_71 = arith.constant 0 : index
    %71 = vector.load %arg5[%c0_69, %c0_70, %c0_71] : memref<9x196x36xf32, #tpu.memory_space<vmem>>, vector<1x196x36xf32>
    %72 = vector.shape_cast %71 : vector<1x196x36xf32> to vector<196x36xf32>
    %cst_72 = arith.constant dense<0.000000e+00> : vector<16x36xf32>
    %73 = tpu.matmul %69, %72, %cst_72 {dimension_numbers = #tpu.dot_dimension_numbers<[1], [0], [0], [1], [0, 0, 1, 1], [], []>} : vector<16x196xf32>, vector<196x36xf32>, vector<16x36xf32> -> vector<16x36xf32>
    %c0_73 = arith.constant 0 : index
    %c0_74 = arith.constant 0 : index
    %c0_75 = arith.constant 0 : index
    %74 = vector.load %arg6[%c0_73, %c0_74, %c0_75] : memref<9x32x16xf32, #tpu.memory_space<vmem>>, vector<1x32x16xf32>
    %75 = vector.shape_cast %74 : vector<1x32x16xf32> to vector<32x16xf32>
    %cst_76 = arith.constant dense<0.000000e+00> : vector<32x36xf32>
    %76 = tpu.matmul %75, %73, %cst_76 {dimension_numbers = #tpu.dot_dimension_numbers<[1], [0], [0], [1], [0, 0, 1, 1], [], []>} : vector<32x16xf32>, vector<16x36xf32>, vector<32x36xf32> -> vector<32x36xf32>
    %77 = arith.addf %70, %76 : vector<32x36xf32>
    %c1_77 = arith.constant 1 : index
    %c0_78 = arith.constant 0 : index
    %c0_79 = arith.constant 0 : index
    %78 = vector.load %arg5[%c1_77, %c0_78, %c0_79] : memref<9x196x36xf32, #tpu.memory_space<vmem>>, vector<1x196x36xf32>
    %79 = vector.shape_cast %78 : vector<1x196x36xf32> to vector<196x36xf32>
    %cst_80 = arith.constant dense<0.000000e+00> : vector<16x36xf32>
    %80 = tpu.matmul %69, %79, %cst_80 {dimension_numbers = #tpu.dot_dimension_numbers<[1], [0], [0], [1], [0, 0, 1, 1], [], []>} : vector<16x196xf32>, vector<196x36xf32>, vector<16x36xf32> -> vector<16x36xf32>
    %c1_81 = arith.constant 1 : index
    %c0_82 = arith.constant 0 : index
    %c0_83 = arith.constant 0 : index
    %81 = vector.load %arg6[%c1_81, %c0_82, %c0_83] : memref<9x32x16xf32, #tpu.memory_space<vmem>>, vector<1x32x16xf32>
    %82 = vector.shape_cast %81 : vector<1x32x16xf32> to vector<32x16xf32>
    %cst_84 = arith.constant dense<0.000000e+00> : vector<32x36xf32>
    %83 = tpu.matmul %82, %80, %cst_84 {dimension_numbers = #tpu.dot_dimension_numbers<[1], [0], [0], [1], [0, 0, 1, 1], [], []>} : vector<32x16xf32>, vector<16x36xf32>, vector<32x36xf32> -> vector<32x36xf32>
    %84 = arith.addf %77, %83 : vector<32x36xf32>
    %c2_85 = arith.constant 2 : index
    %c0_86 = arith.constant 0 : index
    %c0_87 = arith.constant 0 : index
    %85 = vector.load %arg5[%c2_85, %c0_86, %c0_87] : memref<9x196x36xf32, #tpu.memory_space<vmem>>, vector<1x196x36xf32>
    %86 = vector.shape_cast %85 : vector<1x196x36xf32> to vector<196x36xf32>
    %cst_88 = arith.constant dense<0.000000e+00> : vector<16x36xf32>
    %87 = tpu.matmul %69, %86, %cst_88 {dimension_numbers = #tpu.dot_dimension_numbers<[1], [0], [0], [1], [0, 0, 1, 1], [], []>} : vector<16x196xf32>, vector<196x36xf32>, vector<16x36xf32> -> vector<16x36xf32>
    %c2_89 = arith.constant 2 : index
    %c0_90 = arith.constant 0 : index
    %c0_91 = arith.constant 0 : index
    %88 = vector.load %arg6[%c2_89, %c0_90, %c0_91] : memref<9x32x16xf32, #tpu.memory_space<vmem>>, vector<1x32x16xf32>
    %89 = vector.shape_cast %88 : vector<1x32x16xf32> to vector<32x16xf32>
    %cst_92 = arith.constant dense<0.000000e+00> : vector<32x36xf32>
    %90 = tpu.matmul %89, %87, %cst_92 {dimension_numbers = #tpu.dot_dimension_numbers<[1], [0], [0], [1], [0, 0, 1, 1], [], []>} : vector<32x16xf32>, vector<16x36xf32>, vector<32x36xf32> -> vector<32x36xf32>
    %91 = arith.addf %84, %90 : vector<32x36xf32>
    %c3_93 = arith.constant 3 : index
    %c0_94 = arith.constant 0 : index
    %c0_95 = arith.constant 0 : index
    %92 = vector.load %arg5[%c3_93, %c0_94, %c0_95] : memref<9x196x36xf32, #tpu.memory_space<vmem>>, vector<1x196x36xf32>
    %93 = vector.shape_cast %92 : vector<1x196x36xf32> to vector<196x36xf32>
    %cst_96 = arith.constant dense<0.000000e+00> : vector<16x36xf32>
    %94 = tpu.matmul %69, %93, %cst_96 {dimension_numbers = #tpu.dot_dimension_numbers<[1], [0], [0], [1], [0, 0, 1, 1], [], []>} : vector<16x196xf32>, vector<196x36xf32>, vector<16x36xf32> -> vector<16x36xf32>
    %c3_97 = arith.constant 3 : index
    %c0_98 = arith.constant 0 : index
    %c0_99 = arith.constant 0 : index
    %95 = vector.load %arg6[%c3_97, %c0_98, %c0_99] : memref<9x32x16xf32, #tpu.memory_space<vmem>>, vector<1x32x16xf32>
    %96 = vector.shape_cast %95 : vector<1x32x16xf32> to vector<32x16xf32>
    %cst_100 = arith.constant dense<0.000000e+00> : vector<32x36xf32>
    %97 = tpu.matmul %96, %94, %cst_100 {dimension_numbers = #tpu.dot_dimension_numbers<[1], [0], [0], [1], [0, 0, 1, 1], [], []>} : vector<32x16xf32>, vector<16x36xf32>, vector<32x36xf32> -> vector<32x36xf32>
    %98 = arith.addf %91, %97 : vector<32x36xf32>
    %c4_101 = arith.constant 4 : index
    %c0_102 = arith.constant 0 : index
    %c0_103 = arith.constant 0 : index
    %99 = vector.load %arg5[%c4_101, %c0_102, %c0_103] : memref<9x196x36xf32, #tpu.memory_space<vmem>>, vector<1x196x36xf32>
    %100 = vector.shape_cast %99 : vector<1x196x36xf32> to vector<196x36xf32>
    %cst_104 = arith.constant dense<0.000000e+00> : vector<16x36xf32>
    %101 = tpu.matmul %69, %100, %cst_104 {dimension_numbers = #tpu.dot_dimension_numbers<[1], [0], [0], [1], [0, 0, 1, 1], [], []>} : vector<16x196xf32>, vector<196x36xf32>, vector<16x36xf32> -> vector<16x36xf32>
    %c4_105 = arith.constant 4 : index
    %c0_106 = arith.constant 0 : index
    %c0_107 = arith.constant 0 : index
    %102 = vector.load %arg6[%c4_105, %c0_106, %c0_107] : memref<9x32x16xf32, #tpu.memory_space<vmem>>, vector<1x32x16xf32>
    %103 = vector.shape_cast %102 : vector<1x32x16xf32> to vector<32x16xf32>
    %cst_108 = arith.constant dense<0.000000e+00> : vector<32x36xf32>
    %104 = tpu.matmul %103, %101, %cst_108 {dimension_numbers = #tpu.dot_dimension_numbers<[1], [0], [0], [1], [0, 0, 1, 1], [], []>} : vector<32x16xf32>, vector<16x36xf32>, vector<32x36xf32> -> vector<32x36xf32>
    %105 = arith.addf %98, %104 : vector<32x36xf32>
    %c5_109 = arith.constant 5 : index
    %c0_110 = arith.constant 0 : index
    %c0_111 = arith.constant 0 : index
    %106 = vector.load %arg5[%c5_109, %c0_110, %c0_111] : memref<9x196x36xf32, #tpu.memory_space<vmem>>, vector<1x196x36xf32>
    %107 = vector.shape_cast %106 : vector<1x196x36xf32> to vector<196x36xf32>
    %cst_112 = arith.constant dense<0.000000e+00> : vector<16x36xf32>
    %108 = tpu.matmul %69, %107, %cst_112 {dimension_numbers = #tpu.dot_dimension_numbers<[1], [0], [0], [1], [0, 0, 1, 1], [], []>} : vector<16x196xf32>, vector<196x36xf32>, vector<16x36xf32> -> vector<16x36xf32>
    %c5_113 = arith.constant 5 : index
    %c0_114 = arith.constant 0 : index
    %c0_115 = arith.constant 0 : index
    %109 = vector.load %arg6[%c5_113, %c0_114, %c0_115] : memref<9x32x16xf32, #tpu.memory_space<vmem>>, vector<1x32x16xf32>
    %110 = vector.shape_cast %109 : vector<1x32x16xf32> to vector<32x16xf32>
    %cst_116 = arith.constant dense<0.000000e+00> : vector<32x36xf32>
    %111 = tpu.matmul %110, %108, %cst_116 {dimension_numbers = #tpu.dot_dimension_numbers<[1], [0], [0], [1], [0, 0, 1, 1], [], []>} : vector<32x16xf32>, vector<16x36xf32>, vector<32x36xf32> -> vector<32x36xf32>
    %112 = arith.addf %105, %111 : vector<32x36xf32>
    %c6_117 = arith.constant 6 : index
    %c0_118 = arith.constant 0 : index
    %c0_119 = arith.constant 0 : index
    %113 = vector.load %arg5[%c6_117, %c0_118, %c0_119] : memref<9x196x36xf32, #tpu.memory_space<vmem>>, vector<1x196x36xf32>
    %114 = vector.shape_cast %113 : vector<1x196x36xf32> to vector<196x36xf32>
    %cst_120 = arith.constant dense<0.000000e+00> : vector<16x36xf32>
    %115 = tpu.matmul %69, %114, %cst_120 {dimension_numbers = #tpu.dot_dimension_numbers<[1], [0], [0], [1], [0, 0, 1, 1], [], []>} : vector<16x196xf32>, vector<196x36xf32>, vector<16x36xf32> -> vector<16x36xf32>
    %c6_121 = arith.constant 6 : index
    %c0_122 = arith.constant 0 : index
    %c0_123 = arith.constant 0 : index
    %116 = vector.load %arg6[%c6_121, %c0_122, %c0_123] : memref<9x32x16xf32, #tpu.memory_space<vmem>>, vector<1x32x16xf32>
    %117 = vector.shape_cast %116 : vector<1x32x16xf32> to vector<32x16xf32>
    %cst_124 = arith.constant dense<0.000000e+00> : vector<32x36xf32>
    %118 = tpu.matmul %117, %115, %cst_124 {dimension_numbers = #tpu.dot_dimension_numbers<[1], [0], [0], [1], [0, 0, 1, 1], [], []>} : vector<32x16xf32>, vector<16x36xf32>, vector<32x36xf32> -> vector<32x36xf32>
    %119 = arith.addf %112, %118 : vector<32x36xf32>
    %c7_125 = arith.constant 7 : index
    %c0_126 = arith.constant 0 : index
    %c0_127 = arith.constant 0 : index
    %120 = vector.load %arg5[%c7_125, %c0_126, %c0_127] : memref<9x196x36xf32, #tpu.memory_space<vmem>>, vector<1x196x36xf32>
    %121 = vector.shape_cast %120 : vector<1x196x36xf32> to vector<196x36xf32>
    %cst_128 = arith.constant dense<0.000000e+00> : vector<16x36xf32>
    %122 = tpu.matmul %69, %121, %cst_128 {dimension_numbers = #tpu.dot_dimension_numbers<[1], [0], [0], [1], [0, 0, 1, 1], [], []>} : vector<16x196xf32>, vector<196x36xf32>, vector<16x36xf32> -> vector<16x36xf32>
    %c7_129 = arith.constant 7 : index
    %c0_130 = arith.constant 0 : index
    %c0_131 = arith.constant 0 : index
    %123 = vector.load %arg6[%c7_129, %c0_130, %c0_131] : memref<9x32x16xf32, #tpu.memory_space<vmem>>, vector<1x32x16xf32>
    %124 = vector.shape_cast %123 : vector<1x32x16xf32> to vector<32x16xf32>
    %cst_132 = arith.constant dense<0.000000e+00> : vector<32x36xf32>
    %125 = tpu.matmul %124, %122, %cst_132 {dimension_numbers = #tpu.dot_dimension_numbers<[1], [0], [0], [1], [0, 0, 1, 1], [], []>} : vector<32x16xf32>, vector<16x36xf32>, vector<32x36xf32> -> vector<32x36xf32>
    %126 = arith.addf %119, %125 : vector<32x36xf32>
    %c8_133 = arith.constant 8 : index
    %c0_134 = arith.constant 0 : index
    %c0_135 = arith.constant 0 : index
    %127 = vector.load %arg5[%c8_133, %c0_134, %c0_135] : memref<9x196x36xf32, #tpu.memory_space<vmem>>, vector<1x196x36xf32>
    %128 = vector.shape_cast %127 : vector<1x196x36xf32> to vector<196x36xf32>
    %cst_136 = arith.constant dense<0.000000e+00> : vector<16x36xf32>
    %129 = tpu.matmul %69, %128, %cst_136 {dimension_numbers = #tpu.dot_dimension_numbers<[1], [0], [0], [1], [0, 0, 1, 1], [], []>} : vector<16x196xf32>, vector<196x36xf32>, vector<16x36xf32> -> vector<16x36xf32>
    %c8_137 = arith.constant 8 : index
    %c0_138 = arith.constant 0 : index
    %c0_139 = arith.constant 0 : index
    %130 = vector.load %arg6[%c8_137, %c0_138, %c0_139] : memref<9x32x16xf32, #tpu.memory_space<vmem>>, vector<1x32x16xf32>
    %131 = vector.shape_cast %130 : vector<1x32x16xf32> to vector<32x16xf32>
    %cst_140 = arith.constant dense<0.000000e+00> : vector<32x36xf32>
    %132 = tpu.matmul %131, %129, %cst_140 {dimension_numbers = #tpu.dot_dimension_numbers<[1], [0], [0], [1], [0, 0, 1, 1], [], []>} : vector<32x16xf32>, vector<16x36xf32>, vector<32x36xf32> -> vector<32x36xf32>
    %133 = arith.addf %126, %132 : vector<32x36xf32>
    %c0_141 = arith.constant 0 : index
    %c0_142 = arith.constant 0 : index
    %134 = vector.load %arg7[%c0_141, %c0_142] : memref<32x1xf32, #tpu.memory_space<vmem>>, vector<32x1xf32>
    %135 = vector.broadcast %134 : vector<32x1xf32> to vector<32x36xf32>
    %136 = arith.addf %133, %135 : vector<32x36xf32>
    %cst_143 = arith.constant 0.000000e+00 : f32
    %137 = vector.broadcast %cst_143 : f32 to vector<32x36xf32>
    %138 = arith.maximumf %136, %137 : vector<32x36xf32>
    %139 = vector.extract_strided_slice %138 {offsets = [0, 0], sizes = [2, 36], strides = [1, 1]} : vector<32x36xf32> to vector<2x36xf32>
    %c0_144 = arith.constant 0 : index
    %c0_145 = arith.constant 0 : index
    %140 = vector.load %arg13[%c0_144, %c0_145] : memref<2x576xf32, #tpu.memory_space<vmem>>, vector<2x36xf32>
    tpu.vector_store %arg13[%c0_144, %c0_145], %139 {strides = array<i32>} : memref<2x576xf32, #tpu.memory_space<vmem>>, vector<2x36xf32>,
    %141 = vector.extract_strided_slice %138 {offsets = [2, 0], sizes = [2, 36], strides = [1, 1]} : vector<32x36xf32> to vector<2x36xf32>
    %c0_146 = arith.constant 0 : index
    %c36 = arith.constant 36 : index
    %142 = vector.load %arg13[%c0_146, %c36] : memref<2x576xf32, #tpu.memory_space<vmem>>, vector<2x36xf32>
    tpu.vector_store %arg13[%c0_146, %c36], %141 {strides = array<i32>} : memref<2x576xf32, #tpu.memory_space<vmem>>, vector<2x36xf32>,
    %143 = vector.extract_strided_slice %138 {offsets = [4, 0], sizes = [2, 36], strides = [1, 1]} : vector<32x36xf32> to vector<2x36xf32>
    %c0_147 = arith.constant 0 : index
    %c72 = arith.constant 72 : index
    %144 = vector.load %arg13[%c0_147, %c72] : memref<2x576xf32, #tpu.memory_space<vmem>>, vector<2x36xf32>
    tpu.vector_store %arg13[%c0_147, %c72], %143 {strides = array<i32>} : memref<2x576xf32, #tpu.memory_space<vmem>>, vector<2x36xf32>,
    %145 = vector.extract_strided_slice %138 {offsets = [6, 0], sizes = [2, 36], strides = [1, 1]} : vector<32x36xf32> to vector<2x36xf32>
    %c0_148 = arith.constant 0 : index
    %c108 = arith.constant 108 : index
    %146 = vector.load %arg13[%c0_148, %c108] : memref<2x576xf32, #tpu.memory_space<vmem>>, vector<2x36xf32>
    tpu.vector_store %arg13[%c0_148, %c108], %145 {strides = array<i32>} : memref<2x576xf32, #tpu.memory_space<vmem>>, vector<2x36xf32>,
    %147 = vector.extract_strided_slice %138 {offsets = [8, 0], sizes = [2, 36], strides = [1, 1]} : vector<32x36xf32> to vector<2x36xf32>
    %c0_149 = arith.constant 0 : index
    %c144 = arith.constant 144 : index
    %148 = vector.load %arg13[%c0_149, %c144] : memref<2x576xf32, #tpu.memory_space<vmem>>, vector<2x36xf32>
    tpu.vector_store %arg13[%c0_149, %c144], %147 {strides = array<i32>} : memref<2x576xf32, #tpu.memory_space<vmem>>, vector<2x36xf32>,
    %149 = vector.extract_strided_slice %138 {offsets = [10, 0], sizes = [2, 36], strides = [1, 1]} : vector<32x36xf32> to vector<2x36xf32>
    %c0_150 = arith.constant 0 : index
    %c180 = arith.constant 180 : index
    %150 = vector.load %arg13[%c0_150, %c180] : memref<2x576xf32, #tpu.memory_space<vmem>>, vector<2x36xf32>
    tpu.vector_store %arg13[%c0_150, %c180], %149 {strides = array<i32>} : memref<2x576xf32, #tpu.memory_space<vmem>>, vector<2x36xf32>,
    %151 = vector.extract_strided_slice %138 {offsets = [12, 0], sizes = [2, 36], strides = [1, 1]} : vector<32x36xf32> to vector<2x36xf32>
    %c0_151 = arith.constant 0 : index
    %c216 = arith.constant 216 : index
    %152 = vector.load %arg13[%c0_151, %c216] : memref<2x576xf32, #tpu.memory_space<vmem>>, vector<2x36xf32>
    tpu.vector_store %arg13[%c0_151, %c216], %151 {strides = array<i32>} : memref<2x576xf32, #tpu.memory_space<vmem>>, vector<2x36xf32>,
    %153 = vector.extract_strided_slice %138 {offsets = [14, 0], sizes = [2, 36], strides = [1, 1]} : vector<32x36xf32> to vector<2x36xf32>
    %c0_152 = arith.constant 0 : index
    %c252 = arith.constant 252 : index
    %154 = vector.load %arg13[%c0_152, %c252] : memref<2x576xf32, #tpu.memory_space<vmem>>, vector<2x36xf32>
    tpu.vector_store %arg13[%c0_152, %c252], %153 {strides = array<i32>} : memref<2x576xf32, #tpu.memory_space<vmem>>, vector<2x36xf32>,
    %155 = vector.extract_strided_slice %138 {offsets = [16, 0], sizes = [2, 36], strides = [1, 1]} : vector<32x36xf32> to vector<2x36xf32>
    %c0_153 = arith.constant 0 : index
    %c288 = arith.constant 288 : index
    %156 = vector.load %arg13[%c0_153, %c288] : memref<2x576xf32, #tpu.memory_space<vmem>>, vector<2x36xf32>
    tpu.vector_store %arg13[%c0_153, %c288], %155 {strides = array<i32>} : memref<2x576xf32, #tpu.memory_space<vmem>>, vector<2x36xf32>,
    %157 = vector.extract_strided_slice %138 {offsets = [18, 0], sizes = [2, 36], strides = [1, 1]} : vector<32x36xf32> to vector<2x36xf32>
    %c0_154 = arith.constant 0 : index
    %c324 = arith.constant 324 : index
    %158 = vector.load %arg13[%c0_154, %c324] : memref<2x576xf32, #tpu.memory_space<vmem>>, vector<2x36xf32>
    tpu.vector_store %arg13[%c0_154, %c324], %157 {strides = array<i32>} : memref<2x576xf32, #tpu.memory_space<vmem>>, vector<2x36xf32>,
    %159 = vector.extract_strided_slice %138 {offsets = [20, 0], sizes = [2, 36], strides = [1, 1]} : vector<32x36xf32> to vector<2x36xf32>
    %c0_155 = arith.constant 0 : index
    %c360 = arith.constant 360 : index
    %160 = vector.load %arg13[%c0_155, %c360] : memref<2x576xf32, #tpu.memory_space<vmem>>, vector<2x36xf32>
    tpu.vector_store %arg13[%c0_155, %c360], %159 {strides = array<i32>} : memref<2x576xf32, #tpu.memory_space<vmem>>, vector<2x36xf32>,
    %161 = vector.extract_strided_slice %138 {offsets = [22, 0], sizes = [2, 36], strides = [1, 1]} : vector<32x36xf32> to vector<2x36xf32>
    %c0_156 = arith.constant 0 : index
    %c396 = arith.constant 396 : index
    %162 = vector.load %arg13[%c0_156, %c396] : memref<2x576xf32, #tpu.memory_space<vmem>>, vector<2x36xf32>
    tpu.vector_store %arg13[%c0_156, %c396], %161 {strides = array<i32>} : memref<2x576xf32, #tpu.memory_space<vmem>>, vector<2x36xf32>,
    %163 = vector.extract_strided_slice %138 {offsets = [24, 0], sizes = [2, 36], strides = [1, 1]} : vector<32x36xf32> to vector<2x36xf32>
    %c0_157 = arith.constant 0 : index
    %c432 = arith.constant 432 : index
    %164 = vector.load %arg13[%c0_157, %c432] : memref<2x576xf32, #tpu.memory_space<vmem>>, vector<2x36xf32>
    tpu.vector_store %arg13[%c0_157, %c432], %163 {strides = array<i32>} : memref<2x576xf32, #tpu.memory_space<vmem>>, vector<2x36xf32>,
    %165 = vector.extract_strided_slice %138 {offsets = [26, 0], sizes = [2, 36], strides = [1, 1]} : vector<32x36xf32> to vector<2x36xf32>
    %c0_158 = arith.constant 0 : index
    %c468 = arith.constant 468 : index
    %166 = vector.load %arg13[%c0_158, %c468] : memref<2x576xf32, #tpu.memory_space<vmem>>, vector<2x36xf32>
    tpu.vector_store %arg13[%c0_158, %c468], %165 {strides = array<i32>} : memref<2x576xf32, #tpu.memory_space<vmem>>, vector<2x36xf32>,
    %167 = vector.extract_strided_slice %138 {offsets = [28, 0], sizes = [2, 36], strides = [1, 1]} : vector<32x36xf32> to vector<2x36xf32>
    %c0_159 = arith.constant 0 : index
    %c504 = arith.constant 504 : index
    %168 = vector.load %arg13[%c0_159, %c504] : memref<2x576xf32, #tpu.memory_space<vmem>>, vector<2x36xf32>
    tpu.vector_store %arg13[%c0_159, %c504], %167 {strides = array<i32>} : memref<2x576xf32, #tpu.memory_space<vmem>>, vector<2x36xf32>,
    %169 = vector.extract_strided_slice %138 {offsets = [30, 0], sizes = [2, 36], strides = [1, 1]} : vector<32x36xf32> to vector<2x36xf32>
    %c0_160 = arith.constant 0 : index
    %c540 = arith.constant 540 : index
    %170 = vector.load %arg13[%c0_160, %c540] : memref<2x576xf32, #tpu.memory_space<vmem>>, vector<2x36xf32>
    tpu.vector_store %arg13[%c0_160, %c540], %169 {strides = array<i32>} : memref<2x576xf32, #tpu.memory_space<vmem>>, vector<2x36xf32>,
    %c0_161 = arith.constant 0 : index
    %c0_162 = arith.constant 0 : index
    %171 = vector.load %arg13[%c0_161, %c0_162] : memref<2x576xf32, #tpu.memory_space<vmem>>, vector<2x576xf32>
    %c0_163 = arith.constant 0 : index
    %c0_164 = arith.constant 0 : index
    %172 = vector.load %arg8[%c0_163, %c0_164] : memref<576x32xf32, #tpu.memory_space<vmem>>, vector<576x32xf32>
    %cst_165 = arith.constant dense<0.000000e+00> : vector<2x32xf32>
    %173 = tpu.matmul %171, %172, %cst_165 {dimension_numbers = #tpu.dot_dimension_numbers<[1], [0], [0], [1], [0, 0, 1, 1], [], []>} : vector<2x576xf32>, vector<576x32xf32>, vector<2x32xf32> -> vector<2x32xf32>
    %c0_166 = arith.constant 0 : index
    %c0_167 = arith.constant 0 : index
    %174 = vector.load %arg9[%c0_166, %c0_167] : memref<1x32xf32, #tpu.memory_space<vmem>>, vector<1x32xf32>
    %175 = vector.broadcast %174 : vector<1x32xf32> to vector<2x32xf32>
    %176 = arith.addf %173, %175 : vector<2x32xf32>
    %cst_168 = arith.constant 0.000000e+00 : f32
    %177 = vector.broadcast %cst_168 : f32 to vector<2x32xf32>
    %178 = arith.maximumf %176, %177 : vector<2x32xf32>
    %c0_169 = arith.constant 0 : index
    %c0_170 = arith.constant 0 : index
    %179 = vector.load %arg10[%c0_169, %c0_170] : memref<32x4xf32, #tpu.memory_space<vmem>>, vector<32x4xf32>
    %cst_171 = arith.constant dense<0.000000e+00> : vector<2x4xf32>
    %180 = tpu.matmul %178, %179, %cst_171 {dimension_numbers = #tpu.dot_dimension_numbers<[1], [0], [0], [1], [0, 0, 1, 1], [], []>} : vector<2x32xf32>, vector<32x4xf32>, vector<2x4xf32> -> vector<2x4xf32>
    %c0_172 = arith.constant 0 : index
    %c0_173 = arith.constant 0 : index
    %181 = vector.load %arg11[%c0_172, %c0_173] : memref<1x4xf32, #tpu.memory_space<vmem>>, vector<1x4xf32>
    %182 = vector.broadcast %181 : vector<1x4xf32> to vector<2x4xf32>
    %183 = arith.addf %180, %182 : vector<2x4xf32>
    %c0_174 = arith.constant 0 : index
    %c0_175 = arith.constant 0 : index
    %184 = vector.load %arg12[%c0_174, %c0_175] : memref<2x4xf32, #tpu.memory_space<vmem>>, vector<2x4xf32>
    tpu.vector_store %arg12[%c0_174, %c0_175], %183 {strides = array<i32>} : memref<2x4xf32, #tpu.memory_space<vmem>>, vector<2x4xf32>,
    return
  }
  func.func @transform_0(%arg0: i32) -> (i32, i32) {
    %c0_i32 = arith.constant 0 : i32
    %c0_i32_0 = arith.constant 0 : i32
    %c0_i32_1 = arith.constant 0 : i32
    return %c0_i32, %c0_i32_0 : i32, i32
  }
  func.func @transform_1(%arg0: i32) -> (i32, i32, i32) {
    %c0_i32 = arith.constant 0 : i32
    %c0_i32_0 = arith.constant 0 : i32
    %c0_i32_1 = arith.constant 0 : i32
    %c0_i32_2 = arith.constant 0 : i32
    return %c0_i32, %c0_i32_0, %c0_i32_1 : i32, i32, i32
  }
  func.func @transform_2(%arg0: i32) -> (i32, i32, i32) {
    %c0_i32 = arith.constant 0 : i32
    %c0_i32_0 = arith.constant 0 : i32
    %c0_i32_1 = arith.constant 0 : i32
    %c0_i32_2 = arith.constant 0 : i32
    return %c0_i32, %c0_i32_0, %c0_i32_1 : i32, i32, i32
  }
  func.func @transform_3(%arg0: i32) -> (i32, i32) {
    %c0_i32 = arith.constant 0 : i32
    %c0_i32_0 = arith.constant 0 : i32
    %c0_i32_1 = arith.constant 0 : i32
    return %c0_i32, %c0_i32_0 : i32, i32
  }
  func.func @transform_4(%arg0: i32) -> (i32, i32, i32) {
    %c0_i32 = arith.constant 0 : i32
    %c0_i32_0 = arith.constant 0 : i32
    %c0_i32_1 = arith.constant 0 : i32
    %c0_i32_2 = arith.constant 0 : i32
    return %c0_i32, %c0_i32_0, %c0_i32_1 : i32, i32, i32
  }
  func.func @transform_5(%arg0: i32) -> (i32, i32, i32) {
    %c0_i32 = arith.constant 0 : i32
    %c0_i32_0 = arith.constant 0 : i32
    %c0_i32_1 = arith.constant 0 : i32
    %c0_i32_2 = arith.constant 0 : i32
    return %c0_i32, %c0_i32_0, %c0_i32_1 : i32, i32, i32
  }
  func.func @transform_6(%arg0: i32) -> (i32, i32) {
    %c0_i32 = arith.constant 0 : i32
    %c0_i32_0 = arith.constant 0 : i32
    %c0_i32_1 = arith.constant 0 : i32
    return %c0_i32, %c0_i32_0 : i32, i32
  }
  func.func @transform_7(%arg0: i32) -> (i32, i32) {
    %c0_i32 = arith.constant 0 : i32
    %c0_i32_0 = arith.constant 0 : i32
    %c0_i32_1 = arith.constant 0 : i32
    return %c0_i32, %c0_i32_0 : i32, i32
  }
  func.func @transform_8(%arg0: i32) -> (i32, i32) {
    %c0_i32 = arith.constant 0 : i32
    %c0_i32_0 = arith.constant 0 : i32
    %c0_i32_1 = arith.constant 0 : i32
    return %c0_i32, %c0_i32_0 : i32, i32
  }
  func.func @transform_9(%arg0: i32) -> (i32, i32) {
    %c0_i32 = arith.constant 0 : i32
    %c0_i32_0 = arith.constant 0 : i32
    %c0_i32_1 = arith.constant 0 : i32
    return %c0_i32, %c0_i32_0 : i32, i32
  }
  func.func @transform_10(%arg0: i32) -> (i32, i32) {
    %c0_i32 = arith.constant 0 : i32
    %c0_i32_0 = arith.constant 0 : i32
    %c0_i32_1 = arith.constant 0 : i32
    return %c0_i32, %c0_i32_0 : i32, i32
  }
  func.func @transform_11(%arg0: i32) -> (i32, i32) {
    %c0_i32 = arith.constant 0 : i32
    %c0_i32_0 = arith.constant 0 : i32
    %c0_i32_1 = arith.constant 0 : i32
    return %c0_i32, %c0_i32_0 : i32, i32
  }
}

</mosaic_0001>

<bundles_post_ra>
// kernel: conv_network_forward.1
= control target key start
LH: loop header
LB: loop body
LE: loop exit
PB: predicated region body
PF: predicated region fallthrough
CT: control target
= control target key end

     0   :  { %s7622_s0 = inlined_call_operand.vmem [shape: f32[8,256], index: 0, kind: input, shape index: {}]   ;;  %s7623_s1 = inlined_call_operand.vmem [shape: f32[9,256,196], index: 1, kind: input, shape index: {}]   ;;  %s7624_s2 = inlined_call_operand.vmem [shape: f32[9,16,8], index: 2, kind: input, shape index: {}]   ;;  %s7625_s3 = inlined_call_operand.vmem [shape: f32[16,1], index: 3, kind: input, shape index: {}]   ;;  %s7626_s4 = inlined_call_operand.vmem [shape: f32[9,196,36], index: 4, kind: input, shape index: {}]   ;;  %s7627_s5 = inlined_call_operand.vmem [shape: f32[9,32,16], index: 5, kind: input, shape index: {}]   ;;  %s7628_s6 = inlined_call_operand.vmem [shape: f32[32,1], index: 6, kind: input, shape index: {}]   ;;  %s7629_s7 = inlined_call_operand.vmem [shape: f32[576,32], index: 7, kind: input, shape index: {}]   ;;  %s7630_s8 = inlined_call_operand.vmem [shape: f32[1,32], index: 8, kind: input, shape index: {}]   ;;  %s7631_s9 = inlined_call_operand.vmem [shape: f32[32,4], index: 9, kind: input, shape index: {}]   ;;  %s7632_s10 = inlined_call_operand.vmem [shape: f32[1,4], index: 10, kind: input, shape index: {}]   ;;  %s7633_s11 = inlined_call_operand.hbm [shape: f32[2,4], index: 11, kind: output, shape index: {}]  }
   0x1   :  { %v72_v0 = vld [vmem:[%s7623_s1 + $0xf8] sm:$0xff]  ;;  %v70_v2 = vld [vmem:[%s7623_s1 + $0xe8] sm:$0xff]  ;;  %v71_v6 = vld [vmem:[%s7623_s1 + $0xf0] sm:$0xff] }
   0x2   :  { %v104_v1 = vld [vmem:[%s7623_s1 + $0x1f8] sm:$0xff]  ;;  %145 = vmatpush.msra.mxu2 %v72_v0  ;;  %v102_v3 = vld [vmem:[%s7623_s1 + $0x1e8] sm:$0xff]  ;;  %v103_v7 = vld [vmem:[%s7623_s1 + $0x1f0] sm:$0xff]  ;;  %105 = vmatpush.msra.mxu0 %v71_v6 }
   0x3   :  { %165 = vmatpush.msra.mxu3 %v104_v1  ;;  %v68_v4 = vld [vmem:[%s7623_s1 + $0xd8] sm:$0xff]  ;;  %v69_v8 = vld [vmem:[%s7623_s1 + $0xe0] sm:$0xff]  ;;  %125 = vmatpush.msra.mxu1 %v103_v7  ;;  %v66_v10 = vld [vmem:[%s7623_s1 + $0xc8] sm:$0xff] }
   0x4   :  { %v100_v5 = vld [vmem:[%s7623_s1 + $0x1d8] sm:$0xff]  ;;  %146 = vmatpush.msra.mxu2 %v70_v2  ;;  %v101_v9 = vld [vmem:[%s7623_s1 + $0x1e0] sm:$0xff]  ;;  %v98_v11 = vld [vmem:[%s7623_s1 + $0x1c8] sm:$0xff]  ;;  %106 = vmatpush.msra.mxu0 %v69_v8 }
   0x5   :  { %166 = vmatpush.msra.mxu3 %v102_v3  ;;  %v67_v12 = vld [vmem:[%s7623_s1 + $0xd0] sm:$0xff]  ;;  %126 = vmatpush.msra.mxu1 %v101_v9  ;;  %v64_v14 = vld [vmem:[%s7623_s1 + $0xb8] sm:$0xff]  ;;  %v65_v16 = vld [vmem:[%s7623_s1 + $0xc0] sm:$0xff] }
   0x6   :  { %147 = vmatpush.msra.mxu2 %v68_v4  ;;  %v99_v13 = vld [vmem:[%s7623_s1 + $0x1d0] sm:$0xff]  ;;  %v96_v15 = vld [vmem:[%s7623_s1 + $0x1b8] sm:$0xff]  ;;  %v97_v17 = vld [vmem:[%s7623_s1 + $0x1c0] sm:$0xff]  ;;  %107 = vmatpush.msra.mxu0 %v67_v12 }
   0x7   :  { %167 = vmatpush.msra.mxu3 %v100_v5  ;;  %127 = vmatpush.msra.mxu1 %v99_v13  ;;  %v62_v18 = vld [vmem:[%s7623_s1 + $0xa8] sm:$0xff]  ;;  %v63_v20 = vld [vmem:[%s7623_s1 + $0xb0] sm:$0xff]  ;;  %v60_v22 = vld [vmem:[%s7623_s1 + $0x98] sm:$0xff] }
   0x8   :  { %148 = vmatpush.msra.mxu2 %v66_v10  ;;  %v94_v19 = vld [vmem:[%s7623_s1 + $0x1a8] sm:$0xff]  ;;  %v95_v21 = vld [vmem:[%s7623_s1 + $0x1b0] sm:$0xff]  ;;  %108 = vmatpush.msra.mxu0 %v65_v16  ;;  %v92_v23 = vld [vmem:[%s7623_s1 + $0x198] sm:$0xff] }
   0x9   :  { %168 = vmatpush.msra.mxu3 %v98_v11  ;;  %128 = vmatpush.msra.mxu1 %v97_v17  ;;  %v61_v24 = vld [vmem:[%s7623_s1 + $0xa0] sm:$0xff]  ;;  %v58_v26 = vld [vmem:[%s7623_s1 + $0x88] sm:$0xff]  ;;  %v59_v28 = vld [vmem:[%s7623_s1 + $0x90] sm:$0xff] }
   0xa   :  { %149 = vmatpush.msra.mxu2 %v64_v14  ;;  %v93_v25 = vld [vmem:[%s7623_s1 + $0x1a0] sm:$0xff]  ;;  %109 = vmatpush.msra.mxu0 %v63_v20  ;;  %v90_v27 = vld [vmem:[%s7623_s1 + $0x188] sm:$0xff]  ;;  %v91_v29 = vld [vmem:[%s7623_s1 + $0x190] sm:$0xff] }
   0xb   :  { %169 = vmatpush.msra.mxu3 %v96_v15  ;;  %129 = vmatpush.msra.mxu1 %v95_v21  ;;  %v56_v30 = vld [vmem:[%s7623_s1 + $0x78] sm:$0xff]  ;;  %v57_v32 = vld [vmem:[%s7623_s1 + $0x80] sm:$0xff]  ;;  %v54_v34 = vld [vmem:[%s7623_s1 + $0x68] sm:$0xff] }
   0xc   :  { %150 = vmatpush.msra.mxu2 %v62_v18  ;;  %110 = vmatpush.msra.mxu0 %v61_v24  ;;  %v88_v31 = vld [vmem:[%s7623_s1 + $0x178] sm:$0xff]  ;;  %v89_v33 = vld [vmem:[%s7623_s1 + $0x180] sm:$0xff]  ;;  %v86_v35 = vld [vmem:[%s7623_s1 + $0x168] sm:$0xff] }
   0xd   :  { %170 = vmatpush.msra.mxu3 %v94_v19  ;;  %130 = vmatpush.msra.mxu1 %v93_v25  ;;  %v55_v36 = vld [vmem:[%s7623_s1 + $0x70] sm:$0xff]  ;;  %v52_v38 = vld [vmem:[%s7623_s1 + $0x58] sm:$0xff]  ;;  %v53_v40 = vld [vmem:[%s7623_s1 + $0x60] sm:$0xff] }
   0xe   :  { %151 = vmatpush.msra.mxu2 %v60_v22  ;;  %111 = vmatpush.msra.mxu0 %v59_v28  ;;  %v87_v37 = vld [vmem:[%s7623_s1 + $0x170] sm:$0xff]  ;;  %v84_v39 = vld [vmem:[%s7623_s1 + $0x158] sm:$0xff]  ;;  %v85_v41 = vld [vmem:[%s7623_s1 + $0x160] sm:$0xff] }
   0xf   :  { %171 = vmatpush.msra.mxu3 %v92_v23  ;;  %131 = vmatpush.msra.mxu1 %v91_v29  ;;  %v50_v42 = vld [vmem:[%s7623_s1 + $0x48] sm:$0xff]  ;;  %v51_v44 = vld [vmem:[%s7623_s1 + $0x50] sm:$0xff]  ;;  %v48_v46 = vld [vmem:[%s7623_s1 + $0x38] sm:$0xff] }
  0x10   :  { %152 = vmatpush.msra.mxu2 %v58_v26  ;;  %112 = vmatpush.msra.mxu0 %v57_v32  ;;  %v82_v43 = vld [vmem:[%s7623_s1 + $0x148] sm:$0xff]  ;;  %v83_v45 = vld [vmem:[%s7623_s1 + $0x150] sm:$0xff]  ;;  %v80_v47 = vld [vmem:[%s7623_s1 + $0x138] sm:$0xff] }
  0x11   :  { %172 = vmatpush.msra.mxu3 %v90_v27  ;;  %132 = vmatpush.msra.mxu1 %v89_v33  ;;  %v49_v48 = vld [vmem:[%s7623_s1 + $0x40] sm:$0xff]  ;;  %v46_v50 = vld [vmem:[%s7623_s1 + $0x28] sm:$0xff]  ;;  %v47_v52 = vld [vmem:[%s7623_s1 + $0x30] sm:$0xff] }
  0x12   :  { %153 = vmatpush.msra.mxu2 %v56_v30  ;;  %113 = vmatpush.msra.mxu0 %v55_v36  ;;  %v81_v49 = vld [vmem:[%s7623_s1 + $0x140] sm:$0xff]  ;;  %v78_v51 = vld [vmem:[%s7623_s1 + $0x128] sm:$0xff]  ;;  %v79_v53 = vld [vmem:[%s7623_s1 + $0x130] sm:$0xff] }
  0x13   :  { %173 = vmatpush.msra.mxu3 %v88_v31  ;;  %133 = vmatpush.msra.mxu1 %v87_v37  ;;  %v44_v54 = vld [vmem:[%s7623_s1 + $0x18] sm:$0xff]  ;;  %v45_v56 = vld [vmem:[%s7623_s1 + $0x20] sm:$0xff]  ;;  %v42_v58 = vld [vmem:[%s7623_s1 + $0x8] sm:$0xff] }
  0x14   :  { %154 = vmatpush.msra.mxu2 %v54_v34  ;;  %114 = vmatpush.msra.mxu0 %v53_v40  ;;  %v76_v55 = vld [vmem:[%s7623_s1 + $0x118] sm:$0xff]  ;;  %v77_v57 = vld [vmem:[%s7623_s1 + $0x120] sm:$0xff]  ;;  %v74_v59 = vld [vmem:[%s7623_s1 + $0x108] sm:$0xff] }
  0x15   :  { %174 = vmatpush.msra.mxu3 %v86_v35  ;;  %134 = vmatpush.msra.mxu1 %v85_v41  ;;  %v4600_v60 = vld [vmem:[%s7622_s0] sm:$0xff]  ;;  %v4605_v61 = vld [vmem:[%s7622_s0 + $0x8] sm:$0xff]  ;;  %v3458_v62 = vld [vmem:[%s7623_s1 + $0x2f8] sm:$0xff] }
  0x16   :  { %155 = vmatpush.msra.mxu2 %v52_v38  ;;  %115 = vmatpush.msra.mxu0 %v51_v44  ;;  %v3490_v63 = vld [vmem:[%s7623_s1 + $0x3f8] sm:$0xff]  ;;  %v43_v0 = vld [vmem:[%s7623_s1 + $0x10] sm:$0xff]  ;;  %v3456_v2 = vld [vmem:[%s7623_s1 + $0x2e8] sm:$0xff] }
  0x17   :  { %175 = vmatpush.msra.mxu3 %v84_v39  ;;  %135 = vmatpush.msra.mxu1 %v83_v45  ;;  %v75_v1 = vld [vmem:[%s7623_s1 + $0x110] sm:$0xff]  ;;  %v3488_v3 = vld [vmem:[%s7623_s1 + $0x3e8] sm:$0xff]  ;;  %v41_v4 = vld [vmem:[%s7623_s1] sm:$0xff] }
  0x18   :  { %156 = vmatpush.msra.mxu2 %v50_v42  ;;  %116 = vmatpush.msra.mxu0 %v49_v48  ;;  %v73_v5 = vld [vmem:[%s7623_s1 + $0x100] sm:$0xff]  ;;  %v3454_v6 = vld [vmem:[%s7623_s1 + $0x2d8] sm:$0xff]  ;;  %v3457_v8 = vld [vmem:[%s7623_s1 + $0x2f0] sm:$0xff] }
  0x19   :  { %176 = vmatpush.msra.mxu3 %v82_v43  ;;  %136 = vmatpush.msra.mxu1 %v81_v49  ;;  %v3486_v7 = vld [vmem:[%s7623_s1 + $0x3d8] sm:$0xff]  ;;  %v3489_v9 = vld [vmem:[%s7623_s1 + $0x3f0] sm:$0xff]  ;;  %v3452_v10 = vld [vmem:[%s7623_s1 + $0x2c8] sm:$0xff] }
  0x1a   :  { %157 = vmatpush.msra.mxu2 %v48_v46  ;;  %117 = vmatpush.msra.mxu0 %v47_v52  ;;  %v3484_v11 = vld [vmem:[%s7623_s1 + $0x3c8] sm:$0xff]  ;;  %v3455_v12 = vld [vmem:[%s7623_s1 + $0x2e0] sm:$0xff]  ;;  %v3450_v14 = vld [vmem:[%s7623_s1 + $0x2b8] sm:$0xff] }
  0x1b   :  { %177 = vmatpush.msra.mxu3 %v80_v47  ;;  %137 = vmatpush.msra.mxu1 %v79_v53  ;;  %v3487_v13 = vld [vmem:[%s7623_s1 + $0x3e0] sm:$0xff]  ;;  %v3482_v15 = vld [vmem:[%s7623_s1 + $0x3b8] sm:$0xff]  ;;  %v3453_v16 = vld [vmem:[%s7623_s1 + $0x2d0] sm:$0xff] }
  0x1c   :  { %158 = vmatpush.msra.mxu2 %v46_v50  ;;  %118 = vmatpush.msra.mxu0 %v45_v56  ;;  %v3485_v17 = vld [vmem:[%s7623_s1 + $0x3d0] sm:$0xff]  ;;  %v3448_v18 = vld [vmem:[%s7623_s1 + $0x2a8] sm:$0xff]  ;;  %v3451_v20 = vld [vmem:[%s7623_s1 + $0x2c0] sm:$0xff] }
  0x1d   :  { %178 = vmatpush.msra.mxu3 %v78_v51  ;;  %138 = vmatpush.msra.mxu1 %v77_v57  ;;  %v3480_v19 = vld [vmem:[%s7623_s1 + $0x3a8] sm:$0xff]  ;;  %v3483_v21 = vld [vmem:[%s7623_s1 + $0x3c0] sm:$0xff]  ;;  %v3446_v22 = vld [vmem:[%s7623_s1 + $0x298] sm:$0xff] }
  0x1e   :  { %159 = vmatpush.msra.mxu2 %v44_v54  ;;  %119 = vmatpush.msra.mxu0 %v43_v0  ;;  %v3478_v23 = vld [vmem:[%s7623_s1 + $0x398] sm:$0xff]  ;;  %v3449_v24 = vld [vmem:[%s7623_s1 + $0x2b0] sm:$0xff] }
  0x1f   :  { %179 = vmatpush.msra.mxu3 %v76_v55  ;;  %139 = vmatpush.msra.mxu1 %v75_v1  ;;  %v3481_v25 = vld [vmem:[%s7623_s1 + $0x3b0] sm:$0xff] }
  0x20   :  { %160 = vmatpush.msra.mxu2 %v42_v58  ;;  %120 = vmatpush.msra.mxu0 %v41_v4 }
  0x21   :  { %180 = vmatpush.msra.mxu3 %v74_v59  ;;  %161 = vmatmul.f32.vlgmr.msra.gmra.mxu2 %v4600_v60 }
  0x22   :  { %181 = vmatmul.f32.vlgmr.msra.gmra.mxu3 %v4605_v61  ;;  %292 = vmatpush.msrb.mxu2 %v3458_v62 }
  0x23   :  { %312 = vmatpush.msrb.mxu3 %v3490_v63  ;;  %140 = vmatpush.msra.mxu1 %v73_v5 }
  0x24   :  { %293 = vmatpush.msrb.mxu2 %v3456_v2  ;;  %121 = vmatmul.f32.vlgmr.msra.gmra.mxu0 %v4600_v60 }
  0x25   :  { %313 = vmatpush.msrb.mxu3 %v3488_v3  ;;  %141 = vmatmul.f32.vlgmr.msra.gmra.mxu1 %v4605_v61 }
  0x26   :  { %294 = vmatpush.msrb.mxu2 %v3454_v6  ;;  %252 = vmatpush.msrb.mxu0 %v3457_v8 }
  0x27   :  { %314 = vmatpush.msrb.mxu3 %v3486_v7  ;;  %272 = vmatpush.msrb.mxu1 %v3489_v9 }
  0x28   :  { %295 = vmatpush.msrb.mxu2 %v3452_v10  ;;  %253 = vmatpush.msrb.mxu0 %v3455_v12 }
  0x29   :  { %315 = vmatpush.msrb.mxu3 %v3484_v11  ;;  %273 = vmatpush.msrb.mxu1 %v3487_v13 }
  0x2a   :  { %296 = vmatpush.msrb.mxu2 %v3450_v14  ;;  %254 = vmatpush.msrb.mxu0 %v3453_v16 }
  0x2b   :  { %316 = vmatpush.msrb.mxu3 %v3482_v15  ;;  %274 = vmatpush.msrb.mxu1 %v3485_v17 }
  0x2c   :  { %297 = vmatpush.msrb.mxu2 %v3448_v18 }
  0x2d   :  { %317 = vmatpush.msrb.mxu3 %v3480_v19 }
  0x2e   :  { %16 = vsyncpa [#allocation4], 0  ;;  %255 = vmatpush.msrb.mxu0 %v3451_v20  ;;  %275 = vmatpush.msrb.mxu1 %v3483_v21  ;;  %v3444_v26 = vld [vmem:[%s7623_s1 + $0x288] sm:$0xff]  ;;  %v3447_v28 = vld [vmem:[%s7623_s1 + $0x2a0] sm:$0xff]  ;;  %vm335_vm0 = vcmask 64512   ;;  %vm1920_vm1 = vcmask 1043456  }
  0x2f   :  { %v3476_v27 = vld [vmem:[%s7623_s1 + $0x388] sm:$0xff]  ;;  %298 = vmatpush.msrb.mxu2 %v3446_v22  ;;  %318 = vmatpush.msrb.mxu3 %v3478_v23  ;;  %v3479_v29 = vld [vmem:[%s7623_s1 + $0x3a0] sm:$0xff]  ;;  %v3442_v30 = vld [vmem:[%s7623_s1 + $0x278] sm:$0xff]  ;;  %vm1913_vm2 = vcmask 556032   ;;  %vm2054_vm3 = vcmask 130048   ;;  %vm3044_vm4 = vcmask 287744  }
  0x30   :  { %256 = vmatpush.msrb.mxu0 %v3449_v24  ;;  %276 = vmatpush.msrb.mxu1 %v3481_v25  ;;  %v3474_v31 = vld [vmem:[%s7623_s1 + $0x378] sm:$0xff]  ;;  %v3445_v32 = vld [vmem:[%s7623_s1 + $0x290] sm:$0xff]  ;;  %v3440_v34 = vld [vmem:[%s7623_s1 + $0x268] sm:$0xff]  ;;  %s4344_s18 = smov 32   ;;  %s4345_s19 = smov 108   ;;  %vm3053_vm5 = vcmask 582944  }
  0x31   :  { %299 = vmatpush.msrb.mxu2 %v3444_v26  ;;  %319 = vmatpush.msrb.mxu3 %v3476_v27  ;;  %v3477_v33 = vld [vmem:[%s7623_s1 + $0x390] sm:$0xff]  ;;  %v3472_v35 = vld [vmem:[%s7623_s1 + $0x368] sm:$0xff]  ;;  %v3443_v36 = vld [vmem:[%s7623_s1 + $0x280] sm:$0xff]  ;;  %s4346_s20 = smov 52   ;;  %s4347_s21 = smov 88   ;;  %vm3061_vm6 = vcmask 878144  }
  0x32   :  { %257 = vmatpush.msrb.mxu0 %v3447_v28  ;;  %277 = vmatpush.msrb.mxu1 %v3479_v29  ;;  %v3475_v37 = vld [vmem:[%s7623_s1 + $0x380] sm:$0xff]  ;;  %v3438_v38 = vld [vmem:[%s7623_s1 + $0x258] sm:$0xff]  ;;  %v3441_v40 = vld [vmem:[%s7623_s1 + $0x270] sm:$0xff]  ;;  %s4348_s22 = smov 124   ;;  %s4349_s23 = smov 68   ;;  %vm3072_vm7 = vcmask 1042272  }
  0x33   :  { %300 = vmatpush.msrb.mxu2 %v3442_v30  ;;  %320 = vmatpush.msrb.mxu3 %v3474_v31  ;;  %v3470_v39 = vld [vmem:[%s7623_s1 + $0x358] sm:$0xff]  ;;  %v3473_v41 = vld [vmem:[%s7623_s1 + $0x370] sm:$0xff]  ;;  %v3436_v42 = vld [vmem:[%s7623_s1 + $0x248] sm:$0xff]  ;;  %s4350_s24 = smov 48   ;;  %s4352_s25 = smov 12   ;;  %vm3073_vm8 = vcmask 125954  }
  0x34   :  { %258 = vmatpush.msrb.mxu0 %v3445_v32  ;;  %278 = vmatpush.msrb.mxu1 %v3477_v33  ;;  %v3468_v43 = vld [vmem:[%s7623_s1 + $0x348] sm:$0xff]  ;;  %v3439_v44 = vld [vmem:[%s7623_s1 + $0x260] sm:$0xff]  ;;  %v3434_v46 = vld [vmem:[%s7623_s1 + $0x238] sm:$0xff]  ;;  %s4353_s26 = smov 84   ;;  %s4354_s27 = smov 120   ;;  %vm3069_vm9 = vcmask 883712  }
  0x35   :  { %301 = vmatpush.msrb.mxu2 %v3440_v34  ;;  %321 = vmatpush.msrb.mxu3 %v3472_v35  ;;  %v3471_v45 = vld [vmem:[%s7623_s1 + $0x360] sm:$0xff]  ;;  %v3466_v47 = vld [vmem:[%s7623_s1 + $0x338] sm:$0xff]  ;;  %v3437_v48 = vld [vmem:[%s7623_s1 + $0x250] sm:$0xff]  ;;  %s4355_s28 = smov 28   ;;  %vm3080_vm11 = vcmask 418944   ;;  %vm3088_vm12 = vcmask 714144  }
  0x36   :  { %259 = vmatpush.msrb.mxu0 %v3443_v36  ;;  %279 = vmatpush.msrb.mxu1 %v3475_v37  ;;  %v3469_v49 = vld [vmem:[%s7623_s1 + $0x350] sm:$0xff]  ;;  %v3432_v50 = vld [vmem:[%s7623_s1 + $0x228] sm:$0xff]  ;;  %v3435_v52 = vld [vmem:[%s7623_s1 + $0x240] sm:$0xff]  ;;  %vm3096_vm13 = vcmask 1009344   ;;  %vm3107_vm14 = vcmask 1042400   ;;  %vm3108_vm15 = vcmask 257026  }
  0x37   :  { %302 = vmatpush.msrb.mxu2 %v3438_v38  ;;  %322 = vmatpush.msrb.mxu3 %v3470_v39  ;;  %v3464_v51 = vld [vmem:[%s7623_s1 + $0x328] sm:$0xff]  ;;  %v3467_v53 = vld [vmem:[%s7623_s1 + $0x340] sm:$0xff]  ;;  %v3430_v54 = vld [vmem:[%s7623_s1 + $0x218] sm:$0xff]  ;;  %s3418_s30 = sshll.u32 %s7633_s11, 4  ;;  %s3419_s30 = int_to_ptr.hbm [resolvable:$true] %s3418_s30 }
  0x38   :  { %260 = vmatpush.msrb.mxu0 %v3441_v40  ;;  %280 = vmatpush.msrb.mxu1 %v3473_v41  ;;  %v3462_v55 = vld [vmem:[%s7623_s1 + $0x318] sm:$0xff]  ;;  %v3433_v56 = vld [vmem:[%s7623_s1 + $0x230] sm:$0xff]  ;;  %v3428_v58 = vld [vmem:[%s7623_s1 + $0x208] sm:$0xff] }
  0x39   :  { %303 = vmatpush.msrb.mxu2 %v3436_v42  ;;  %323 = vmatpush.msrb.mxu3 %v3468_v43  ;;  %v3465_v57 = vld [vmem:[%s7623_s1 + $0x330] sm:$0xff]  ;;  %v3460_v59 = vld [vmem:[%s7623_s1 + $0x308] sm:$0xff]  ;;  %v3431_v62 = vld [vmem:[%s7623_s1 + $0x220] sm:$0xff] }
  0x3a   :  { %261 = vmatpush.msrb.mxu0 %v3439_v44  ;;  %281 = vmatpush.msrb.mxu1 %v3471_v45  ;;  %v3463_v63 = vld [vmem:[%s7623_s1 + $0x320] sm:$0xff]  ;;  %v3429_v0 = vld [vmem:[%s7623_s1 + $0x210] sm:$0xff]  ;;  %v3532_v9 = vld [vmem:[%s7623_s1 + $0x4f8] sm:$0xff] }
  0x3b   :  { %304 = vmatpush.msrb.mxu2 %v3434_v46  ;;  %324 = vmatpush.msrb.mxu3 %v3466_v47  ;;  %v3461_v1 = vld [vmem:[%s7623_s1 + $0x310] sm:$0xff]  ;;  %v3427_v2 = vld [vmem:[%s7623_s1 + $0x200] sm:$0xff]  ;;  %v3564_v11 = vld [vmem:[%s7623_s1 + $0x5f8] sm:$0xff] }
  0x3c   :  { %262 = vmatpush.msrb.mxu0 %v3437_v48  ;;  %282 = vmatpush.msrb.mxu1 %v3469_v49  ;;  %v3459_v3 = vld [vmem:[%s7623_s1 + $0x300] sm:$0xff]  ;;  %v3530_v13 = vld [vmem:[%s7623_s1 + $0x4e8] sm:$0xff]  ;;  %v3528_v15 = vld [vmem:[%s7623_s1 + $0x4d8] sm:$0xff] }
  0x3d   :  { %305 = vmatpush.msrb.mxu2 %v3432_v50  ;;  %325 = vmatpush.msrb.mxu3 %v3464_v51  ;;  %v185_v12 = vld [vmem:[%s7624_s2] sm:$0xff]  ;;  %v3562_v14 = vld [vmem:[%s7623_s1 + $0x5e8] sm:$0xff]  ;;  %v3560_v16 = vld [vmem:[%s7623_s1 + $0x5d8] sm:$0xff] }
  0x3e   :  { %263 = vmatpush.msrb.mxu0 %v3435_v52  ;;  %283 = vmatpush.msrb.mxu1 %v3467_v53  ;;  %v3526_v17 = vld [vmem:[%s7623_s1 + $0x4c8] sm:$0xff]  ;;  %v3524_v19 = vld [vmem:[%s7623_s1 + $0x4b8] sm:$0xff]  ;;  %v3531_v49 = vld [vmem:[%s7623_s1 + $0x4f0] sm:$0xff] }
  0x3f   :  { %306 = vmatpush.msrb.mxu2 %v3430_v54  ;;  %326 = vmatpush.msrb.mxu3 %v3462_v55  ;;  %v3558_v18 = vld [vmem:[%s7623_s1 + $0x5c8] sm:$0xff]  ;;  %v3556_v20 = vld [vmem:[%s7623_s1 + $0x5b8] sm:$0xff]  ;;  %v3563_v51 = vld [vmem:[%s7623_s1 + $0x5f0] sm:$0xff] }
  0x40   :  { %264 = vmatpush.msrb.mxu0 %v3433_v56  ;;  %284 = vmatpush.msrb.mxu1 %v3465_v57  ;;  %v186_v21 = vld [vmem:[%s7624_s2 + $0x8] sm:$0xff]  ;;  %v3520_v24 = vld [vmem:[%s7623_s1 + $0x498] sm:$0xff]  ;;  %v3601_v52 = vld [vmem:[%s7623_s1 + $0x6f0] sm:$0xff] }
  0x41   :  { %307 = vmatpush.msrb.mxu2 %v3428_v58  ;;  %327 = vmatpush.msrb.mxu3 %v3460_v59  ;;  %v3522_v22 = vld [vmem:[%s7623_s1 + $0x4a8] sm:$0xff]  ;;  %v3552_v25 = vld [vmem:[%s7623_s1 + $0x598] sm:$0xff]  ;;  %v3633_v53 = vld [vmem:[%s7623_s1 + $0x7f0] sm:$0xff] }
  0x42   :  { %308 = vmatmul.f32.vlgmr.msrb.gmra.mxu2 %v4600_v60  ;;  %328 = vmatmul.f32.vlgmr.msrb.gmra.mxu3 %v4605_v61  ;;  %v3554_v23 = vld [vmem:[%s7623_s1 + $0x5a8] sm:$0xff]  ;;  %v3516_v28 = vld [vmem:[%s7623_s1 + $0x478] sm:$0xff]  ;;  %v3529_v54 = vld [vmem:[%s7623_s1 + $0x4e0] sm:$0xff] }
  0x43   :  { %265 = vmatpush.msrb.mxu0 %v3431_v62  ;;  %285 = vmatpush.msrb.mxu1 %v3463_v63  ;;  %v3518_v26 = vld [vmem:[%s7623_s1 + $0x488] sm:$0xff]  ;;  %v3548_v29 = vld [vmem:[%s7623_s1 + $0x578] sm:$0xff]  ;;  %v3561_v55 = vld [vmem:[%s7623_s1 + $0x5e0] sm:$0xff] }
  0x44   :  { %v3550_v27 = vld [vmem:[%s7623_s1 + $0x588] sm:$0xff]  ;;  %v3512_v32 = vld [vmem:[%s7623_s1 + $0x458] sm:$0xff]  ;;  %v3599_v56 = vld [vmem:[%s7623_s1 + $0x6e0] sm:$0xff] }
  0x45   :  { %266 = vmatpush.msrb.mxu0 %v3429_v0  ;;  %286 = vmatpush.msrb.mxu1 %v3461_v1  ;;  %v3514_v30 = vld [vmem:[%s7623_s1 + $0x468] sm:$0xff]  ;;  %v3544_v33 = vld [vmem:[%s7623_s1 + $0x558] sm:$0xff]  ;;  %v3631_v57 = vld [vmem:[%s7623_s1 + $0x7e0] sm:$0xff] }
  0x46   :  { %v3546_v31 = vld [vmem:[%s7623_s1 + $0x568] sm:$0xff]  ;;  %v3508_v36 = vld [vmem:[%s7623_s1 + $0x438] sm:$0xff]  ;;  %v3527_v58 = vld [vmem:[%s7623_s1 + $0x4d0] sm:$0xff] }
  0x47   :  { %267 = vmatpush.msrb.mxu0 %v3427_v2  ;;  %287 = vmatpush.msrb.mxu1 %v3459_v3  ;;  %v3510_v34 = vld [vmem:[%s7623_s1 + $0x448] sm:$0xff]  ;;  %v3540_v37 = vld [vmem:[%s7623_s1 + $0x538] sm:$0xff]  ;;  %v3559_v59 = vld [vmem:[%s7623_s1 + $0x5d0] sm:$0xff] }
  0x48   :  { %268 = vmatmul.f32.vlgmr.msrb.gmra.mxu0 %v4600_v60  ;;  %288 = vmatmul.f32.vlgmr.msrb.gmra.mxu1 %v4605_v61  ;;  %v3542_v35 = vld [vmem:[%s7623_s1 + $0x548] sm:$0xff]  ;;  %v3504_v40 = vld [vmem:[%s7623_s1 + $0x418] sm:$0xff]  ;;  %v3597_v62 = vld [vmem:[%s7623_s1 + $0x6d0] sm:$0xff] }
  0x49   :  { %v3506_v38 = vld [vmem:[%s7623_s1 + $0x428] sm:$0xff]  ;;  %v3536_v41 = vld [vmem:[%s7623_s1 + $0x518] sm:$0xff]  ;;  %v3629_v63 = vld [vmem:[%s7623_s1 + $0x7d0] sm:$0xff] }
  0x4a   :  { %v3538_v39 = vld [vmem:[%s7623_s1 + $0x528] sm:$0xff]  ;;  %v3525_v0 = vld [vmem:[%s7623_s1 + $0x4c0] sm:$0xff]  ;;  %vm3074_vm10 = vmor %vm3073_vm8, %vm3072_vm7  ;;  %vm3144_vm8 = vcmask 386144  }
  0x4b   :  { %v3502_v42 = vld [vmem:[%s7623_s1 + $0x408] sm:$0xff]  ;;  %v3557_v1 = vld [vmem:[%s7623_s1 + $0x5c0] sm:$0xff] }
  0x4c   :  { %v3534_v43 = vld [vmem:[%s7623_s1 + $0x508] sm:$0xff]  ;;  %v3595_v2 = vld [vmem:[%s7623_s1 + $0x6c0] sm:$0xff] }
  0x4d   :  { %v3627_v3 = vld [vmem:[%s7623_s1 + $0x7c0] sm:$0xff] }
  0xa1   :  { %v122_v4 = vpop.f32.mrf.mxu0 }
  0xa2   :  { %v142_v5 = vpop.f32.mrf.mxu1 }
  0xa3   :  { %v143_v6 = vadd.f32 %v142_v5, %v122_v4  ;;  %v3523_v4 = vld [vmem:[%s7623_s1 + $0x4b0] sm:$0xff] }
  0xa4   :  { %v162_v7 = vpop.f32.mrf.mxu2  ;;  %v3555_v5 = vld [vmem:[%s7623_s1 + $0x5b0] sm:$0xff] }
  0xa5   :  { %v182_v8 = vpop.f32.mrf.mxu3  ;;  %409 = vmatpush.msra.mxu2 %v143_v6  ;;  %v3593_v6 = vld [vmem:[%s7623_s1 + $0x6b0] sm:$0xff] }
  0xa6   :  { %v183_v10 = vadd.f32 %v182_v8, %v162_v7  ;;  %3497 = vmatmul.msk.f32.vlgmr.msra.gmra.mxu2 %vm335_vm0, %v185_v12  ;;  %v3625_v7 = vld [vmem:[%s7623_s1 + $0x7b0] sm:$0xff]  ;;  %v3521_v8 = vld [vmem:[%s7623_s1 + $0x4a0] sm:$0xff] }
  0xa7   :  { %545 = vmatpush.msrb.mxu2 %v3532_v9  ;;  %v3553_v9 = vld [vmem:[%s7623_s1 + $0x5a0] sm:$0xff] }
  0xa8   :  { %432 = vmatpush.msra.mxu3 %v183_v10  ;;  %v3591_v10 = vld [vmem:[%s7623_s1 + $0x6a0] sm:$0xff] }
  0xa9   :  { %546 = vmatpush.msrb.mxu2 %v3530_v13  ;;  %3499 = vmatmul.msk.f32.vlgmr.msra.gmra.mxu3 %vm335_vm0, %v185_v12  ;;  %v3519_v12 = vld [vmem:[%s7623_s1 + $0x490] sm:$0xff] }
  0xaa   :  { %565 = vmatpush.msrb.mxu3 %v3564_v11  ;;  %v3623_v11 = vld [vmem:[%s7623_s1 + $0x7a0] sm:$0xff]  ;;  %v3551_v13 = vld [vmem:[%s7623_s1 + $0x590] sm:$0xff] }
  0xab   :  { %547 = vmatpush.msrb.mxu2 %v3528_v15  ;;  %v3621_v15 = vld [vmem:[%s7623_s1 + $0x790] sm:$0xff] }
  0xac   :  { %566 = vmatpush.msrb.mxu3 %v3562_v14  ;;  %v3589_v14 = vld [vmem:[%s7623_s1 + $0x690] sm:$0xff] }
  0xad   :  { %548 = vmatpush.msrb.mxu2 %v3526_v17  ;;  %v3549_v17 = vld [vmem:[%s7623_s1 + $0x580] sm:$0xff] }
  0xae   :  { %567 = vmatpush.msrb.mxu3 %v3560_v16  ;;  %3498 = vmatmul.msk.f32.gmra.mxu2 %vm335_vm0, %v186_v21  ;;  %v3517_v16 = vld [vmem:[%s7623_s1 + $0x480] sm:$0xff] }
  0xaf   :  { %549 = vmatpush.msrb.mxu2 %v3524_v19  ;;  %v3619_v19 = vld [vmem:[%s7623_s1 + $0x780] sm:$0xff] }
  0xb0   :  { %568 = vmatpush.msrb.mxu3 %v3558_v18  ;;  %v3587_v18 = vld [vmem:[%s7623_s1 + $0x680] sm:$0xff] }
  0xb1   :  { %550 = vmatpush.msrb.mxu2 %v3522_v22  ;;  %3500 = vmatmul.msk.f32.gmra.mxu3 %vm335_vm0, %v186_v21  ;;  %v3515_v21 = vld [vmem:[%s7623_s1 + $0x470] sm:$0xff] }
  0xb2   :  { %569 = vmatpush.msrb.mxu3 %v3556_v20  ;;  %v3491_v20 = vld [vmem:[%s7624_s2 + $0x10] sm:$0xff] }
  0xb3   :  { %551 = vmatpush.msrb.mxu2 %v3520_v24  ;;  %v3547_v22 = vld [vmem:[%s7623_s1 + $0x570] sm:$0xff] }
  0xb4   :  { %570 = vmatpush.msrb.mxu3 %v3554_v23  ;;  %v3585_v23 = vld [vmem:[%s7623_s1 + $0x670] sm:$0xff] }
  0xb5   :  { %552 = vmatpush.msrb.mxu2 %v3518_v26  ;;  %v3617_v24 = vld [vmem:[%s7623_s1 + $0x770] sm:$0xff]  ;;  %v3545_v26 = vld [vmem:[%s7623_s1 + $0x560] sm:$0xff] }
  0xb6   :  { %571 = vmatpush.msrb.mxu3 %v3552_v25  ;;  %v3513_v25 = vld [vmem:[%s7623_s1 + $0x460] sm:$0xff] }
  0xb7   :  { %553 = vmatpush.msrb.mxu2 %v3516_v28  ;;  %v3615_v28 = vld [vmem:[%s7623_s1 + $0x760] sm:$0xff] }
  0xb8   :  { %572 = vmatpush.msrb.mxu3 %v3550_v27  ;;  %v3583_v27 = vld [vmem:[%s7623_s1 + $0x660] sm:$0xff] }
  0xb9   :  { %554 = vmatpush.msrb.mxu2 %v3514_v30  ;;  %v3543_v30 = vld [vmem:[%s7623_s1 + $0x550] sm:$0xff] }
  0xba   :  { %573 = vmatpush.msrb.mxu3 %v3548_v29  ;;  %v3511_v29 = vld [vmem:[%s7623_s1 + $0x450] sm:$0xff] }
  0xbb   :  { %555 = vmatpush.msrb.mxu2 %v3512_v32  ;;  %v3613_v32 = vld [vmem:[%s7623_s1 + $0x750] sm:$0xff] }
  0xbc   :  { %574 = vmatpush.msrb.mxu3 %v3546_v31  ;;  %v3581_v31 = vld [vmem:[%s7623_s1 + $0x650] sm:$0xff] }
  0xbd   :  { %556 = vmatpush.msrb.mxu2 %v3510_v34  ;;  %v3541_v34 = vld [vmem:[%s7623_s1 + $0x540] sm:$0xff] }
  0xbe   :  { %575 = vmatpush.msrb.mxu3 %v3544_v33  ;;  %v3509_v33 = vld [vmem:[%s7623_s1 + $0x440] sm:$0xff] }
  0xbf   :  { %557 = vmatpush.msrb.mxu2 %v3508_v36  ;;  %v3611_v36 = vld [vmem:[%s7623_s1 + $0x740] sm:$0xff] }
  0xc0   :  { %576 = vmatpush.msrb.mxu3 %v3542_v35  ;;  %v3579_v35 = vld [vmem:[%s7623_s1 + $0x640] sm:$0xff] }
  0xc1   :  { %558 = vmatpush.msrb.mxu2 %v3506_v38  ;;  %v3507_v38 = vld [vmem:[%s7623_s1 + $0x430] sm:$0xff] }
  0xc2   :  { %577 = vmatpush.msrb.mxu3 %v3540_v37  ;;  %v3492_v37 = vld [vmem:[%s7624_s2 + $0x18] sm:$0xff] }
  0xc3   :  { %559 = vmatpush.msrb.mxu2 %v3504_v40  ;;  %v3577_v40 = vld [vmem:[%s7623_s1 + $0x630] sm:$0xff] }
  0xc4   :  { %578 = vmatpush.msrb.mxu3 %v3538_v39  ;;  %v3539_v39 = vld [vmem:[%s7623_s1 + $0x530] sm:$0xff] }
  0xc5   :  { %v269_v44 = vpop.f32.mrf.mxu0  ;;  %v289_v45 = vpop.f32.mrf.mxu1  ;;  %560 = vmatpush.msrb.mxu2 %v3502_v42  ;;  %v3505_v42 = vld [vmem:[%s7623_s1 + $0x420] sm:$0xff] }
  0xc6   :  { %579 = vmatpush.msrb.mxu3 %v3536_v41  ;;  %v290_v46 = vadd.f32 %v289_v45, %v269_v44  ;;  %v309_v47 = vpop.f32.mrf.mxu2  ;;  %v329_v48 = vpop.f32.mrf.mxu3  ;;  %561 = vmatmul.f32.vlgmr.msrb.gmra.mxu2 %v4600_v60  ;;  %v3609_v41 = vld [vmem:[%s7623_s1 + $0x730] sm:$0xff]  ;;  %v3575_v44 = vld [vmem:[%s7623_s1 + $0x620] sm:$0xff] }
  0xc7   :  { %v330_v50 = vadd.f32 %v329_v48, %v309_v47  ;;  %709 = vmatpush.msra.mxu2 %v3601_v52  ;;  %v3607_v45 = vld [vmem:[%s7623_s1 + $0x720] sm:$0xff]  ;;  %v3535_v47 = vld [vmem:[%s7623_s1 + $0x510] sm:$0xff] }
  0xc8   :  { %580 = vmatpush.msrb.mxu3 %v3534_v43  ;;  %357 = vmatpush.msra.mxu0 %v290_v46  ;;  %v3537_v43 = vld [vmem:[%s7623_s1 + $0x520] sm:$0xff]  ;;  %v3503_v46 = vld [vmem:[%s7623_s1 + $0x410] sm:$0xff] }
  0xc9   :  { %581 = vmatmul.f32.vlgmr.msrb.gmra.mxu3 %v4605_v61  ;;  %380 = vmatpush.msra.mxu1 %v330_v50  ;;  %v3573_v48 = vld [vmem:[%s7623_s1 + $0x610] sm:$0xff]  ;;  %v3501_v50 = vld [vmem:[%s7623_s1 + $0x400] sm:$0xff] }
  0xca   :  { %505 = vmatpush.msrb.mxu0 %v3531_v49  ;;  %729 = vmatpush.msra.mxu3 %v3633_v53  ;;  %v3605_v49 = vld [vmem:[%s7623_s1 + $0x710] sm:$0xff]  ;;  %v3571_v52 = vld [vmem:[%s7623_s1 + $0x600] sm:$0xff] }
  0xcb   :  { %525 = vmatpush.msrb.mxu1 %v3563_v51  ;;  %710 = vmatpush.msra.mxu2 %v3599_v56  ;;  %v3533_v51 = vld [vmem:[%s7623_s1 + $0x500] sm:$0xff] }
  0xcc   :  { %506 = vmatpush.msrb.mxu0 %v3529_v54  ;;  %730 = vmatpush.msra.mxu3 %v3631_v57  ;;  %v3603_v53 = vld [vmem:[%s7623_s1 + $0x700] sm:$0xff] }
  0xcd   :  { %526 = vmatpush.msrb.mxu1 %v3561_v55  ;;  %711 = vmatpush.msra.mxu2 %v3597_v62 }
  0xce   :  { %507 = vmatpush.msrb.mxu0 %v3527_v58  ;;  %731 = vmatpush.msra.mxu3 %v3629_v63  ;;  %v3565_v63 = vld [vmem:[%s7624_s2 + $0x20] sm:$0xff] }
  0xcf   :  { %527 = vmatpush.msrb.mxu1 %v3559_v59  ;;  %712 = vmatpush.msra.mxu2 %v3595_v2  ;;  %v3630_v2 = vld [vmem:[%s7623_s1 + $0x7d8] sm:$0xff] }
  0xd0   :  { %508 = vmatpush.msrb.mxu0 %v3525_v0  ;;  %732 = vmatpush.msra.mxu3 %v3627_v3  ;;  %v3634_v0 = vld [vmem:[%s7623_s1 + $0x7f8] sm:$0xff]  ;;  %v3628_v3 = vld [vmem:[%s7623_s1 + $0x7c8] sm:$0xff] }
  0xd1   :  { %528 = vmatpush.msrb.mxu1 %v3557_v1  ;;  %713 = vmatpush.msra.mxu2 %v3593_v6  ;;  %v3632_v1 = vld [vmem:[%s7623_s1 + $0x7e8] sm:$0xff] }
  0xd2   :  { %509 = vmatpush.msrb.mxu0 %v3523_v4  ;;  %733 = vmatpush.msra.mxu3 %v3625_v7  ;;  %v3566_v4 = vld [vmem:[%s7624_s2 + $0x28] sm:$0xff] }
  0xd3   :  { %529 = vmatpush.msrb.mxu1 %v3555_v5  ;;  %714 = vmatpush.msra.mxu2 %v3591_v10  ;;  %v3626_v5 = vld [vmem:[%s7623_s1 + $0x7b8] sm:$0xff]  ;;  %v3620_v10 = vld [vmem:[%s7623_s1 + $0x788] sm:$0xff] }
  0xd4   :  { %510 = vmatpush.msrb.mxu0 %v3521_v8  ;;  %734 = vmatpush.msra.mxu3 %v3623_v11  ;;  %v3624_v8 = vld [vmem:[%s7623_s1 + $0x7a8] sm:$0xff]  ;;  %v3618_v11 = vld [vmem:[%s7623_s1 + $0x778] sm:$0xff] }
  0xd5   :  { %530 = vmatpush.msrb.mxu1 %v3553_v9  ;;  %715 = vmatpush.msra.mxu2 %v3589_v14  ;;  %v3622_v9 = vld [vmem:[%s7623_s1 + $0x798] sm:$0xff] }
  0xd6   :  { %511 = vmatpush.msrb.mxu0 %v3519_v12  ;;  %735 = vmatpush.msra.mxu3 %v3621_v15  ;;  %v3614_v15 = vld [vmem:[%s7623_s1 + $0x758] sm:$0xff] }
  0xd7   :  { %531 = vmatpush.msrb.mxu1 %v3551_v13  ;;  %716 = vmatpush.msra.mxu2 %v3587_v18  ;;  %v3616_v13 = vld [vmem:[%s7623_s1 + $0x768] sm:$0xff] }
  0xd8   :  { %512 = vmatpush.msrb.mxu0 %v3517_v16  ;;  %736 = vmatpush.msra.mxu3 %v3619_v19  ;;  %v3612_v16 = vld [vmem:[%s7623_s1 + $0x748] sm:$0xff] }
  0xd9   :  { %532 = vmatpush.msrb.mxu1 %v3549_v17  ;;  %3493 = vmatmul.msk.f32.vlgmr.msra.gmra.mxu0 %vm335_vm0, %v3491_v20  ;;  %v3610_v17 = vld [vmem:[%s7623_s1 + $0x738] sm:$0xff]  ;;  %v3608_v18 = vld [vmem:[%s7623_s1 + $0x728] sm:$0xff] }
  0xda   :  { %3495 = vmatmul.msk.f32.vlgmr.msra.gmra.mxu1 %vm335_vm0, %v3491_v20  ;;  %513 = vmatpush.msrb.mxu0 %v3515_v21  ;;  %v3606_v21 = vld [vmem:[%s7623_s1 + $0x718] sm:$0xff] }
  0xdb   :  { %533 = vmatpush.msrb.mxu1 %v3547_v22  ;;  %717 = vmatpush.msra.mxu2 %v3585_v23  ;;  %v3602_v23 = vld [vmem:[%s7623_s1 + $0x6f8] sm:$0xff] }
  0xdc   :  { %737 = vmatpush.msra.mxu3 %v3617_v24  ;;  %514 = vmatpush.msrb.mxu0 %v3513_v25  ;;  %v3604_v24 = vld [vmem:[%s7623_s1 + $0x708] sm:$0xff] }
  0xdd   :  { %534 = vmatpush.msrb.mxu1 %v3545_v26  ;;  %718 = vmatpush.msra.mxu2 %v3583_v27  ;;  %v3600_v25 = vld [vmem:[%s7623_s1 + $0x6e8] sm:$0xff]  ;;  %v3703_v26 = vld [vmem:[%s7623_s1 + $0x9f0] sm:$0xff] }
  0xde   :  { %738 = vmatpush.msra.mxu3 %v3615_v28  ;;  %515 = vmatpush.msrb.mxu0 %v3511_v29  ;;  %v3598_v28 = vld [vmem:[%s7623_s1 + $0x6d8] sm:$0xff]  ;;  %v3701_v29 = vld [vmem:[%s7623_s1 + $0x9e0] sm:$0xff] }
  0xdf   :  { %535 = vmatpush.msrb.mxu1 %v3543_v30  ;;  %719 = vmatpush.msra.mxu2 %v3581_v31 }
  0xe0   :  { %739 = vmatpush.msra.mxu3 %v3613_v32  ;;  %516 = vmatpush.msrb.mxu0 %v3509_v33  ;;  %v3596_v32 = vld [vmem:[%s7623_s1 + $0x6c8] sm:$0xff]  ;;  %v5228_v33 = vld [vmem:[%s7624_s2 + $0x30] sm:$0xff] }
  0xe1   :  { %536 = vmatpush.msrb.mxu1 %v3541_v34  ;;  %720 = vmatpush.msra.mxu2 %v3579_v35  ;;  %v3594_v34 = vld [vmem:[%s7623_s1 + $0x6b8] sm:$0xff]  ;;  %v3697_v35 = vld [vmem:[%s7623_s1 + $0x9c0] sm:$0xff] }
  0xe2   :  { %740 = vmatpush.msra.mxu3 %v3611_v36  ;;  %3494 = vmatmul.msk.f32.gmra.mxu0 %vm335_vm0, %v3492_v37  ;;  %v3592_v36 = vld [vmem:[%s7623_s1 + $0x6a8] sm:$0xff] }
  0xe3   :  { %3496 = vmatmul.msk.f32.gmra.mxu1 %vm335_vm0, %v3492_v37  ;;  %517 = vmatpush.msrb.mxu0 %v3507_v38  ;;  %v3695_v37 = vld [vmem:[%s7623_s1 + $0x9b0] sm:$0xff]  ;;  %v3590_v38 = vld [vmem:[%s7623_s1 + $0x698] sm:$0xff] }
  0xe4   :  { %537 = vmatpush.msrb.mxu1 %v3539_v39  ;;  %721 = vmatpush.msra.mxu2 %v3577_v40  ;;  %v3693_v39 = vld [vmem:[%s7623_s1 + $0x9a0] sm:$0xff]  ;;  %v3588_v40 = vld [vmem:[%s7623_s1 + $0x688] sm:$0xff] }
  0xe5   :  { %741 = vmatpush.msra.mxu3 %v3609_v41  ;;  %518 = vmatpush.msrb.mxu0 %v3505_v42  ;;  %v5260_v41 = vld [vmem:[%s7624_s2 + $0x38] sm:$0xff]  ;;  %v3691_v42 = vld [vmem:[%s7623_s1 + $0x990] sm:$0xff] }
  0xe6   :  { %538 = vmatpush.msrb.mxu1 %v3537_v43  ;;  %722 = vmatpush.msra.mxu2 %v3575_v44  ;;  %v3586_v43 = vld [vmem:[%s7623_s1 + $0x678] sm:$0xff]  ;;  %v3689_v44 = vld [vmem:[%s7623_s1 + $0x980] sm:$0xff] }
  0xe7   :  { %742 = vmatpush.msra.mxu3 %v3607_v45  ;;  %519 = vmatpush.msrb.mxu0 %v3503_v46  ;;  %v3584_v45 = vld [vmem:[%s7623_s1 + $0x668] sm:$0xff]  ;;  %v3687_v46 = vld [vmem:[%s7623_s1 + $0x970] sm:$0xff] }
  0xe8   :  { %539 = vmatpush.msrb.mxu1 %v3535_v47  ;;  %723 = vmatpush.msra.mxu2 %v3573_v48  ;;  %v3582_v47 = vld [vmem:[%s7623_s1 + $0x658] sm:$0xff]  ;;  %v3685_v48 = vld [vmem:[%s7623_s1 + $0x960] sm:$0xff] }
  0xe9   :  { %743 = vmatpush.msra.mxu3 %v3605_v49  ;;  %520 = vmatpush.msrb.mxu0 %v3501_v50  ;;  %v3580_v49 = vld [vmem:[%s7623_s1 + $0x648] sm:$0xff]  ;;  %v3683_v50 = vld [vmem:[%s7623_s1 + $0x950] sm:$0xff] }
  0xea   :  { %540 = vmatpush.msrb.mxu1 %v3533_v51  ;;  %724 = vmatpush.msra.mxu2 %v3571_v52  ;;  %v3578_v51 = vld [vmem:[%s7623_s1 + $0x638] sm:$0xff]  ;;  %v3681_v52 = vld [vmem:[%s7623_s1 + $0x940] sm:$0xff] }
  0xeb   :  { %744 = vmatpush.msra.mxu3 %v3603_v53  ;;  %521 = vmatmul.f32.vlgmr.msrb.gmra.mxu0 %v4600_v60  ;;  %v3576_v53 = vld [vmem:[%s7623_s1 + $0x628] sm:$0xff] }
  0xec   :  { %541 = vmatmul.f32.vlgmr.msrb.gmra.mxu1 %v4605_v61  ;;  %725 = vmatmul.f32.vlgmr.msra.gmra.mxu2 %v4600_v60 }
  0xed   :  { %745 = vmatmul.f32.vlgmr.msra.gmra.mxu3 %v4605_v61 }
 0x129   :  { %v5133_v54 = vpop.f32.mrf.mxu2 }
 0x12c   :  { %v5135_v55 = vpop.f32.mrf.mxu3 }
 0x131   :  { %v5137_v56 = vpop.f32.mrf.mxu2 }
 0x134   :  { %v5139_v57 = vpop.f32.mrf.mxu3 }
 0x149   :  { %v562_v58 = vpop.f32.mrf.mxu2 }
 0x14c   :  { %v582_v59 = vpop.f32.mrf.mxu3 }
 0x14d   :  { %v583_v62 = vadd.f32 %v582_v59, %v562_v58  ;;  %v3679_v58 = vld [vmem:[%s7623_s1 + $0x930] sm:$0xff]  ;;  %v3574_v59 = vld [vmem:[%s7623_s1 + $0x618] sm:$0xff] }
 0x14f   :  { %632 = vmatpush.msra.mxu1 %v583_v62  ;;  %v3677_v62 = vld [vmem:[%s7623_s1 + $0x920] sm:$0xff] }
 0x150   :  { %3569 = vmatmul.msk.f32.vlgmr.msra.gmra.mxu1 %vm335_vm0, %v3565_v63 }
 0x151   :  { %769 = vmatpush.msrb.mxu1 %v3634_v0  ;;  %v3675_v0 = vld [vmem:[%s7623_s1 + $0x910] sm:$0xff] }
 0x153   :  { %770 = vmatpush.msrb.mxu1 %v3632_v1  ;;  %v3671_v1 = vld [vmem:[%s7623_s1 + $0x8f0] sm:$0xff] }
 0x155   :  { %771 = vmatpush.msrb.mxu1 %v3630_v2  ;;  %v3673_v2 = vld [vmem:[%s7623_s1 + $0x900] sm:$0xff] }
 0x156   :  { %v5163_v6 = vpop.f32.mrf.mxu0 }
 0x157   :  { %772 = vmatpush.msrb.mxu1 %v3628_v3  ;;  %v5165_v7 = vpop.f32.mrf.mxu1  ;;  %v3669_v3 = vld [vmem:[%s7623_s1 + $0x8e0] sm:$0xff] }
 0x158   :  { %3570 = vmatmul.msk.f32.gmra.mxu1 %vm335_vm0, %v3566_v4 }
 0x159   :  { %773 = vmatpush.msrb.mxu1 %v3626_v5  ;;  %v5331_v5 = vld [vmem:[%s7622_s0 + $0x8] sm:$0xff] }
 0x15b   :  { %774 = vmatpush.msrb.mxu1 %v3624_v8  ;;  %v3663_v8 = vld [vmem:[%s7623_s1 + $0x8b0] sm:$0xff] }
 0x15d   :  { %775 = vmatpush.msrb.mxu1 %v3622_v9  ;;  %v3661_v9 = vld [vmem:[%s7623_s1 + $0x8a0] sm:$0xff] }
 0x15f   :  { %776 = vmatpush.msrb.mxu1 %v3620_v10  ;;  %v5180_v12 = vpop.f32.mrf.mxu0  ;;  %v3659_v10 = vld [vmem:[%s7623_s1 + $0x890] sm:$0xff] }
 0x160   :  { %v5185_v14 = vpop.f32.mrf.mxu1 }
 0x161   :  { %777 = vmatpush.msrb.mxu1 %v3618_v11  ;;  %v3657_v11 = vld [vmem:[%s7623_s1 + $0x880] sm:$0xff] }
 0x163   :  { %778 = vmatpush.msrb.mxu1 %v3616_v13  ;;  %v3655_v13 = vld [vmem:[%s7623_s1 + $0x870] sm:$0xff] }
 0x165   :  { %779 = vmatpush.msrb.mxu1 %v3614_v15  ;;  %v3653_v15 = vld [vmem:[%s7623_s1 + $0x860] sm:$0xff] }
 0x167   :  { %780 = vmatpush.msrb.mxu1 %v3612_v16  ;;  %v3651_v16 = vld [vmem:[%s7623_s1 + $0x850] sm:$0xff] }
 0x168   :  { %v522_v19 = vpop.f32.mrf.mxu0 }
 0x169   :  { %781 = vmatpush.msrb.mxu1 %v3610_v17  ;;  %v542_v20 = vpop.f32.mrf.mxu1  ;;  %v3649_v17 = vld [vmem:[%s7623_s1 + $0x840] sm:$0xff] }
 0x16a   :  { %v543_v22 = vadd.f32 %v542_v20, %v522_v19  ;;  %v3645_v19 = vld [vmem:[%s7623_s1 + $0x820] sm:$0xff]  ;;  %v3643_v20 = vld [vmem:[%s7623_s1 + $0x810] sm:$0xff] }
 0x16b   :  { %782 = vmatpush.msrb.mxu1 %v3608_v18  ;;  %v3647_v18 = vld [vmem:[%s7623_s1 + $0x830] sm:$0xff] }
 0x16c   :  { %609 = vmatpush.msra.mxu0 %v543_v22  ;;  %v5376_v22 = vld [vmem:[%s7622_s0] sm:$0xff] }
 0x16d   :  { %783 = vmatpush.msrb.mxu1 %v3606_v21  ;;  %3567 = vmatmul.msk.f32.vlgmr.msra.gmra.mxu0 %vm335_vm0, %v3565_v63  ;;  %v3572_v63 = vld [vmem:[%s7623_s1 + $0x608] sm:$0xff]  ;;  %v3641_v21 = vld [vmem:[%s7623_s1 + $0x800] sm:$0xff] }
 0x16e   :  { %749 = vmatpush.msrb.mxu0 %v3602_v23  ;;  %v3672_v23 = vld [vmem:[%s7623_s1 + $0x8f8] sm:$0xff] }
 0x16f   :  { %784 = vmatpush.msrb.mxu1 %v3604_v24  ;;  %v726_v27 = vpop.f32.mrf.mxu2  ;;  %v3670_v24 = vld [vmem:[%s7623_s1 + $0x8e8] sm:$0xff] }
 0x170   :  { %785 = vmatmul.f32.vlgmr.msrb.gmra.mxu1 %v4605_v61  ;;  %v746_v30 = vpop.f32.mrf.mxu3  ;;  %750 = vmatpush.msrb.mxu0 %v3600_v25  ;;  %v3699_v61 = vld [vmem:[%s7623_s1 + $0x9d0] sm:$0xff]  ;;  %v3668_v25 = vld [vmem:[%s7623_s1 + $0x8d8] sm:$0xff] }
 0x171   :  { %933 = vmatpush.msra.mxu1 %v3703_v26  ;;  %v747_v31 = vadd.f32 %v746_v30, %v726_v27  ;;  %v3666_v26 = vld [vmem:[%s7623_s1 + $0x8c8] sm:$0xff] }
 0x172   :  { %751 = vmatpush.msrb.mxu0 %v3598_v28  ;;  %v3664_v28 = vld [vmem:[%s7623_s1 + $0x8b8] sm:$0xff] }
 0x173   :  { %934 = vmatpush.msra.mxu1 %v3701_v29  ;;  %813 = vmatpush.msrb.mxu2 %v747_v31  ;;  %v3662_v29 = vld [vmem:[%s7623_s1 + $0x8a8] sm:$0xff]  ;;  %v3660_v31 = vld [vmem:[%s7623_s1 + $0x898] sm:$0xff] }
 0x174   :  { %752 = vmatpush.msrb.mxu0 %v3596_v32  ;;  %3637 = vmatmul.msk.f32.vlgmr.msrb.gmra.mxu2 %vm335_vm0, %v5228_v33  ;;  %v3658_v32 = vld [vmem:[%s7623_s1 + $0x888] sm:$0xff] }
 0x175   :  { %3568 = vmatmul.msk.f32.gmra.mxu0 %vm335_vm0, %v3566_v4  ;;  %935 = vmatpush.msra.mxu1 %v3699_v61  ;;  %v3667_v4 = vld [vmem:[%s7623_s1 + $0x8d0] sm:$0xff]  ;;  %v3656_v61 = vld [vmem:[%s7623_s1 + $0x878] sm:$0xff] }
 0x176   :  { %753 = vmatpush.msrb.mxu0 %v3594_v34  ;;  %953 = vmatpush.msra.mxu2 %v3672_v23  ;;  %v3654_v34 = vld [vmem:[%s7623_s1 + $0x868] sm:$0xff] }
 0x177   :  { %936 = vmatpush.msra.mxu1 %v3697_v35 }
 0x178   :  { %754 = vmatpush.msrb.mxu0 %v3592_v36  ;;  %954 = vmatpush.msra.mxu2 %v3670_v24  ;;  %v3652_v36 = vld [vmem:[%s7623_s1 + $0x858] sm:$0xff]  ;;  %v3674_v24 = vld [vmem:[%s7623_s1 + $0x908] sm:$0xff] }
 0x179   :  { %937 = vmatpush.msra.mxu1 %v3695_v37 }
 0x17a   :  { %755 = vmatpush.msrb.mxu0 %v3590_v38  ;;  %955 = vmatpush.msra.mxu2 %v3668_v25  ;;  %v3650_v38 = vld [vmem:[%s7623_s1 + $0x848] sm:$0xff] }
 0x17b   :  { %938 = vmatpush.msra.mxu1 %v3693_v39  ;;  %v3648_v39 = vld [vmem:[%s7623_s1 + $0x838] sm:$0xff] }
 0x17c   :  { %756 = vmatpush.msrb.mxu0 %v3588_v40  ;;  %3638 = vmatmul.msk.f32.gmra.mxu2 %vm335_vm0, %v5260_v41  ;;  %v3646_v40 = vld [vmem:[%s7623_s1 + $0x828] sm:$0xff] }
 0x17d   :  { %939 = vmatpush.msra.mxu1 %v3691_v42  ;;  %956 = vmatpush.msra.mxu2 %v3666_v26  ;;  %v5536_v26 = vld [vmem:[%s7624_s2 + $0x40] sm:$0xff] }
 0x17e   :  { %757 = vmatpush.msrb.mxu0 %v3586_v43 }
 0x17f   :  { %940 = vmatpush.msra.mxu1 %v3689_v44  ;;  %957 = vmatpush.msra.mxu2 %v3664_v28  ;;  %v3644_v44 = vld [vmem:[%s7623_s1 + $0x818] sm:$0xff]  ;;  %v3773_v28 = vld [vmem:[%s7623_s1 + $0xbf0] sm:$0xff] }
 0x180   :  { %758 = vmatpush.msrb.mxu0 %v3584_v45 }
 0x181   :  { %941 = vmatpush.msra.mxu1 %v3687_v46  ;;  %958 = vmatpush.msra.mxu2 %v3662_v29  ;;  %v3642_v46 = vld [vmem:[%s7623_s1 + $0x808] sm:$0xff]  ;;  %v3711_v29 = vld [vmem:[%s7623_s1 + $0xa00] sm:$0xff] }
 0x182   :  { %759 = vmatpush.msrb.mxu0 %v3582_v47  ;;  %v3704_v47 = vld [vmem:[%s7623_s1 + $0x9f8] sm:$0xff] }
 0x183   :  { %942 = vmatpush.msra.mxu1 %v3685_v48  ;;  %959 = vmatpush.msra.mxu2 %v3660_v31  ;;  %v3741_v48 = vld [vmem:[%s7623_s1 + $0xaf0] sm:$0xff]  ;;  %v3771_v31 = vld [vmem:[%s7623_s1 + $0xbe0] sm:$0xff] }
 0x184   :  { %760 = vmatpush.msrb.mxu0 %v3580_v49  ;;  %v3702_v49 = vld [vmem:[%s7623_s1 + $0x9e8] sm:$0xff] }
 0x185   :  { %943 = vmatpush.msra.mxu1 %v3683_v50  ;;  %960 = vmatpush.msra.mxu2 %v3658_v32  ;;  %v3739_v50 = vld [vmem:[%s7623_s1 + $0xae0] sm:$0xff]  ;;  %v3769_v32 = vld [vmem:[%s7623_s1 + $0xbd0] sm:$0xff] }
 0x186   :  { %761 = vmatpush.msrb.mxu0 %v3578_v51  ;;  %v3700_v51 = vld [vmem:[%s7623_s1 + $0x9d8] sm:$0xff] }
 0x187   :  { %944 = vmatpush.msra.mxu1 %v3681_v52  ;;  %961 = vmatpush.msra.mxu2 %v3656_v61  ;;  %v3698_v52 = vld [vmem:[%s7623_s1 + $0x9c8] sm:$0xff]  ;;  %v3767_v61 = vld [vmem:[%s7623_s1 + $0xbc0] sm:$0xff] }
 0x188   :  { %762 = vmatpush.msrb.mxu0 %v3576_v53  ;;  %v3735_v53 = vld [vmem:[%s7623_s1 + $0xac0] sm:$0xff] }
 0x189   :  { %945 = vmatpush.msra.mxu1 %v3679_v58  ;;  %962 = vmatpush.msra.mxu2 %v3654_v34  ;;  %v3696_v58 = vld [vmem:[%s7623_s1 + $0x9b8] sm:$0xff]  ;;  %v5560_v34 = vld [vmem:[%s7624_s2 + $0x48] sm:$0xff] }
 0x18a   :  { %763 = vmatpush.msrb.mxu0 %v3574_v59  ;;  %v3694_v59 = vld [vmem:[%s7623_s1 + $0x9a8] sm:$0xff] }
 0x18b   :  { %946 = vmatpush.msra.mxu1 %v3677_v62  ;;  %963 = vmatpush.msra.mxu2 %v3652_v36  ;;  %v3733_v62 = vld [vmem:[%s7623_s1 + $0xab0] sm:$0xff] }
 0x18c   :  { %764 = vmatpush.msrb.mxu0 %v3572_v63  ;;  %v3731_v63 = vld [vmem:[%s7623_s1 + $0xaa0] sm:$0xff]  ;;  %v3765_v36 = vld [vmem:[%s7623_s1 + $0xbb0] sm:$0xff] }
 0x18d   :  { %765 = vmatmul.f32.vlgmr.msrb.gmra.mxu0 %v4600_v60  ;;  %947 = vmatpush.msra.mxu1 %v3675_v0  ;;  %v3665_v60 = vld [vmem:[%s7623_s1 + $0x8c0] sm:$0xff]  ;;  %v3692_v0 = vld [vmem:[%s7623_s1 + $0x998] sm:$0xff] }
 0x18e   :  { %913 = vmatpush.msra.mxu0 %v3671_v1  ;;  %964 = vmatpush.msra.mxu2 %v3650_v38  ;;  %v3690_v1 = vld [vmem:[%s7623_s1 + $0x988] sm:$0xff]  ;;  %v3763_v38 = vld [vmem:[%s7623_s1 + $0xba0] sm:$0xff] }
 0x18f   :  { %948 = vmatpush.msra.mxu1 %v3673_v2  ;;  %v3727_v2 = vld [vmem:[%s7623_s1 + $0xa80] sm:$0xff] }
 0x190   :  { %914 = vmatpush.msra.mxu0 %v3669_v3  ;;  %949 = vmatmul.f32.vlgmr.msra.gmra.mxu1 %v5331_v5  ;;  %v3688_v3 = vld [vmem:[%s7623_s1 + $0x978] sm:$0xff] }
 0x191   :  { %965 = vmatpush.msra.mxu2 %v3648_v39  ;;  %v3761_v39 = vld [vmem:[%s7623_s1 + $0xb90] sm:$0xff] }
 0x192   :  { %915 = vmatpush.msra.mxu0 %v3667_v4  ;;  %v3725_v4 = vld [vmem:[%s7623_s1 + $0xa70] sm:$0xff] }
 0x193   :  { %966 = vmatpush.msra.mxu2 %v3646_v40  ;;  %v3759_v40 = vld [vmem:[%s7623_s1 + $0xb80] sm:$0xff] }
 0x194   :  { %916 = vmatpush.msra.mxu0 %v3665_v60  ;;  %v3686_v60 = vld [vmem:[%s7623_s1 + $0x968] sm:$0xff] }
 0x195   :  { %967 = vmatpush.msra.mxu2 %v3644_v44  ;;  %v3753_v44 = vld [vmem:[%s7623_s1 + $0xb50] sm:$0xff] }
 0x196   :  { %917 = vmatpush.msra.mxu0 %v3663_v8  ;;  %v3723_v8 = vld [vmem:[%s7623_s1 + $0xa60] sm:$0xff] }
 0x197   :  { %968 = vmatpush.msra.mxu2 %v3642_v46  ;;  %v3749_v46 = vld [vmem:[%s7623_s1 + $0xb30] sm:$0xff] }
 0x198   :  { %918 = vmatpush.msra.mxu0 %v3661_v9  ;;  %969 = vmatmul.f32.vlgmr.msra.gmra.mxu2 %v5376_v22  ;;  %v3684_v9 = vld [vmem:[%s7623_s1 + $0x958] sm:$0xff] }
 0x199   :  { %1117 = vmatpush.msrb.mxu2 %v3741_v48  ;;  %v3745_v48 = vld [vmem:[%s7623_s1 + $0xb10] sm:$0xff] }
 0x19a   :  { %919 = vmatpush.msra.mxu0 %v3659_v10  ;;  %v3721_v10 = vld [vmem:[%s7623_s1 + $0xa50] sm:$0xff] }
 0x19b   :  { %1118 = vmatpush.msrb.mxu2 %v3739_v50  ;;  %v3742_v50 = vld [vmem:[%s7623_s1 + $0xaf8] sm:$0xff] }
 0x19c   :  { %920 = vmatpush.msra.mxu0 %v3657_v11  ;;  %v3682_v11 = vld [vmem:[%s7623_s1 + $0x948] sm:$0xff] }
 0x19e   :  { %921 = vmatpush.msra.mxu0 %v3655_v13  ;;  %v3719_v13 = vld [vmem:[%s7623_s1 + $0xa40] sm:$0xff] }
 0x1a0   :  { %922 = vmatpush.msra.mxu0 %v3653_v15  ;;  %v3680_v15 = vld [vmem:[%s7623_s1 + $0x938] sm:$0xff] }
 0x1a2   :  { %923 = vmatpush.msra.mxu0 %v3651_v16  ;;  %v3717_v16 = vld [vmem:[%s7623_s1 + $0xa30] sm:$0xff] }
 0x1a4   :  { %924 = vmatpush.msra.mxu0 %v3649_v17  ;;  %v3678_v17 = vld [vmem:[%s7623_s1 + $0x928] sm:$0xff] }
 0x1a6   :  { %925 = vmatpush.msra.mxu0 %v3647_v18  ;;  %v3715_v18 = vld [vmem:[%s7623_s1 + $0xa20] sm:$0xff] }
 0x1a8   :  { %926 = vmatpush.msra.mxu0 %v3645_v19 }
 0x1aa   :  { %927 = vmatpush.msra.mxu0 %v3643_v20  ;;  %v3676_v20 = vld [vmem:[%s7623_s1 + $0x918] sm:$0xff] }
 0x1ac   :  { %928 = vmatpush.msra.mxu0 %v3641_v21  ;;  %v3713_v21 = vld [vmem:[%s7623_s1 + $0xa10] sm:$0xff] }
 0x1ad   :  { %929 = vmatmul.f32.vlgmr.msra.gmra.mxu0 %v5376_v22 }
 0x1cd   :  { %v5391_v27 = vpop.f32.mrf.mxu1 }
 0x1d5   :  { %v5413_v35 = vpop.f32.mrf.mxu1 }
 0x1ea   :  { %v5399_v30 = vpop.f32.mrf.mxu0 }
 0x1ed   :  { %v786_v42 = vpop.f32.mrf.mxu1 }
 0x1f2   :  { %v5418_v37 = vpop.f32.mrf.mxu0 }
 0x20a   :  { %v766_v43 = vpop.f32.mrf.mxu0 }
 0x20b   :  { %v787_v45 = vadd.f32 %v786_v42, %v766_v43  ;;  %v3757_v42 = vld [vmem:[%s7623_s1 + $0xb70] sm:$0xff]  ;;  %v3755_v43 = vld [vmem:[%s7623_s1 + $0xb60] sm:$0xff] }
 0x20d   :  { %836 = vmatpush.msrb.mxu3 %v787_v45  ;;  %v950_v19 = vpop.f32.mrf.mxu1  ;;  %v3751_v45 = vld [vmem:[%s7623_s1 + $0xb40] sm:$0xff] }
 0x20e   :  { %3639 = vmatmul.msk.f32.vlgmr.msrb.gmra.mxu3 %vm335_vm0, %v5228_v33  ;;  %v3737_v33 = vld [vmem:[%s7623_s1 + $0xad0] sm:$0xff] }
 0x20f   :  { %973 = vmatpush.msra.mxu3 %v3704_v47  ;;  %1119 = vmatpush.msrb.mxu2 %v3737_v33  ;;  %v3747_v47 = vld [vmem:[%s7623_s1 + $0xb20] sm:$0xff]  ;;  %v3738_v33 = vld [vmem:[%s7623_s1 + $0xad8] sm:$0xff] }
 0x211   :  { %974 = vmatpush.msra.mxu3 %v3702_v49  ;;  %1120 = vmatpush.msrb.mxu2 %v3735_v53  ;;  %v3743_v49 = vld [vmem:[%s7623_s1 + $0xb00] sm:$0xff]  ;;  %v5613_v53 = vpop.f32.mrf.mxu2 }
 0x213   :  { %975 = vmatpush.msra.mxu3 %v3700_v51  ;;  %1121 = vmatpush.msrb.mxu2 %v3733_v62  ;;  %v3740_v51 = vld [vmem:[%s7623_s1 + $0xae8] sm:$0xff] }
 0x215   :  { %976 = vmatpush.msra.mxu3 %v3698_v52  ;;  %1122 = vmatpush.msrb.mxu2 %v3731_v63  ;;  %v3736_v52 = vld [vmem:[%s7623_s1 + $0xac8] sm:$0xff]  ;;  %v3730_v63 = vld [vmem:[%s7623_s1 + $0xa98] sm:$0xff] }
 0x216   :  { %3640 = vmatmul.msk.f32.gmra.mxu3 %vm335_vm0, %v5260_v41  ;;  %v3729_v41 = vld [vmem:[%s7623_s1 + $0xa90] sm:$0xff] }
 0x217   :  { %977 = vmatpush.msra.mxu3 %v3696_v58  ;;  %1123 = vmatpush.msrb.mxu2 %v3729_v41  ;;  %v3734_v58 = vld [vmem:[%s7623_s1 + $0xab8] sm:$0xff] }
 0x218   :  { %v3726_v41 = vld [vmem:[%s7623_s1 + $0xa78] sm:$0xff] }
 0x219   :  { %978 = vmatpush.msra.mxu3 %v3694_v59  ;;  %1124 = vmatpush.msrb.mxu2 %v3727_v2  ;;  %v3732_v59 = vld [vmem:[%s7623_s1 + $0xaa8] sm:$0xff]  ;;  %v5635_v2 = vpop.f32.mrf.mxu2 }
 0x21b   :  { %979 = vmatpush.msra.mxu3 %v3692_v0  ;;  %1125 = vmatpush.msrb.mxu2 %v3725_v4  ;;  %v3728_v0 = vld [vmem:[%s7623_s1 + $0xa88] sm:$0xff] }
 0x21d   :  { %980 = vmatpush.msra.mxu3 %v3690_v1  ;;  %1126 = vmatpush.msrb.mxu2 %v3723_v8  ;;  %v3724_v1 = vld [vmem:[%s7623_s1 + $0xa68] sm:$0xff]  ;;  %v3718_v8 = vld [vmem:[%s7623_s1 + $0xa38] sm:$0xff] }
 0x21f   :  { %981 = vmatpush.msra.mxu3 %v3688_v3  ;;  %1127 = vmatpush.msrb.mxu2 %v3721_v10  ;;  %v3722_v3 = vld [vmem:[%s7623_s1 + $0xa58] sm:$0xff] }
 0x221   :  { %982 = vmatpush.msra.mxu3 %v3686_v60  ;;  %1128 = vmatpush.msrb.mxu2 %v3719_v13  ;;  %v3720_v60 = vld [vmem:[%s7623_s1 + $0xa48] sm:$0xff]  ;;  %v970_v10 = vpop.f32.mrf.mxu2  ;;  %v3714_v13 = vld [vmem:[%s7623_s1 + $0xa18] sm:$0xff] }
 0x223   :  { %983 = vmatpush.msra.mxu3 %v3684_v9  ;;  %1129 = vmatpush.msrb.mxu2 %v3717_v16  ;;  %v3716_v9 = vld [vmem:[%s7623_s1 + $0xa28] sm:$0xff] }
 0x224   :  { %v3712_v16 = vld [vmem:[%s7623_s1 + $0xa08] sm:$0xff] }
 0x225   :  { %984 = vmatpush.msra.mxu3 %v3682_v11  ;;  %1130 = vmatpush.msrb.mxu2 %v3715_v18  ;;  %v3811_v18 = vld [vmem:[%s7623_s1 + $0xcf0] sm:$0xff] }
 0x227   :  { %985 = vmatpush.msra.mxu3 %v3680_v15  ;;  %1131 = vmatpush.msrb.mxu2 %v3713_v21  ;;  %v3770_v21 = vld [vmem:[%s7623_s1 + $0xbd8] sm:$0xff] }
 0x229   :  { %986 = vmatpush.msra.mxu3 %v3678_v17  ;;  %1132 = vmatpush.msrb.mxu2 %v3711_v29  ;;  %v3774_v17 = vld [vmem:[%s7623_s1 + $0xbf8] sm:$0xff]  ;;  %v3803_v29 = vld [vmem:[%s7623_s1 + $0xcb0] sm:$0xff] }
 0x22a   :  { %v930_v23 = vpop.f32.mrf.mxu0  ;;  %1133 = vmatmul.f32.vlgmr.msrb.gmra.mxu2 %v5376_v22 }
 0x22b   :  { %v951_v25 = vadd.f32 %v950_v19, %v930_v23  ;;  %987 = vmatpush.msra.mxu3 %v3676_v20  ;;  %v3772_v19 = vld [vmem:[%s7623_s1 + $0xbe8] sm:$0xff]  ;;  %v3809_v20 = vld [vmem:[%s7623_s1 + $0xce0] sm:$0xff]  ;;  %v3807_v23 = vld [vmem:[%s7623_s1 + $0xcd0] sm:$0xff] }
 0x22d   :  { %988 = vmatpush.msra.mxu3 %v3674_v24  ;;  %1017 = vmatpush.msrb.mxu0 %v951_v25  ;;  %v3768_v24 = vld [vmem:[%s7623_s1 + $0xbc8] sm:$0xff]  ;;  %v3805_v25 = vld [vmem:[%s7623_s1 + $0xcc0] sm:$0xff] }
 0x22e   :  { %989 = vmatmul.f32.vlgmr.msra.gmra.mxu3 %v5331_v5  ;;  %3707 = vmatmul.msk.f32.vlgmr.msrb.gmra.mxu0 %vm335_vm0, %v5536_v26 }
 0x22f   :  { %1137 = vmatpush.msrb.mxu3 %v3773_v28  ;;  %1157 = vmatpush.msra.mxu0 %v3742_v50  ;;  %v3764_v28 = vld [vmem:[%s7623_s1 + $0xba8] sm:$0xff]  ;;  %v3785_v50 = vld [vmem:[%s7623_s1 + $0xc20] sm:$0xff] }
 0x231   :  { %1138 = vmatpush.msrb.mxu3 %v3771_v31  ;;  %1158 = vmatpush.msra.mxu0 %v3740_v51  ;;  %v3801_v31 = vld [vmem:[%s7623_s1 + $0xca0] sm:$0xff] }
 0x233   :  { %1139 = vmatpush.msrb.mxu3 %v3769_v32  ;;  %1159 = vmatpush.msra.mxu0 %v3738_v33  ;;  %v3762_v32 = vld [vmem:[%s7623_s1 + $0xb98] sm:$0xff] }
 0x234   :  { %v3746_v33 = vld [vmem:[%s7623_s1 + $0xb18] sm:$0xff] }
 0x235   :  { %1140 = vmatpush.msrb.mxu3 %v3767_v61  ;;  %1160 = vmatpush.msra.mxu0 %v3736_v52  ;;  %v3799_v61 = vld [vmem:[%s7623_s1 + $0xc90] sm:$0xff] }
 0x236   :  { %3708 = vmatmul.msk.f32.gmra.mxu0 %vm335_vm0, %v5560_v34  ;;  %v3783_v52 = vld [vmem:[%s7623_s1 + $0xc10] sm:$0xff] }
 0x237   :  { %1141 = vmatpush.msrb.mxu3 %v3765_v36  ;;  %1161 = vmatpush.msra.mxu0 %v3734_v58  ;;  %v3797_v36 = vld [vmem:[%s7623_s1 + $0xc80] sm:$0xff] }
 0x239   :  { %1142 = vmatpush.msrb.mxu3 %v3763_v38  ;;  %1162 = vmatpush.msra.mxu0 %v3732_v59  ;;  %v3758_v38 = vld [vmem:[%s7623_s1 + $0xb78] sm:$0xff]  ;;  %v3744_v59 = vld [vmem:[%s7623_s1 + $0xb08] sm:$0xff] }
 0x23b   :  { %1143 = vmatpush.msrb.mxu3 %v3761_v39  ;;  %1163 = vmatpush.msra.mxu0 %v3730_v63  ;;  %v3795_v39 = vld [vmem:[%s7623_s1 + $0xc70] sm:$0xff] }
 0x23d   :  { %1144 = vmatpush.msrb.mxu3 %v3759_v40  ;;  %1164 = vmatpush.msra.mxu0 %v3728_v0  ;;  %v3756_v40 = vld [vmem:[%s7623_s1 + $0xb68] sm:$0xff]  ;;  %v5758_v0 = vld [vmem:[%s7624_s2 + $0x50] sm:$0xff] }
 0x23f   :  { %1145 = vmatpush.msrb.mxu3 %v3757_v42  ;;  %1165 = vmatpush.msra.mxu0 %v3726_v41  ;;  %v3793_v42 = vld [vmem:[%s7623_s1 + $0xc60] sm:$0xff]  ;;  %v3843_v41 = vld [vmem:[%s7623_s1 + $0xdf0] sm:$0xff] }
 0x241   :  { %1146 = vmatpush.msrb.mxu3 %v3755_v43  ;;  %1166 = vmatpush.msra.mxu0 %v3724_v1  ;;  %v3754_v43 = vld [vmem:[%s7623_s1 + $0xb58] sm:$0xff]  ;;  %v3781_v1 = vld [vmem:[%s7623_s1 + $0xc00] sm:$0xff] }
 0x243   :  { %1147 = vmatpush.msrb.mxu3 %v3753_v44  ;;  %1167 = vmatpush.msra.mxu0 %v3722_v3  ;;  %v3791_v44 = vld [vmem:[%s7623_s1 + $0xc50] sm:$0xff]  ;;  %v3841_v3 = vld [vmem:[%s7623_s1 + $0xde0] sm:$0xff] }
 0x245   :  { %1148 = vmatpush.msrb.mxu3 %v3751_v45  ;;  %1168 = vmatpush.msra.mxu0 %v3720_v60  ;;  %v3752_v45 = vld [vmem:[%s7623_s1 + $0xb48] sm:$0xff]  ;;  %v3839_v60 = vld [vmem:[%s7623_s1 + $0xdd0] sm:$0xff] }
 0x247   :  { %1149 = vmatpush.msrb.mxu3 %v3749_v46  ;;  %1169 = vmatpush.msra.mxu0 %v3718_v8  ;;  %v3789_v46 = vld [vmem:[%s7623_s1 + $0xc40] sm:$0xff] }
 0x248   :  { %v3837_v8 = vld [vmem:[%s7623_s1 + $0xdc0] sm:$0xff] }
 0x249   :  { %1150 = vmatpush.msrb.mxu3 %v3747_v47  ;;  %1170 = vmatpush.msra.mxu0 %v3716_v9  ;;  %v3750_v47 = vld [vmem:[%s7623_s1 + $0xb38] sm:$0xff] }
 0x24a   :  { %v5782_v9 = vld [vmem:[%s7624_s2 + $0x58] sm:$0xff] }
 0x24b   :  { %1151 = vmatpush.msrb.mxu3 %v3745_v48  ;;  %1171 = vmatpush.msra.mxu0 %v3714_v13  ;;  %v3787_v48 = vld [vmem:[%s7623_s1 + $0xc30] sm:$0xff] }
 0x24c   :  { %v3831_v13 = vld [vmem:[%s7623_s1 + $0xd90] sm:$0xff] }
 0x24d   :  { %1152 = vmatpush.msrb.mxu3 %v3743_v49  ;;  %1172 = vmatpush.msra.mxu0 %v3712_v16  ;;  %v3748_v49 = vld [vmem:[%s7623_s1 + $0xb28] sm:$0xff]  ;;  %v3827_v16 = vld [vmem:[%s7623_s1 + $0xd70] sm:$0xff] }
 0x24e   :  { %1153 = vmatmul.f32.vlgmr.msrb.gmra.mxu3 %v5331_v5  ;;  %1173 = vmatmul.f32.vlgmr.msra.gmra.mxu0 %v5376_v22 }
 0x24f   :  { %1321 = vmatpush.msrb.mxu0 %v3811_v18  ;;  %v3823_v18 = vld [vmem:[%s7623_s1 + $0xd50] sm:$0xff] }
 0x251   :  { %1322 = vmatpush.msrb.mxu0 %v3809_v20  ;;  %v3819_v20 = vld [vmem:[%s7623_s1 + $0xd30] sm:$0xff] }
 0x253   :  { %1323 = vmatpush.msrb.mxu0 %v3807_v23  ;;  %v3815_v23 = vld [vmem:[%s7623_s1 + $0xd10] sm:$0xff] }
 0x255   :  { %1324 = vmatpush.msrb.mxu0 %v3805_v25  ;;  %v3812_v25 = vld [vmem:[%s7623_s1 + $0xcf8] sm:$0xff] }
 0x257   :  { %1325 = vmatpush.msrb.mxu0 %v3803_v29  ;;  %v3806_v29 = vld [vmem:[%s7623_s1 + $0xcc8] sm:$0xff] }
 0x259   :  { %1326 = vmatpush.msrb.mxu0 %v3801_v31 }
 0x25b   :  { %1327 = vmatpush.msrb.mxu0 %v3799_v61 }
 0x25d   :  { %1328 = vmatpush.msrb.mxu0 %v3797_v36  ;;  %v3800_v36 = vld [vmem:[%s7623_s1 + $0xc98] sm:$0xff] }
 0x25f   :  { %1329 = vmatpush.msrb.mxu0 %v3795_v39  ;;  %v3796_v39 = vld [vmem:[%s7623_s1 + $0xc78] sm:$0xff] }
 0x261   :  { %1330 = vmatpush.msrb.mxu0 %v3793_v42 }
 0x263   :  { %1331 = vmatpush.msrb.mxu0 %v3791_v44 }
 0x265   :  { %1332 = vmatpush.msrb.mxu0 %v3789_v46  ;;  %v3788_v46 = vld [vmem:[%s7623_s1 + $0xc38] sm:$0xff] }
 0x267   :  { %1333 = vmatpush.msrb.mxu0 %v3787_v48 }
 0x269   :  { %1334 = vmatpush.msrb.mxu0 %v3785_v50  ;;  %v3784_v50 = vld [vmem:[%s7623_s1 + $0xc18] sm:$0xff] }
 0x26b   :  { %1335 = vmatpush.msrb.mxu0 %v3783_v52  ;;  %v3844_v52 = vld [vmem:[%s7623_s1 + $0xdf8] sm:$0xff] }
 0x26d   :  { %1336 = vmatpush.msrb.mxu0 %v3781_v1  ;;  %v3838_v1 = vld [vmem:[%s7623_s1 + $0xdc8] sm:$0xff] }
 0x26e   :  { %1337 = vmatmul.f32.vlgmr.msrb.gmra.mxu0 %v5376_v22 }
 0x291   :  { %v5621_v62 = vpop.f32.mrf.mxu3 }
 0x299   :  { %v5640_v4 = vpop.f32.mrf.mxu3 }
 0x2ab   :  { %v5835_v31 = vpop.f32.mrf.mxu0 }
 0x2ad   :  { %v1134_v51 = vpop.f32.mrf.mxu2 }
 0x2b1   :  { %v990_v11 = vpop.f32.mrf.mxu3 }
 0x2b2   :  { %v991_v15 = vadd.f32 %v990_v11, %v970_v10  ;;  %v3835_v10 = vld [vmem:[%s7623_s1 + $0xdb0] sm:$0xff]  ;;  %v3833_v11 = vld [vmem:[%s7623_s1 + $0xda0] sm:$0xff] }
 0x2b3   :  { %v5857_v42 = vpop.f32.mrf.mxu0 }
 0x2b4   :  { %1040 = vmatpush.msrb.mxu1 %v991_v15  ;;  %v3829_v15 = vld [vmem:[%s7623_s1 + $0xd80] sm:$0xff] }
 0x2b5   :  { %3709 = vmatmul.msk.f32.vlgmr.msrb.gmra.mxu1 %vm335_vm0, %v5536_v26  ;;  %v3766_v26 = vld [vmem:[%s7623_s1 + $0xbb8] sm:$0xff] }
 0x2b6   :  { %1177 = vmatpush.msra.mxu1 %v3774_v17  ;;  %v3825_v17 = vld [vmem:[%s7623_s1 + $0xd60] sm:$0xff] }
 0x2b8   :  { %1178 = vmatpush.msra.mxu1 %v3772_v19  ;;  %v3821_v19 = vld [vmem:[%s7623_s1 + $0xd40] sm:$0xff] }
 0x2ba   :  { %1179 = vmatpush.msra.mxu1 %v3770_v21  ;;  %v3817_v21 = vld [vmem:[%s7623_s1 + $0xd20] sm:$0xff] }
 0x2bc   :  { %1180 = vmatpush.msra.mxu1 %v3768_v24  ;;  %v3813_v24 = vld [vmem:[%s7623_s1 + $0xd00] sm:$0xff] }
 0x2bd   :  { %3710 = vmatmul.msk.f32.gmra.mxu1 %vm335_vm0, %v5560_v34  ;;  %v3760_v34 = vld [vmem:[%s7623_s1 + $0xb88] sm:$0xff] }
 0x2be   :  { %1181 = vmatpush.msra.mxu1 %v3766_v26  ;;  %v3810_v26 = vld [vmem:[%s7623_s1 + $0xce8] sm:$0xff] }
 0x2c0   :  { %1182 = vmatpush.msra.mxu1 %v3764_v28  ;;  %v3808_v28 = vld [vmem:[%s7623_s1 + $0xcd8] sm:$0xff] }
 0x2c2   :  { %1183 = vmatpush.msra.mxu1 %v3762_v32  ;;  %v3804_v32 = vld [vmem:[%s7623_s1 + $0xcb8] sm:$0xff] }
 0x2c4   :  { %1184 = vmatpush.msra.mxu1 %v3760_v34  ;;  %v3802_v34 = vld [vmem:[%s7623_s1 + $0xca8] sm:$0xff] }
 0x2c6   :  { %1185 = vmatpush.msra.mxu1 %v3758_v38  ;;  %v3798_v38 = vld [vmem:[%s7623_s1 + $0xc88] sm:$0xff] }
 0x2c8   :  { %1186 = vmatpush.msra.mxu1 %v3756_v40  ;;  %v3794_v40 = vld [vmem:[%s7623_s1 + $0xc68] sm:$0xff] }
 0x2ca   :  { %1187 = vmatpush.msra.mxu1 %v3754_v43  ;;  %v3792_v43 = vld [vmem:[%s7623_s1 + $0xc58] sm:$0xff] }
 0x2cb   :  { %v1174_v48 = vpop.f32.mrf.mxu0 }
 0x2cc   :  { %1188 = vmatpush.msra.mxu1 %v3752_v45  ;;  %v3790_v45 = vld [vmem:[%s7623_s1 + $0xc48] sm:$0xff] }
 0x2ce   :  { %1189 = vmatpush.msra.mxu1 %v3750_v47  ;;  %v3786_v47 = vld [vmem:[%s7623_s1 + $0xc28] sm:$0xff] }
 0x2d0   :  { %1190 = vmatpush.msra.mxu1 %v3748_v49 }
 0x2d1   :  { %v1154_v58 = vpop.f32.mrf.mxu3 }
 0x2d2   :  { %v1155_v63 = vadd.f32 %v1154_v58, %v1134_v51  ;;  %1191 = vmatpush.msra.mxu1 %v3746_v33  ;;  %v3782_v33 = vld [vmem:[%s7623_s1 + $0xc08] sm:$0xff]  ;;  %v3881_v58 = vld [vmem:[%s7623_s1 + $0xef0] sm:$0xff] }
 0x2d4   :  { %1192 = vmatpush.msra.mxu1 %v3744_v59  ;;  %1221 = vmatpush.msra.mxu2 %v1155_v63  ;;  %v3842_v59 = vld [vmem:[%s7623_s1 + $0xde8] sm:$0xff]  ;;  %v3879_v63 = vld [vmem:[%s7623_s1 + $0xee0] sm:$0xff] }
 0x2d5   :  { %1193 = vmatmul.f32.vlgmr.msra.gmra.mxu1 %v5331_v5  ;;  %3777 = vmatmul.msk.f32.vlgmr.msra.gmra.mxu2 %vm335_vm0, %v5758_v0 }
 0x2d6   :  { %1341 = vmatpush.msrb.mxu1 %v3843_v41  ;;  %1361 = vmatpush.msrb.mxu2 %v3812_v25  ;;  %v3840_v41 = vld [vmem:[%s7623_s1 + $0xdd8] sm:$0xff]  ;;  %v3859_v25 = vld [vmem:[%s7623_s1 + $0xe40] sm:$0xff] }
 0x2d8   :  { %1342 = vmatpush.msrb.mxu1 %v3841_v3  ;;  %1362 = vmatpush.msrb.mxu2 %v3810_v26  ;;  %v3875_v3 = vld [vmem:[%s7623_s1 + $0xec0] sm:$0xff]  ;;  %v3820_v26 = vld [vmem:[%s7623_s1 + $0xd38] sm:$0xff] }
 0x2da   :  { %1343 = vmatpush.msrb.mxu1 %v3839_v60  ;;  %1363 = vmatpush.msrb.mxu2 %v3808_v28  ;;  %v3836_v60 = vld [vmem:[%s7623_s1 + $0xdb8] sm:$0xff]  ;;  %v3857_v28 = vld [vmem:[%s7623_s1 + $0xe30] sm:$0xff] }
 0x2dc   :  { %1344 = vmatpush.msrb.mxu1 %v3837_v8  ;;  %1364 = vmatpush.msrb.mxu2 %v3806_v29  ;;  %v3834_v8 = vld [vmem:[%s7623_s1 + $0xda8] sm:$0xff] }
 0x2dd   :  { %3778 = vmatmul.msk.f32.gmra.mxu2 %vm335_vm0, %v5782_v9  ;;  %v3818_v29 = vld [vmem:[%s7623_s1 + $0xd28] sm:$0xff] }
 0x2de   :  { %1345 = vmatpush.msrb.mxu1 %v3835_v10  ;;  %1365 = vmatpush.msrb.mxu2 %v3804_v32  ;;  %v3873_v10 = vld [vmem:[%s7623_s1 + $0xeb0] sm:$0xff]  ;;  %v3855_v32 = vld [vmem:[%s7623_s1 + $0xe20] sm:$0xff] }
 0x2e0   :  { %1346 = vmatpush.msrb.mxu1 %v3833_v11  ;;  %1366 = vmatpush.msrb.mxu2 %v3802_v34  ;;  %v3871_v11 = vld [vmem:[%s7623_s1 + $0xea0] sm:$0xff] }
 0x2e2   :  { %1347 = vmatpush.msrb.mxu1 %v3831_v13  ;;  %1367 = vmatpush.msrb.mxu2 %v3800_v36  ;;  %v3832_v13 = vld [vmem:[%s7623_s1 + $0xd98] sm:$0xff] }
 0x2e3   :  { %v3816_v36 = vld [vmem:[%s7623_s1 + $0xd18] sm:$0xff] }
 0x2e4   :  { %1348 = vmatpush.msrb.mxu1 %v3829_v15  ;;  %1368 = vmatpush.msrb.mxu2 %v3798_v38  ;;  %v3830_v15 = vld [vmem:[%s7623_s1 + $0xd88] sm:$0xff]  ;;  %v3853_v38 = vld [vmem:[%s7623_s1 + $0xe10] sm:$0xff] }
 0x2e6   :  { %1349 = vmatpush.msrb.mxu1 %v3827_v16  ;;  %1369 = vmatpush.msrb.mxu2 %v3796_v39  ;;  %v3867_v16 = vld [vmem:[%s7623_s1 + $0xe80] sm:$0xff] }
 0x2e8   :  { %1350 = vmatpush.msrb.mxu1 %v3825_v17  ;;  %1370 = vmatpush.msrb.mxu2 %v3794_v40  ;;  %v3828_v17 = vld [vmem:[%s7623_s1 + $0xd78] sm:$0xff]  ;;  %v3814_v40 = vld [vmem:[%s7623_s1 + $0xd08] sm:$0xff] }
 0x2ea   :  { %1351 = vmatpush.msrb.mxu1 %v3823_v18  ;;  %1371 = vmatpush.msrb.mxu2 %v3792_v43  ;;  %v3865_v18 = vld [vmem:[%s7623_s1 + $0xe70] sm:$0xff] }
 0x2eb   :  { %v1338_v34 = vpop.f32.mrf.mxu0 }
 0x2ec   :  { %1352 = vmatpush.msrb.mxu1 %v3821_v19  ;;  %1372 = vmatpush.msrb.mxu2 %v3790_v45  ;;  %v3826_v19 = vld [vmem:[%s7623_s1 + $0xd68] sm:$0xff]  ;;  %v5980_v45 = vld [vmem:[%s7624_s2 + $0x60] sm:$0xff] }
 0x2ee   :  { %1353 = vmatpush.msrb.mxu1 %v3819_v20  ;;  %1373 = vmatpush.msrb.mxu2 %v3788_v46  ;;  %v3863_v20 = vld [vmem:[%s7623_s1 + $0xe60] sm:$0xff]  ;;  %v3913_v46 = vld [vmem:[%s7623_s1 + $0xff0] sm:$0xff] }
 0x2f0   :  { %1354 = vmatpush.msrb.mxu1 %v3817_v21  ;;  %1374 = vmatpush.msrb.mxu2 %v3786_v47  ;;  %v3824_v21 = vld [vmem:[%s7623_s1 + $0xd58] sm:$0xff]  ;;  %v3851_v47 = vld [vmem:[%s7623_s1 + $0xe00] sm:$0xff] }
 0x2f2   :  { %1355 = vmatpush.msrb.mxu1 %v3815_v23  ;;  %1375 = vmatpush.msrb.mxu2 %v3784_v50  ;;  %v3861_v23 = vld [vmem:[%s7623_s1 + $0xe50] sm:$0xff]  ;;  %v3907_v50 = vld [vmem:[%s7623_s1 + $0xfc0] sm:$0xff] }
 0x2f4   :  { %1356 = vmatpush.msrb.mxu1 %v3813_v24  ;;  %1376 = vmatpush.msrb.mxu2 %v3782_v33  ;;  %v3822_v24 = vld [vmem:[%s7623_s1 + $0xd48] sm:$0xff]  ;;  %v3905_v33 = vld [vmem:[%s7623_s1 + $0xfb0] sm:$0xff] }
 0x2f5   :  { %1357 = vmatmul.f32.vlgmr.msrb.gmra.mxu1 %v5331_v5  ;;  %1377 = vmatmul.f32.vlgmr.msrb.gmra.mxu2 %v5376_v22 }
 0x2f6   :  { %1525 = vmatpush.msra.mxu2 %v3881_v58  ;;  %v3901_v58 = vld [vmem:[%s7623_s1 + $0xf90] sm:$0xff] }
 0x2f8   :  { %1526 = vmatpush.msra.mxu2 %v3879_v63  ;;  %v3897_v63 = vld [vmem:[%s7623_s1 + $0xf70] sm:$0xff] }
 0x332   :  { %v5840_v61 = vpop.f32.mrf.mxu1 }
 0x33a   :  { %v5862_v44 = vpop.f32.mrf.mxu1 }
 0x352   :  { %v1194_v49 = vpop.f32.mrf.mxu1 }
 0x353   :  { %v1195_v51 = vadd.f32 %v1194_v49, %v1174_v48  ;;  %v3911_v48 = vld [vmem:[%s7623_s1 + $0xfe0] sm:$0xff]  ;;  %v3909_v49 = vld [vmem:[%s7623_s1 + $0xfd0] sm:$0xff] }
 0x355   :  { %1244 = vmatpush.msra.mxu3 %v1195_v51  ;;  %v6004_v51 = vld [vmem:[%s7624_s2 + $0x68] sm:$0xff] }
 0x356   :  { %3779 = vmatmul.msk.f32.vlgmr.msra.gmra.mxu3 %vm335_vm0, %v5758_v0  ;;  %v3877_v0 = vld [vmem:[%s7623_s1 + $0xed0] sm:$0xff] }
 0x357   :  { %1381 = vmatpush.msrb.mxu3 %v3844_v52  ;;  %1527 = vmatpush.msra.mxu2 %v3877_v0  ;;  %v3903_v52 = vld [vmem:[%s7623_s1 + $0xfa0] sm:$0xff]  ;;  %v3893_v0 = vld [vmem:[%s7623_s1 + $0xf50] sm:$0xff] }
 0x359   :  { %1382 = vmatpush.msrb.mxu3 %v3842_v59  ;;  %1528 = vmatpush.msra.mxu2 %v3875_v3  ;;  %v3899_v59 = vld [vmem:[%s7623_s1 + $0xf80] sm:$0xff]  ;;  %v3889_v3 = vld [vmem:[%s7623_s1 + $0xf30] sm:$0xff] }
 0x35b   :  { %1383 = vmatpush.msrb.mxu3 %v3840_v41  ;;  %1529 = vmatpush.msra.mxu2 %v3873_v10  ;;  %v3895_v41 = vld [vmem:[%s7623_s1 + $0xf60] sm:$0xff] }
 0x35c   :  { %v3883_v10 = vld [vmem:[%s7623_s1 + $0xf00] sm:$0xff] }
 0x35d   :  { %1384 = vmatpush.msrb.mxu3 %v3838_v1  ;;  %1530 = vmatpush.msra.mxu2 %v3871_v11  ;;  %v3891_v1 = vld [vmem:[%s7623_s1 + $0xf40] sm:$0xff]  ;;  %v3882_v11 = vld [vmem:[%s7623_s1 + $0xef8] sm:$0xff] }
 0x35e   :  { %3780 = vmatmul.msk.f32.gmra.mxu3 %vm335_vm0, %v5782_v9  ;;  %v3869_v9 = vld [vmem:[%s7623_s1 + $0xe90] sm:$0xff] }
 0x35f   :  { %1385 = vmatpush.msrb.mxu3 %v3836_v60  ;;  %1531 = vmatpush.msra.mxu2 %v3869_v9  ;;  %v3887_v60 = vld [vmem:[%s7623_s1 + $0xf20] sm:$0xff]  ;;  %v3878_v9 = vld [vmem:[%s7623_s1 + $0xed8] sm:$0xff] }
 0x361   :  { %1386 = vmatpush.msrb.mxu3 %v3834_v8  ;;  %1532 = vmatpush.msra.mxu2 %v3867_v16  ;;  %v3885_v8 = vld [vmem:[%s7623_s1 + $0xf10] sm:$0xff]  ;;  %v3874_v16 = vld [vmem:[%s7623_s1 + $0xeb8] sm:$0xff] }
 0x363   :  { %1387 = vmatpush.msrb.mxu3 %v3832_v13  ;;  %1533 = vmatpush.msra.mxu2 %v3865_v18  ;;  %v3880_v13 = vld [vmem:[%s7623_s1 + $0xee8] sm:$0xff] }
 0x365   :  { %1388 = vmatpush.msrb.mxu3 %v3830_v15  ;;  %1534 = vmatpush.msra.mxu2 %v3863_v20  ;;  %v3876_v15 = vld [vmem:[%s7623_s1 + $0xec8] sm:$0xff]  ;;  %v412_v20 = vadd.f32 %v5133_v54, %v5163_v6 }
 0x367   :  { %1389 = vmatpush.msrb.mxu3 %v3828_v17  ;;  %1535 = vmatpush.msra.mxu2 %v3861_v23  ;;  %v3872_v17 = vld [vmem:[%s7623_s1 + $0xea8] sm:$0xff]  ;;  %v640_v23 = vadd.f32 %v5399_v30, %v412_v20  ;;  %v3862_v30 = vld [vmem:[%s7623_s1 + $0xe58] sm:$0xff]  ;;  %v3925_v20 = vld [vmem:[%s7623_s1 + $0x1020] sm:$0xff] }
 0x369   :  { %1390 = vmatpush.msrb.mxu3 %v3826_v19  ;;  %1536 = vmatpush.msra.mxu2 %v3859_v25  ;;  %v3870_v19 = vld [vmem:[%s7623_s1 + $0xe98] sm:$0xff]  ;;  %v844_v25 = vadd.f32 %v5613_v53, %v640_v23  ;;  %v3860_v53 = vld [vmem:[%s7623_s1 + $0xe48] sm:$0xff] }
 0x36a   :  { %v3886_v23 = vld [vmem:[%s7623_s1 + $0xf18] sm:$0xff] }
 0x36b   :  { %1391 = vmatpush.msrb.mxu3 %v3824_v21  ;;  %1537 = vmatpush.msra.mxu2 %v3857_v28  ;;  %v3868_v21 = vld [vmem:[%s7623_s1 + $0xe88] sm:$0xff]  ;;  %v1048_v6 = vadd.f32 %v5835_v31, %v844_v25  ;;  %v3858_v31 = vld [vmem:[%s7623_s1 + $0xe38] sm:$0xff] }
 0x36d   :  { %1392 = vmatpush.msrb.mxu3 %v3822_v24  ;;  %1538 = vmatpush.msra.mxu2 %v3855_v32  ;;  %v3866_v24 = vld [vmem:[%s7623_s1 + $0xe78] sm:$0xff] }
 0x36f   :  { %1393 = vmatpush.msrb.mxu3 %v3820_v26  ;;  %1539 = vmatpush.msra.mxu2 %v3853_v38  ;;  %v3864_v26 = vld [vmem:[%s7623_s1 + $0xe68] sm:$0xff] }
 0x371   :  { %1394 = vmatpush.msrb.mxu3 %v3818_v29  ;;  %1540 = vmatpush.msra.mxu2 %v3851_v47  ;;  %v3914_v47 = vld [vmem:[%s7623_s1 + $0xff8] sm:$0xff] }
 0x372   :  { %v1358_v39 = vpop.f32.mrf.mxu1  ;;  %1541 = vmatmul.f32.vlgmr.msra.gmra.mxu2 %v5376_v22 }
 0x373   :  { %v1359_v43 = vadd.f32 %v1358_v39, %v1338_v34  ;;  %1395 = vmatpush.msrb.mxu3 %v3816_v36  ;;  %v3856_v36 = vld [vmem:[%s7623_s1 + $0xe28] sm:$0xff] }
 0x375   :  { %1396 = vmatpush.msrb.mxu3 %v3814_v40  ;;  %1425 = vmatpush.msra.mxu0 %v1359_v43  ;;  %v3854_v40 = vld [vmem:[%s7623_s1 + $0xe18] sm:$0xff] }
 0x376   :  { %1397 = vmatmul.f32.vlgmr.msrb.gmra.mxu3 %v5331_v5  ;;  %3847 = vmatmul.msk.f32.vlgmr.msra.gmra.mxu0 %vm335_vm0, %v5980_v45 }
 0x377   :  { %1545 = vmatpush.msra.mxu3 %v3913_v46  ;;  %1565 = vmatpush.msrb.mxu0 %v3882_v11  ;;  %v3852_v46 = vld [vmem:[%s7623_s1 + $0xe08] sm:$0xff]  ;;  %v3933_v11 = vld [vmem:[%s7623_s1 + $0x1060] sm:$0xff] }
 0x379   :  { %1546 = vmatpush.msra.mxu3 %v3911_v48  ;;  %1566 = vmatpush.msrb.mxu0 %v3880_v13  ;;  %v3951_v48 = vld [vmem:[%s7623_s1 + $0x10f0] sm:$0xff]  ;;  %v3894_v13 = vld [vmem:[%s7623_s1 + $0xf58] sm:$0xff] }
 0x37b   :  { %1547 = vmatpush.msra.mxu3 %v3909_v49  ;;  %1567 = vmatpush.msrb.mxu0 %v3878_v9  ;;  %v3912_v49 = vld [vmem:[%s7623_s1 + $0xfe8] sm:$0xff]  ;;  %v3931_v9 = vld [vmem:[%s7623_s1 + $0x1050] sm:$0xff] }
 0x37d   :  { %1548 = vmatpush.msra.mxu3 %v3907_v50  ;;  %1568 = vmatpush.msrb.mxu0 %v3876_v15  ;;  %v3949_v50 = vld [vmem:[%s7623_s1 + $0x10e0] sm:$0xff]  ;;  %v3892_v15 = vld [vmem:[%s7623_s1 + $0xf48] sm:$0xff] }
 0x37e   :  { %3848 = vmatmul.msk.f32.gmra.mxu0 %vm335_vm0, %v6004_v51 }
 0x37f   :  { %1549 = vmatpush.msra.mxu3 %v3905_v33  ;;  %1569 = vmatpush.msrb.mxu0 %v3874_v16  ;;  %v3910_v33 = vld [vmem:[%s7623_s1 + $0xfd8] sm:$0xff] }
 0x380   :  { %v3890_v16 = vld [vmem:[%s7623_s1 + $0xf38] sm:$0xff] }
 0x381   :  { %1550 = vmatpush.msra.mxu3 %v3903_v52  ;;  %1570 = vmatpush.msrb.mxu0 %v3872_v17  ;;  %v3945_v52 = vld [vmem:[%s7623_s1 + $0x10c0] sm:$0xff]  ;;  %v3927_v17 = vld [vmem:[%s7623_s1 + $0x1030] sm:$0xff] }
 0x383   :  { %1551 = vmatpush.msra.mxu3 %v3901_v58  ;;  %1571 = vmatpush.msrb.mxu0 %v3870_v19  ;;  %v3906_v58 = vld [vmem:[%s7623_s1 + $0xfb8] sm:$0xff]  ;;  %v3888_v19 = vld [vmem:[%s7623_s1 + $0xf28] sm:$0xff] }
 0x385   :  { %1552 = vmatpush.msra.mxu3 %v3899_v59  ;;  %1572 = vmatpush.msrb.mxu0 %v3868_v21  ;;  %v3904_v59 = vld [vmem:[%s7623_s1 + $0xfa8] sm:$0xff] }
 0x387   :  { %1553 = vmatpush.msra.mxu3 %v3897_v63  ;;  %1573 = vmatpush.msrb.mxu0 %v3866_v24  ;;  %v3943_v63 = vld [vmem:[%s7623_s1 + $0x10b0] sm:$0xff] }
 0x388   :  { %v3923_v24 = vld [vmem:[%s7623_s1 + $0x1010] sm:$0xff] }
 0x389   :  { %1554 = vmatpush.msra.mxu3 %v3895_v41  ;;  %1574 = vmatpush.msrb.mxu0 %v3864_v26  ;;  %v3941_v41 = vld [vmem:[%s7623_s1 + $0x10a0] sm:$0xff]  ;;  %v3884_v26 = vld [vmem:[%s7623_s1 + $0xf08] sm:$0xff] }
 0x38b   :  { %1555 = vmatpush.msra.mxu3 %v3893_v0  ;;  %1575 = vmatpush.msrb.mxu0 %v3862_v30  ;;  %v3902_v0 = vld [vmem:[%s7623_s1 + $0xf98] sm:$0xff]  ;;  %v6207_v30 = vld [vmem:[%s7624_s2 + $0x70] sm:$0xff] }
 0x38d   :  { %1556 = vmatpush.msra.mxu3 %v3891_v1  ;;  %1576 = vmatpush.msrb.mxu0 %v3860_v53  ;;  %v3900_v1 = vld [vmem:[%s7623_s1 + $0xf88] sm:$0xff]  ;;  %v3921_v53 = vld [vmem:[%s7623_s1 + $0x1000] sm:$0xff] }
 0x38f   :  { %1557 = vmatpush.msra.mxu3 %v3889_v3  ;;  %1577 = vmatpush.msrb.mxu0 %v3858_v31  ;;  %v3937_v3 = vld [vmem:[%s7623_s1 + $0x1080] sm:$0xff] }
 0x390   :  { %v3981_v31 = vld [vmem:[%s7623_s1 + $0x11e0] sm:$0xff] }
 0x391   :  { %1558 = vmatpush.msra.mxu3 %v3887_v60  ;;  %1578 = vmatpush.msrb.mxu0 %v3856_v36  ;;  %v3898_v60 = vld [vmem:[%s7623_s1 + $0xf78] sm:$0xff]  ;;  %v3979_v36 = vld [vmem:[%s7623_s1 + $0x11d0] sm:$0xff] }
 0x393   :  { %1559 = vmatpush.msra.mxu3 %v3885_v8  ;;  %1579 = vmatpush.msrb.mxu0 %v3854_v40  ;;  %v3935_v8 = vld [vmem:[%s7623_s1 + $0x1070] sm:$0xff]  ;;  %v6241_v40 = vld [vmem:[%s7624_s2 + $0x78] sm:$0xff] }
 0x395   :  { %1560 = vmatpush.msra.mxu3 %v3883_v10  ;;  %1580 = vmatpush.msrb.mxu0 %v3852_v46  ;;  %v3896_v10 = vld [vmem:[%s7623_s1 + $0xf68] sm:$0xff]  ;;  %v3973_v46 = vld [vmem:[%s7623_s1 + $0x11a0] sm:$0xff] }
 0x396   :  { %1561 = vmatmul.f32.vlgmr.msra.gmra.mxu3 %v5331_v5  ;;  %v1223_v5 = vpop.f32.mrf.mxu2  ;;  %1581 = vmatmul.f32.vlgmr.msrb.gmra.mxu0 %v5376_v22  ;;  %v3908_v22 = vld [vmem:[%s7623_s1 + $0xfc8] sm:$0xff] }
 0x397   :  { %v1252_v29 = vadd.f32 %v1223_v5, %v1048_v6  ;;  %1729 = vmatpush.msra.mxu0 %v3951_v48  ;;  %v3929_v5 = vld [vmem:[%s7623_s1 + $0x1040] sm:$0xff] }
 0x398   :  { %v3969_v48 = vld [vmem:[%s7623_s1 + $0x1180] sm:$0xff] }
 0x399   :  { %1730 = vmatpush.msra.mxu0 %v3949_v50  ;;  %v3965_v50 = vld [vmem:[%s7623_s1 + $0x1160] sm:$0xff] }
 0x39e   :  { %v6081_v54 = vpop.f32.mrf.mxu2 }
 0x3a6   :  { %v1378_v38 = vpop.f32.mrf.mxu2 }
 0x3d9   :  { %v6063_v18 = vpop.f32.mrf.mxu3 }
 0x3e1   :  { %v6087_v28 = vpop.f32.mrf.mxu3 }
 0x3f3   :  { %v1427_v32 = vpop.f32.mrf.mxu0 }
 0x3f4   :  { %v6092_v34 = vadd.f32 %v1427_v32, %v1252_v29  ;;  %v3983_v29 = vld [vmem:[%s7623_s1 + $0x11f0] sm:$0xff]  ;;  %v6218_v32 = vld [vmem:[%s7622_s0 + $0x8] sm:$0xff] }
 0x3f5   :  { %v1542_v21 = vpop.f32.mrf.mxu2 }
 0x3f9   :  { %v1398_v39 = vpop.f32.mrf.mxu3 }
 0x3fa   :  { %v1399_v43 = vadd.f32 %v1398_v39, %v1378_v38  ;;  %v6232_v38 = vld [vmem:[%s7622_s0] sm:$0xff]  ;;  %s4351_s0 = smov 104  }
 0x3fb   :  { %v3977_v39 = vld [vmem:[%s7623_s1 + $0x11c0] sm:$0xff] }
 0x3fc   :  { %1448 = vmatpush.msra.mxu1 %v1399_v43  ;;  %v3975_v43 = vld [vmem:[%s7623_s1 + $0x11b0] sm:$0xff] }
 0x3fd   :  { %3849 = vmatmul.msk.f32.vlgmr.msra.gmra.mxu1 %vm335_vm0, %v5980_v45  ;;  %v3947_v45 = vld [vmem:[%s7623_s1 + $0x10d0] sm:$0xff] }
 0x3fe   :  { %1585 = vmatpush.msrb.mxu1 %v3914_v47  ;;  %1731 = vmatpush.msra.mxu0 %v3947_v45  ;;  %v3971_v47 = vld [vmem:[%s7623_s1 + $0x1190] sm:$0xff]  ;;  %v3961_v45 = vld [vmem:[%s7623_s1 + $0x1140] sm:$0xff] }
 0x400   :  { %1586 = vmatpush.msrb.mxu1 %v3912_v49  ;;  %1732 = vmatpush.msra.mxu0 %v3945_v52  ;;  %v3967_v49 = vld [vmem:[%s7623_s1 + $0x1170] sm:$0xff]  ;;  %v3957_v52 = vld [vmem:[%s7623_s1 + $0x1120] sm:$0xff] }
 0x402   :  { %1587 = vmatpush.msrb.mxu1 %v3910_v33  ;;  %1733 = vmatpush.msra.mxu0 %v3943_v63  ;;  %v3963_v33 = vld [vmem:[%s7623_s1 + $0x1150] sm:$0xff]  ;;  %v3952_v63 = vld [vmem:[%s7623_s1 + $0x10f8] sm:$0xff] }
 0x404   :  { %1588 = vmatpush.msrb.mxu1 %v3908_v22  ;;  %1734 = vmatpush.msra.mxu0 %v3941_v41  ;;  %v3959_v22 = vld [vmem:[%s7623_s1 + $0x1130] sm:$0xff]  ;;  %v3950_v41 = vld [vmem:[%s7623_s1 + $0x10e8] sm:$0xff] }
 0x405   :  { %3850 = vmatmul.msk.f32.gmra.mxu1 %vm335_vm0, %v6004_v51  ;;  %v3939_v51 = vld [vmem:[%s7623_s1 + $0x1090] sm:$0xff] }
 0x406   :  { %1589 = vmatpush.msrb.mxu1 %v3906_v58  ;;  %1735 = vmatpush.msra.mxu0 %v3939_v51  ;;  %v3955_v58 = vld [vmem:[%s7623_s1 + $0x1110] sm:$0xff]  ;;  %v3946_v51 = vld [vmem:[%s7623_s1 + $0x10c8] sm:$0xff] }
 0x408   :  { %1590 = vmatpush.msrb.mxu1 %v3904_v59  ;;  %1736 = vmatpush.msra.mxu0 %v3937_v3  ;;  %v3953_v59 = vld [vmem:[%s7623_s1 + $0x1100] sm:$0xff] }
 0x40a   :  { %1591 = vmatpush.msrb.mxu1 %v3902_v0  ;;  %1737 = vmatpush.msra.mxu0 %v3935_v8  ;;  %v3948_v0 = vld [vmem:[%s7623_s1 + $0x10d8] sm:$0xff] }
 0x40b   :  { %v3940_v8 = vld [vmem:[%s7623_s1 + $0x1098] sm:$0xff] }
 0x40c   :  { %1592 = vmatpush.msrb.mxu1 %v3900_v1  ;;  %1738 = vmatpush.msra.mxu0 %v3933_v11  ;;  %v3944_v1 = vld [vmem:[%s7623_s1 + $0x10b8] sm:$0xff] }
 0x40d   :  { %v3936_v11 = vld [vmem:[%s7623_s1 + $0x1078] sm:$0xff] }
 0x40e   :  { %1593 = vmatpush.msrb.mxu1 %v3898_v60  ;;  %1739 = vmatpush.msra.mxu0 %v3931_v9  ;;  %v3942_v60 = vld [vmem:[%s7623_s1 + $0x10a8] sm:$0xff]  ;;  %v6314_v9 = vpop.f32.mrf.mxu0 }
 0x410   :  { %1594 = vmatpush.msrb.mxu1 %v3896_v10  ;;  %1740 = vmatpush.msra.mxu0 %v3929_v5  ;;  %v3938_v10 = vld [vmem:[%s7623_s1 + $0x1088] sm:$0xff] }
 0x412   :  { %1595 = vmatpush.msrb.mxu1 %v3894_v13  ;;  %1741 = vmatpush.msra.mxu0 %v3927_v17  ;;  %v3934_v13 = vld [vmem:[%s7623_s1 + $0x1068] sm:$0xff]  ;;  %v3928_v17 = vld [vmem:[%s7623_s1 + $0x1038] sm:$0xff] }
 0x414   :  { %1596 = vmatpush.msrb.mxu1 %v3892_v15  ;;  %1742 = vmatpush.msra.mxu0 %v3925_v20  ;;  %v3932_v15 = vld [vmem:[%s7623_s1 + $0x1058] sm:$0xff] }
 0x416   :  { %1597 = vmatpush.msrb.mxu1 %v3890_v16  ;;  %1743 = vmatpush.msra.mxu0 %v3923_v24  ;;  %v3930_v16 = vld [vmem:[%s7623_s1 + $0x1048] sm:$0xff]  ;;  %v1582_v20 = vpop.f32.mrf.mxu0 }
 0x418   :  { %1598 = vmatpush.msrb.mxu1 %v3888_v19  ;;  %1744 = vmatpush.msra.mxu0 %v3921_v53  ;;  %v3926_v19 = vld [vmem:[%s7623_s1 + $0x1028] sm:$0xff] }
 0x419   :  { %v1562_v25 = vpop.f32.mrf.mxu3  ;;  %1745 = vmatmul.f32.vlgmr.msra.gmra.mxu0 %v6232_v38  ;;  %v3978_v53 = vld [vmem:[%s7623_s1 + $0x11c8] sm:$0xff] }
 0x41a   :  { %v1563_v6 = vadd.f32 %v1562_v25, %v1542_v21  ;;  %1599 = vmatpush.msrb.mxu1 %v3886_v23  ;;  %v3924_v23 = vld [vmem:[%s7623_s1 + $0x1018] sm:$0xff]  ;;  %v3922_v25 = vld [vmem:[%s7623_s1 + $0x1008] sm:$0xff] }
 0x41c   :  { %1600 = vmatpush.msrb.mxu1 %v3884_v26  ;;  %1629 = vmatpush.msrb.mxu2 %v1563_v6  ;;  %v3984_v26 = vld [vmem:[%s7623_s1 + $0x11f8] sm:$0xff]  ;;  %v3982_v6 = vld [vmem:[%s7623_s1 + $0x11e8] sm:$0xff] }
 0x41d   :  { %1601 = vmatmul.f32.vlgmr.msrb.gmra.mxu1 %v6218_v32  ;;  %3917 = vmatmul.msk.f32.vlgmr.msrb.gmra.mxu2 %vm335_vm0, %v6207_v30 }
 0x41e   :  { %1749 = vmatpush.msra.mxu1 %v3983_v29  ;;  %1769 = vmatpush.msra.mxu2 %v3952_v63  ;;  %v3980_v29 = vld [vmem:[%s7623_s1 + $0x11d8] sm:$0xff] }
 0x41f   :  { %v3960_v63 = vld [vmem:[%s7623_s1 + $0x1138] sm:$0xff] }
 0x420   :  { %1750 = vmatpush.msra.mxu1 %v3981_v31  ;;  %1770 = vmatpush.msra.mxu2 %v3950_v41  ;;  %v3974_v31 = vld [vmem:[%s7623_s1 + $0x11a8] sm:$0xff] }
 0x421   :  { %v3958_v41 = vld [vmem:[%s7623_s1 + $0x1128] sm:$0xff] }
 0x422   :  { %1751 = vmatpush.msra.mxu1 %v3979_v36  ;;  %1771 = vmatpush.msra.mxu2 %v3948_v0  ;;  %v1868_v36 = vld [vmem:[%s7625_s3] sm:$0xff] }
 0x424   :  { %1752 = vmatpush.msra.mxu1 %v3977_v39  ;;  %1772 = vmatpush.msra.mxu2 %v3946_v51  ;;  %v4340_v39 = vmov 0   ;;  %v3956_v51 = vld [vmem:[%s7623_s1 + $0x1118] sm:$0xff] }
 0x425   :  { %3918 = vmatmul.msk.f32.gmra.mxu2 %vm335_vm0, %v6241_v40  ;;  %4305 = vset.pattern.permute.xlu0 %v4340_v39 }
 0x426   :  { %1753 = vmatpush.msra.mxu1 %v3975_v43  ;;  %1773 = vmatpush.msra.mxu2 %v3944_v1  ;;  %v1902_v43 = vld [vmem:[%s7626_s4 + $0x70] sm:$0xff] }
 0x427   :  { %1872 = vperm.xlu0 %4305, %v1868_v36   ;;  %4306 = vset.pattern.permute.xlu1 %v4340_v39  ;;  %v4001_v36 = vld [vmem:[%s7626_s4 + $0x100] sm:$0xff] }
 0x428   :  { %1754 = vmatpush.msra.mxu1 %v3973_v46  ;;  %1774 = vmatpush.msra.mxu2 %v3942_v60  ;;  %v1901_v46 = vld [vmem:[%s7626_s4 + $0x68] sm:$0xff] }
 0x429   :  { %4307 = vset.pattern.permute.xlu2 %v4340_v39  ;;  %v3954_v60 = vld [vmem:[%s7623_s1 + $0x1108] sm:$0xff]  ;;  %v4000_v39 = vld [vmem:[%s7626_s4 + $0xf8] sm:$0xff] }
 0x42a   :  { %1755 = vmatpush.msra.mxu1 %v3971_v47  ;;  %1775 = vmatpush.msra.mxu2 %v3940_v8  ;;  %v3970_v47 = vld [vmem:[%s7623_s1 + $0x1188] sm:$0xff] }
 0x42c   :  { %1756 = vmatpush.msra.mxu1 %v3969_v48  ;;  %1776 = vmatpush.msra.mxu2 %v3938_v10  ;;  %v1900_v48 = vld [vmem:[%s7626_s4 + $0x60] sm:$0xff] }
 0x42d   :  { %v6419_v10 = vld [vmem:[%s7624_s2 + $0x80] sm:$0xff] }
 0x42e   :  { %1757 = vmatpush.msra.mxu1 %v3967_v49  ;;  %1777 = vmatpush.msra.mxu2 %v3936_v11  ;;  %v3968_v49 = vld [vmem:[%s7623_s1 + $0x1178] sm:$0xff]  ;;  %v6427_v11 = vld [vmem:[%s7624_s2 + $0x88] sm:$0xff] }
 0x430   :  { %1758 = vmatpush.msra.mxu1 %v3965_v50  ;;  %1778 = vmatpush.msra.mxu2 %v3934_v13  ;;  %v1869_v50 = vld [vmem:[%s7625_s3 + $0x8] sm:$0xff]  ;;  %v1896_v13 = vld [vmem:[%s7626_s4 + $0x40] sm:$0xff] }
 0x431   :  { %1877 = vperm.xlu0 %4305, %v1869_v50   ;;  %v4045_v50 = vld [vmem:[%s7626_s4 + $0x1e8] sm:$0xff] }
 0x432   :  { %1759 = vmatpush.msra.mxu1 %v3963_v33  ;;  %1779 = vmatpush.msra.mxu2 %v3932_v15  ;;  %v1899_v33 = vld [vmem:[%s7626_s4 + $0x58] sm:$0xff] }
 0x433   :  { %v1895_v15 = vld [vmem:[%s7626_s4 + $0x38] sm:$0xff] }
 0x434   :  { %1760 = vmatpush.msra.mxu1 %v3961_v45  ;;  %1780 = vmatpush.msra.mxu2 %v3930_v16  ;;  %v3966_v45 = vld [vmem:[%s7623_s1 + $0x1168] sm:$0xff]  ;;  %v4008_v16 = vld [vmem:[%s7626_s4 + $0x138] sm:$0xff] }
 0x436   :  { %1761 = vmatpush.msra.mxu1 %v3959_v22  ;;  %1781 = vmatpush.msra.mxu2 %v3928_v17  ;;  %v1898_v22 = vld [vmem:[%s7626_s4 + $0x50] sm:$0xff] }
 0x437   :  { %v1894_v17 = vld [vmem:[%s7626_s4 + $0x30] sm:$0xff] }
 0x438   :  { %1762 = vmatpush.msra.mxu1 %v3957_v52  ;;  %1782 = vmatpush.msra.mxu2 %v3926_v19  ;;  %v3964_v52 = vld [vmem:[%s7623_s1 + $0x1158] sm:$0xff]  ;;  %v4007_v19 = vld [vmem:[%s7626_s4 + $0x130] sm:$0xff] }
 0x43a   :  { %1763 = vmatpush.msra.mxu1 %v3955_v58  ;;  %1783 = vmatpush.msra.mxu2 %v3924_v23  ;;  %v1897_v58 = vld [vmem:[%s7626_s4 + $0x48] sm:$0xff]  ;;  %v1892_v23 = vld [vmem:[%s7626_s4 + $0x20] sm:$0xff] }
 0x43c   :  { %1764 = vmatpush.msra.mxu1 %v3953_v59  ;;  %1784 = vmatpush.msra.mxu2 %v3922_v25  ;;  %v3962_v59 = vld [vmem:[%s7623_s1 + $0x1148] sm:$0xff]  ;;  %v1891_v25 = vld [vmem:[%s7626_s4 + $0x18] sm:$0xff] }
 0x43d   :  { %1765 = vmatmul.f32.vlgmr.msra.gmra.mxu1 %v6218_v32  ;;  %1785 = vmatmul.f32.vlgmr.msra.gmra.mxu2 %v6232_v38  ;;  %v1903_v38 = vld [vmem:[%s7626_s4 + $0x78] sm:$0xff] }
 0x43e   :  { %1924 = vmatpush.msrb.mxu2 %v1903_v38  ;;  %v4049_v38 = vld [vmem:[%s7626_s4 + $0x208] sm:$0xff] }
 0x440   :  { %1925 = vmatpush.msrb.mxu2 %v1902_v43  ;;  %v4048_v43 = vld [vmem:[%s7626_s4 + $0x200] sm:$0xff] }
 0x442   :  { %1926 = vmatpush.msrb.mxu2 %v1901_v46  ;;  %v4047_v46 = vld [vmem:[%s7626_s4 + $0x1f8] sm:$0xff] }
 0x444   :  { %1927 = vmatpush.msrb.mxu2 %v1900_v48  ;;  %v4046_v48 = vld [vmem:[%s7626_s4 + $0x1f0] sm:$0xff] }
 0x446   :  { %1928 = vmatpush.msrb.mxu2 %v1899_v33  ;;  %v3996_v33 = vld [vmem:[%s7626_s4 + $0xd8] sm:$0xff] }
 0x448   :  { %1929 = vmatpush.msrb.mxu2 %v1898_v22  ;;  %v3995_v22 = vld [vmem:[%s7626_s4 + $0xd0] sm:$0xff] }
 0x44a   :  { %1930 = vmatpush.msrb.mxu2 %v1897_v58  ;;  %v3994_v58 = vld [vmem:[%s7626_s4 + $0xc8] sm:$0xff] }
 0x44c   :  { %1931 = vmatpush.msrb.mxu2 %v1896_v13  ;;  %v4035_v13 = vld [vmem:[%s7626_s4 + $0x198] sm:$0xff] }
 0x44e   :  { %1932 = vmatpush.msrb.mxu2 %v1895_v15 }
 0x450   :  { %1933 = vmatpush.msrb.mxu2 %v1894_v17 }
 0x47a   :  { %v6297_v3 = vpop.f32.mrf.mxu1 }
 0x482   :  { %v6319_v5 = vpop.f32.mrf.mxu1 }
 0x496   :  { %v1746_v0 = vpop.f32.mrf.mxu0 }
 0x49a   :  { %v1602_v21 = vpop.f32.mrf.mxu1 }
 0x49b   :  { %v1603_v24 = vadd.f32 %v1602_v21, %v1582_v20  ;;  %v1893_v20 = vld [vmem:[%s7626_s4 + $0x28] sm:$0xff] }
 0x49c   :  { %v4006_v21 = vld [vmem:[%s7626_s4 + $0x128] sm:$0xff]  ;;  %1934 = vmatpush.msrb.mxu2 %v1893_v20 }
 0x49d   :  { %1652 = vmatpush.msrb.mxu3 %v1603_v24  ;;  %v4005_v24 = vld [vmem:[%s7626_s4 + $0x120] sm:$0xff] }
 0x49e   :  { %3919 = vmatmul.msk.f32.vlgmr.msrb.gmra.mxu3 %vm335_vm0, %v6207_v30  ;;  %v3976_v30 = vld [vmem:[%s7623_s1 + $0x11b8] sm:$0xff]  ;;  %1935 = vmatpush.msrb.mxu2 %v1892_v23 }
 0x49f   :  { %1789 = vmatpush.msra.mxu3 %v3984_v26  ;;  %v4004_v26 = vld [vmem:[%s7626_s4 + $0x118] sm:$0xff] }
 0x4a0   :  { %1936 = vmatpush.msrb.mxu2 %v1891_v25  ;;  %v4058_v25 = vld [vmem:[%s7626_s4 + $0x250] sm:$0xf] }
 0x4a1   :  { %1790 = vmatpush.msra.mxu3 %v3982_v6  ;;  %v1890_v6 = vld [vmem:[%s7626_s4 + $0x10] sm:$0xff] }
 0x4a2   :  { %1937 = vmatpush.msrb.mxu2 %v1890_v6  ;;  %v4056_v6 = vld [vmem:[%s7626_s4 + $0x240] sm:$0xff] }
 0x4a3   :  { %1791 = vmatpush.msra.mxu3 %v3980_v29  ;;  %v4003_v29 = vld [vmem:[%s7626_s4 + $0x110] sm:$0xff] }
 0x4a5   :  { %1792 = vmatpush.msra.mxu3 %v3978_v53  ;;  %v1889_v53 = vld [vmem:[%s7626_s4 + $0x8] sm:$0xff] }
 0x4a6   :  { %3920 = vmatmul.msk.f32.gmra.mxu3 %vm335_vm0, %v6241_v40  ;;  %v3972_v40 = vld [vmem:[%s7623_s1 + $0x1198] sm:$0xff]  ;;  %1938 = vmatpush.msrb.mxu2 %v1889_v53 }
 0x4a7   :  { %1793 = vmatpush.msra.mxu3 %v3976_v30  ;;  %v4002_v30 = vld [vmem:[%s7626_s4 + $0x108] sm:$0xff] }
 0x4a9   :  { %1794 = vmatpush.msra.mxu3 %v3974_v31  ;;  %v1888_v31 = vld [vmem:[%s7626_s4] sm:$0xff] }
 0x4aa   :  { %1939 = vmatpush.msrb.mxu2 %v1888_v31  ;;  %v4055_v31 = vld [vmem:[%s7626_s4 + $0x238] sm:$0xff] }
 0x4ab   :  { %1795 = vmatpush.msra.mxu3 %v3972_v40  ;;  %v3999_v40 = vld [vmem:[%s7626_s4 + $0xf0] sm:$0xff] }
 0x4ac   :  { %2166 = vmatpush.msra.mxu2 %v4049_v38 }
 0x4ad   :  { %1796 = vmatpush.msra.mxu3 %v3970_v47  ;;  %v3998_v47 = vld [vmem:[%s7626_s4 + $0xe8] sm:$0xff] }
 0x4ae   :  { %2167 = vmatpush.msra.mxu2 %v4048_v43 }
 0x4af   :  { %1797 = vmatpush.msra.mxu3 %v3968_v49  ;;  %v3997_v49 = vld [vmem:[%s7626_s4 + $0xe0] sm:$0xff] }
 0x4b0   :  { %2168 = vmatpush.msra.mxu2 %v4047_v46 }
 0x4b1   :  { %1798 = vmatpush.msra.mxu3 %v3966_v45  ;;  %v4044_v45 = vld [vmem:[%s7626_s4 + $0x1e0] sm:$0xff] }
 0x4b2   :  { %2169 = vmatpush.msra.mxu2 %v4046_v48  ;;  %v4018_v48 = vld [vmem:[%s7626_s4 + $0x188] sm:$0xf] }
 0x4b3   :  { %1799 = vmatpush.msra.mxu3 %v3964_v52  ;;  %v4043_v52 = vld [vmem:[%s7626_s4 + $0x1d8] sm:$0xff] }
 0x4b4   :  { %2170 = vmatpush.msra.mxu2 %v4045_v50 }
 0x4b5   :  { %1800 = vmatpush.msra.mxu3 %v3962_v59  ;;  %v4042_v59 = vld [vmem:[%s7626_s4 + $0x1d0] sm:$0xff] }
 0x4b6   :  { %2171 = vmatpush.msra.mxu2 %v4044_v45  ;;  %v4016_v45 = vld [vmem:[%s7626_s4 + $0x178] sm:$0xff] }
 0x4b7   :  { %1801 = vmatpush.msra.mxu3 %v3960_v63  ;;  %v4041_v63 = vld [vmem:[%s7626_s4 + $0x1c8] sm:$0xff] }
 0x4b8   :  { %2172 = vmatpush.msra.mxu2 %v4043_v52  ;;  %v1908_v52 = vld [vmem:[%s7626_s4 + $0xa0] sm:$0xff] }
 0x4b9   :  { %1802 = vmatpush.msra.mxu3 %v3958_v41  ;;  %v4040_v41 = vld [vmem:[%s7626_s4 + $0x1c0] sm:$0xff] }
 0x4ba   :  { %v1766_v1 = vpop.f32.mrf.mxu1  ;;  %2173 = vmatpush.msra.mxu2 %v4042_v59  ;;  %v1907_v59 = vld [vmem:[%s7626_s4 + $0x98] sm:$0xff] }
 0x4bb   :  { %v1767_v8 = vadd.f32 %v1766_v1, %v1746_v0  ;;  %1803 = vmatpush.msra.mxu3 %v3956_v51  ;;  %v4039_v0 = vld [vmem:[%s7626_s4 + $0x1b8] sm:$0xff]  ;;  %v4038_v51 = vld [vmem:[%s7626_s4 + $0x1b0] sm:$0xff]  ;;  %v4037_v1 = vld [vmem:[%s7626_s4 + $0x1a8] sm:$0xff] }
 0x4bc   :  { %2174 = vmatpush.msra.mxu2 %v4041_v63  ;;  %v4013_v63 = vld [vmem:[%s7626_s4 + $0x160] sm:$0xff] }
 0x4bd   :  { %1804 = vmatpush.msra.mxu3 %v3954_v60  ;;  %1833 = vmatpush.msrb.mxu0 %v1767_v8  ;;  %v4036_v60 = vld [vmem:[%s7626_s4 + $0x1a0] sm:$0xff]  ;;  %v1631_v8 = vpop.f32.mrf.mxu2 }
 0x4be   :  { %1805 = vmatmul.f32.vlgmr.msra.gmra.mxu3 %v6218_v32  ;;  %3987 = vmatmul.msk.f32.vlgmr.msrb.gmra.mxu0 %vm335_vm0, %v6419_v10  ;;  %v4009_v32 = vld [vmem:[%s7626_s4 + $0x140] sm:$0xff] }
 0x4bf   :  { %2003 = vmatpush.msra.mxu0 %v4009_v32  ;;  %2175 = vmatpush.msra.mxu2 %v4040_v41  ;;  %v4034_v32 = vld [vmem:[%s7626_s4 + $0x190] sm:$0xff]  ;;  %v4052_v41 = vld [vmem:[%s7626_s4 + $0x220] sm:$0xff] }
 0x4c1   :  { %2004 = vmatpush.msra.mxu0 %v4008_v16  ;;  %2176 = vmatpush.msra.mxu2 %v4039_v0  ;;  %v415_v16 = vadd.f32 %v5137_v56, %v5180_v12  ;;  %v1912_v56 = vld [vmem:[%s7626_s4 + $0xc0] sm:$0xf]  ;;  %v4057_v12 = vld [vmem:[%s7626_s4 + $0x248] sm:$0xff]  ;;  %v1906_v0 = vld [vmem:[%s7626_s4 + $0x90] sm:$0xff] }
 0x4c2   :  { %3991 = vmatpush.msk.msrb.mxu3 %vm1920_vm1, %v1912_v56  ;;  %v4089_v56 = vld [vmem:[%s7626_s4 + $0x2f0] sm:$0xff] }
 0x4c3   :  { %2005 = vmatpush.msra.mxu0 %v4007_v19  ;;  %2177 = vmatpush.msra.mxu2 %v4038_v51  ;;  %v642_v19 = vadd.f32 %v5418_v37, %v415_v16  ;;  %v4012_v51 = vld [vmem:[%s7626_s4 + $0x158] sm:$0xff]  ;;  %v4010_v16 = vld [vmem:[%s7626_s4 + $0x148] sm:$0xff] }
 0x4c5   :  { %2006 = vmatpush.msra.mxu0 %v4006_v21  ;;  %2178 = vmatpush.msra.mxu2 %v4037_v1  ;;  %v1634_v17 = vpop.f32.mrf.mxu2  ;;  %v6561_v21 = vpop.permute.xlu0 %1872  ;;  %v846_v23 = vadd.f32 %v5635_v2, %v642_v19  ;;  %v1911_v2 = vld [vmem:[%s7626_s4 + $0xb8] sm:$0xff]  ;;  %v4093_v19 = vld [vmem:[%s7626_s4 + $0x310] sm:$0xff] }
 0x4c6   :  { %3988 = vmatmul.msk.f32.gmra.mxu0 %vm335_vm0, %v6427_v11  ;;  %1955 = vmatpush.msrb.mxu3 %v1911_v2  ;;  %v4051_v1 = vld [vmem:[%s7626_s4 + $0x218] sm:$0xff]  ;;  %v4087_v2 = vld [vmem:[%s7626_s4 + $0x2e0] sm:$0xff] }
 0x4c7   :  { %2007 = vmatpush.msra.mxu0 %v4005_v24  ;;  %2179 = vmatpush.msra.mxu2 %v4036_v60  ;;  %v1660_v24 = vadd.f32 %v1631_v8, %v6092_v34  ;;  %v1050_v34 = vadd.f32 %v5857_v42, %v846_v23  ;;  %v1909_v42 = vld [vmem:[%s7626_s4 + $0xa8] sm:$0xff]  ;;  %v4011_v8 = vld [vmem:[%s7626_s4 + $0x150] sm:$0xff] }
 0x4c8   :  { %v1905_v60 = vld [vmem:[%s7626_s4 + $0x88] sm:$0xff] }
 0x4c9   :  { %2008 = vmatpush.msra.mxu0 %v4004_v26  ;;  %2180 = vmatpush.msra.mxu2 %v4035_v13  ;;  %v1254_v53 = vadd.f32 %v6081_v54, %v1050_v34  ;;  %v4050_v13 = vld [vmem:[%s7626_s4 + $0x210] sm:$0xff]  ;;  %v4092_v23 = vld [vmem:[%s7626_s4 + $0x308] sm:$0xff]  ;;  %v4086_v34 = vld [vmem:[%s7626_s4 + $0x2d8] sm:$0xff] }
 0x4cb   :  { %2009 = vmatpush.msra.mxu0 %v4003_v29  ;;  %2181 = vmatpush.msra.mxu2 %v4034_v32  ;;  %v1910_v29 = vld [vmem:[%s7626_s4 + $0xb0] sm:$0xff]  ;;  %v1458_v38 = vadd.f32 %v6314_v9, %v1254_v53  ;;  %v4017_v9 = vld [vmem:[%s7626_s4 + $0x180] sm:$0xff] }
 0x4cc   :  { %1956 = vmatpush.msrb.mxu3 %v1910_v29  ;;  %v1904_v32 = vld [vmem:[%s7626_s4 + $0x80] sm:$0xff] }
 0x4cd   :  { %2010 = vmatpush.msra.mxu0 %v4002_v30  ;;  %v1662_v54 = vadd.f32 %v1634_v17, %v1458_v38  ;;  %v4094_v17 = vld [vmem:[%s7626_s4 + $0x318] sm:$0xf] }
 0x4ce   :  { %1957 = vmatpush.msrb.mxu3 %v1909_v42 }
 0x4cf   :  { %2011 = vmatpush.msra.mxu0 %v4001_v36  ;;  %v1786_v36 = vpop.f32.mrf.mxu2 }
 0x4d0   :  { %1958 = vmatpush.msrb.mxu3 %v1908_v52 }
 0x4d1   :  { %2012 = vmatpush.msra.mxu0 %v4000_v39 }
 0x4d2   :  { %1959 = vmatpush.msrb.mxu3 %v1907_v59  ;;  %v1970_v59 = vld [vmem:[%s7627_s5] sm:$0xff] }
 0x4d3   :  { %2013 = vmatpush.msra.mxu0 %v3999_v40 }
 0x4d4   :  { %1960 = vmatpush.msrb.mxu3 %v1906_v0  ;;  %v4023_v0 = vld [vmem:[%s7627_s5 + $0x28] sm:$0xff] }
 0x4d5   :  { %2014 = vmatpush.msra.mxu0 %v3998_v47  ;;  %v6599_v47 = vpop.permute.xlu0 %1877 }
 0x4d6   :  { %1961 = vmatpush.msrb.mxu3 %v1905_v60  ;;  %v4083_v60 = vld [vmem:[%s7626_s4 + $0x2c0] sm:$0xff] }
 0x4d7   :  { %2015 = vmatpush.msra.mxu0 %v3997_v49 }
 0x4d8   :  { %1962 = vmatpush.msrb.mxu3 %v1904_v32  ;;  %v4117_v32 = vld [vmem:[%s7626_s4 + $0x378] sm:$0xff] }
 0x4d9   :  { %2016 = vmatpush.msra.mxu0 %v3996_v33 }
 0x4db   :  { %2017 = vmatpush.msra.mxu0 %v3995_v22  ;;  %v4054_v22 = vld [vmem:[%s7626_s4 + $0x230] sm:$0xff] }
 0x4dd   :  { %2018 = vmatpush.msra.mxu0 %v3994_v58  ;;  %v4014_v58 = vld [vmem:[%s7626_s4 + $0x168] sm:$0xff] }
 0x4df   :  { %4059 = vmatpush.msk.msrb.mxu0 %vm1920_vm1, %v4058_v25  ;;  %v4090_v25 = vld [vmem:[%s7626_s4 + $0x2f8] sm:$0xff] }
 0x4e1   :  { %2197 = vmatpush.msrb.mxu0 %v4057_v12  ;;  %v4088_v12 = vld [vmem:[%s7626_s4 + $0x2e8] sm:$0xff] }
 0x4e3   :  { %2198 = vmatpush.msrb.mxu0 %v4056_v6 }
 0x4e5   :  { %2199 = vmatpush.msrb.mxu0 %v4055_v31 }
 0x4e7   :  { %2200 = vmatpush.msrb.mxu0 %v4054_v22 }
 0x521   :  { %v6554_v15 = vpop.f32.mrf.mxu3 }
 0x529   :  { %v6559_v20 = vpop.f32.mrf.mxu3 }
 0x53b   :  { %v1835_v37 = vpop.f32.mrf.mxu0 }
 0x53c   :  { %v1864_v26 = vadd.f32 %v1835_v37, %v1660_v24  ;;  %v4091_v24 = vld [vmem:[%s7626_s4 + $0x300] sm:$0xff]  ;;  %v435_v37 = vadd.f32 %v5135_v55, %v5165_v7  ;;  %v438_v55 = vadd.f32 %v5139_v57, %v5185_v14 }
 0x53e   :  { %v1880_v30 = vadd.f32 %v6561_v21, %v1864_v26  ;;  %v641_v26 = vadd.f32 %v5391_v27, %v435_v37  ;;  %v643_v53 = vadd.f32 %v5413_v35, %v438_v55  ;;  %v4078_v37 = vld [vmem:[%s7626_s4 + $0x298] sm:$0xff]  ;;  %v4076_v55 = vld [vmem:[%s7626_s4 + $0x288] sm:$0xff] }
 0x540   :  { %v6595_v39 = vmax.f32 %v1880_v30, 0.0  ;;  %v845_v6 = vadd.f32 %v5621_v62, %v641_v26  ;;  %v847_v31 = vadd.f32 %v5640_v4, %v643_v53  ;;  %v4077_v26 = vld [vmem:[%s7626_s4 + $0x290] sm:$0xff]  ;;  %v4075_v53 = vld [vmem:[%s7626_s4 + $0x280] sm:$0xff] }
 0x541   :  { %v1806_v43 = vpop.f32.mrf.mxu3 }
 0x542   :  { %v1807_v40 = vadd.f32 %v1806_v43, %v1786_v36  ;;  %1940 = vmatmul.f32.vlgmr.msrb.gmra.mxu2 %v6595_v39  ;;  %2019 = vmatmul.f32.vlgmr.msra.gmra.mxu0 %v6595_v39  ;;  %v1049_v29 = vadd.f32 %v5840_v61, %v845_v6  ;;  %v1051_v36 = vadd.f32 %v5862_v44, %v847_v31  ;;  %v4112_v6 = vld [vmem:[%s7626_s4 + $0x350] sm:$0xff]  ;;  %v4074_v31 = vld [vmem:[%s7626_s4 + $0x278] sm:$0xff] }
 0x543   :  { %v1838_v46 = vpop.f32.mrf.mxu0 }
 0x544   :  { %v1866_v49 = vadd.f32 %v1838_v46, %v1662_v54  ;;  %1856 = vmatpush.msrb.mxu1 %v1807_v40  ;;  %v1253_v7 = vadd.f32 %v6063_v18, %v1049_v29  ;;  %v1255_v38 = vadd.f32 %v6087_v28, %v1051_v36  ;;  %v4025_v29 = vld [vmem:[%s7627_s5 + $0x38] sm:$0xff]  ;;  %v4073_v36 = vld [vmem:[%s7626_s4 + $0x270] sm:$0xff] }
 0x545   :  { %3989 = vmatmul.msk.f32.vlgmr.msrb.gmra.mxu1 %vm335_vm0, %v6419_v10  ;;  %v4015_v10 = vld [vmem:[%s7626_s4 + $0x170] sm:$0xff] }
 0x546   :  { %v1882_v50 = vadd.f32 %v6599_v47, %v1866_v49  ;;  %4019 = vmatpush.msk.msra.mxu1 %vm1920_vm1, %v4018_v48  ;;  %v1457_v30 = vadd.f32 %v6297_v3, %v1253_v7  ;;  %v1459_v57 = vadd.f32 %v6319_v5, %v1255_v38  ;;  %v4111_v7 = vld [vmem:[%s7626_s4 + $0x348] sm:$0xff]  ;;  %v4062_v38 = vld [vmem:[%s7627_s5 + $0x40] sm:$0xff] }
 0x548   :  { %v6611_v33 = vmax.f32 %v1882_v50, 0.0  ;;  %2034 = vmatpush.msra.mxu1 %v4017_v9  ;;  %v1661_v42 = vadd.f32 %v6554_v15, %v1457_v30  ;;  %v1663_v35 = vadd.f32 %v6559_v20, %v1459_v57  ;;  %v4022_v9 = vld [vmem:[%s7627_s5 + $0x20] sm:$0xff]  ;;  %v4107_v57 = vld [vmem:[%s7626_s4 + $0x328] sm:$0xff] }
 0x549   :  { %v4110_v30 = vld [vmem:[%s7626_s4 + $0x340] sm:$0xff] }
 0x54a   :  { %1943 = vmatmul.f32.gmra.mxu2 %v6611_v33  ;;  %2022 = vmatmul.f32.gmra.mxu0 %v6611_v33 }
 0x54b   :  { %2035 = vmatpush.msra.mxu1 %v4016_v45 }
 0x54d   :  { %3990 = vmatmul.msk.f32.gmra.mxu1 %vm335_vm0, %v6427_v11  ;;  %v4053_v11 = vld [vmem:[%s7626_s4 + $0x228] sm:$0xff]  ;;  %vm3104_vm0 = vcmask 1014784  }
 0x54e   :  { %2036 = vmatpush.msra.mxu1 %v4015_v10  ;;  %2201 = vmatpush.msrb.mxu0 %v4053_v11 }
 0x550   :  { %2037 = vmatpush.msra.mxu1 %v4014_v58  ;;  %2202 = vmatpush.msrb.mxu0 %v4052_v41  ;;  %v4121_v58 = vld [vmem:[%s7626_s4 + $0x398] sm:$0xff]  ;;  %v4085_v41 = vld [vmem:[%s7626_s4 + $0x2d0] sm:$0xff] }
 0x552   :  { %2182 = vmatmul.f32.vlgmr.msra.gmra.mxu2 %v6595_v39  ;;  %2038 = vmatpush.msra.mxu1 %v4013_v63  ;;  %v4120_v63 = vld [vmem:[%s7626_s4 + $0x390] sm:$0xff] }
 0x553   :  { %2203 = vmatpush.msrb.mxu0 %v4051_v1  ;;  %v4119_v1 = vld [vmem:[%s7626_s4 + $0x388] sm:$0xff] }
 0x554   :  { %2039 = vmatpush.msra.mxu1 %v4012_v51  ;;  %v4084_v51 = vld [vmem:[%s7626_s4 + $0x2c8] sm:$0xff] }
 0x555   :  { %2204 = vmatpush.msrb.mxu0 %v4050_v13  ;;  %v4082_v13 = vld [vmem:[%s7626_s4 + $0x2b8] sm:$0xff] }
 0x556   :  { %2040 = vmatpush.msra.mxu1 %v4011_v8  ;;  %v4118_v8 = vld [vmem:[%s7626_s4 + $0x380] sm:$0xff] }
 0x557   :  { %4095 = vmatpush.msk.msra.mxu0 %vm1920_vm1, %v4094_v17  ;;  %v4081_v17 = vld [vmem:[%s7626_s4 + $0x2b0] sm:$0xff] }
 0x558   :  { %2041 = vmatpush.msra.mxu1 %v4010_v16  ;;  %v1971_v16 = vld [vmem:[%s7627_s5 + $0x8] sm:$0xff] }
 0x559   :  { %2322 = vmatpush.msra.mxu0 %v4093_v19  ;;  %v4116_v19 = vld [vmem:[%s7626_s4 + $0x370] sm:$0xff] }
 0x55a   :  { %2185 = vmatmul.f32.gmra.mxu2 %v6611_v33 }
 0x55b   :  { %2323 = vmatpush.msra.mxu0 %v4092_v23  ;;  %v4024_v23 = vld [vmem:[%s7627_s5 + $0x30] sm:$0xff] }
 0x55d   :  { %2324 = vmatpush.msra.mxu0 %v4091_v24  ;;  %v4080_v24 = vld [vmem:[%s7626_s4 + $0x2a8] sm:$0xff] }
 0x55f   :  { %2325 = vmatpush.msra.mxu0 %v4090_v25  ;;  %v4115_v25 = vld [vmem:[%s7626_s4 + $0x368] sm:$0xff] }
 0x561   :  { %2326 = vmatpush.msra.mxu0 %v4089_v56  ;;  %v4079_v56 = vld [vmem:[%s7626_s4 + $0x2a0] sm:$0xff] }
 0x563   :  { %2327 = vmatpush.msra.mxu0 %v4088_v12  ;;  %v4114_v12 = vld [vmem:[%s7626_s4 + $0x360] sm:$0xff] }
 0x565   :  { %2328 = vmatpush.msra.mxu0 %v4087_v2  ;;  %v4113_v2 = vld [vmem:[%s7626_s4 + $0x358] sm:$0xff] }
 0x567   :  { %2329 = vmatpush.msra.mxu0 %v4086_v34  ;;  %v1972_v34 = vld [vmem:[%s7627_s5 + $0x10] sm:$0xff] }
 0x5bf   :  { %v2020_v5 = vpop.f32.mrf.mxu0 }
 0x5c2   :  { %v1858_v27 = vpop.f32.mrf.mxu1 }
 0x5c3   :  { %v1865_v62 = vadd.f32 %v1858_v27, %v1661_v42  ;;  %v4109_v42 = vld [vmem:[%s7626_s4 + $0x338] sm:$0xff] }
 0x5c4   :  { %v1973_v27 = vld [vmem:[%s7627_s5 + $0x18] sm:$0xff] }
 0x5c5   :  { %v1881_v61 = vadd.f32 %v6561_v21, %v1865_v62  ;;  %v1941_v3 = vpop.f32.mrf.mxu2  ;;  %v4108_v62 = vld [vmem:[%s7626_s4 + $0x330] sm:$0xff] }
 0x5c7   :  { %v6714_v14 = vmax.f32 %v1881_v61, 0.0  ;;  %v2023_v20 = vpop.f32.mrf.mxu0  ;;  %v4072_v61 = vld [vmem:[%s7626_s4 + $0x268] sm:$0xff] }
 0x5c9   :  { %3992 = vmatmul.msk.f32.vlgmr.msrb.gmra.mxu3 %vm1913_vm2, %v6714_v14  ;;  %4020 = vmatmul.msk.f32.vlgmr.msra.gmra.mxu1 %vm1913_vm2, %v6714_v14 }
 0x5ca   :  { %4060 = vmatmul.msk.f32.vlgmr.msrb.gmra.mxu0 %vm1913_vm2, %v6714_v14  ;;  %v1861_v4 = vpop.f32.mrf.mxu1 }
 0x5cb   :  { %v1867_v44 = vadd.f32 %v1861_v4, %v1663_v35  ;;  %v4071_v35 = vld [vmem:[%s7626_s4 + $0x260] sm:$0xff] }
 0x5cc   :  { %v4106_v4 = vld [vmem:[%s7626_s4 + $0x320] sm:$0xff] }
 0x5cd   :  { %v1883_v18 = vadd.f32 %v6599_v47, %v1867_v44  ;;  %v1944_v15 = vpop.f32.mrf.mxu2  ;;  %v4070_v44 = vld [vmem:[%s7626_s4 + $0x258] sm:$0xff] }
 0x5cf   :  { %v6724_v28 = vmax.f32 %v1883_v18, 0.0  ;;  %v4130_v18 = vld [vmem:[%s7626_s4 + $0x3e0] sm:$0xf] }
 0x5d1   :  { %3993 = vmatmul.msk.f32.gmra.mxu3 %vm1913_vm2, %v6724_v28  ;;  %4021 = vmatmul.msk.f32.gmra.mxu1 %vm1913_vm2, %v6724_v28 }
 0x5d2   :  { %4061 = vmatmul.msk.f32.gmra.mxu0 %vm1913_vm2, %v6724_v28 }
 0x5d5   :  { %v2183_v54 = vpop.f32.mrf.mxu2 }
 0x5da   :  { %4096 = vmatmul.msk.f32.vlgmr.msra.gmra.mxu0 %vm1913_vm2, %v6714_v14 }
 0x5dd   :  { %v2186_v50 = vpop.f32.mrf.mxu2 }
 0x5e2   :  { %4097 = vmatmul.msk.f32.gmra.mxu0 %vm1913_vm2, %v6724_v28 }
 0x646   :  { %v2043_v21 = vpop.f32.mrf.mxu1 }
 0x647   :  { %v2206_v43 = vpop.f32.mrf.mxu0  ;;  %v2044_v49 = vadd.f32 %v2043_v21, %v2020_v5  ;;  %v4063_v5 = vld [vmem:[%s7627_s5 + $0x48] sm:$0xff]  ;;  %v4126_v21 = vld [vmem:[%s7626_s4 + $0x3c0] sm:$0xff] }
 0x648   :  { %v2207_v22 = vadd.f32 %v2206_v43, %v2183_v54  ;;  %v4125_v43 = vld [vmem:[%s7626_s4 + $0x3b8] sm:$0xff]  ;;  %v4064_v54 = vld [vmem:[%s7627_s5 + $0x50] sm:$0xff] }
 0x64c   :  { %v1964_v40 = vpop.f32.mrf.mxu3 }
 0x64d   :  { %v1965_v11 = vadd.f32 %v1964_v40, %v1941_v3  ;;  %v4129_v3 = vld [vmem:[%s7626_s4 + $0x3d8] sm:$0xff]  ;;  %v4124_v40 = vld [vmem:[%s7626_s4 + $0x3b0] sm:$0xff] }
 0x64e   :  { %v2046_v46 = vpop.f32.mrf.mxu1 }
 0x64f   :  { %v2047_v47 = vadd.f32 %v2046_v46, %v2023_v20  ;;  %v2209_v48 = vpop.f32.mrf.mxu0  ;;  %v4127_v20 = vld [vmem:[%s7626_s4 + $0x3c8] sm:$0xff] }
 0x650   :  { %v2210_v45 = vadd.f32 %v2209_v48, %v2186_v50  ;;  %v4123_v46 = vld [vmem:[%s7626_s4 + $0x3a8] sm:$0xff]  ;;  %v4164_v50 = vld [vmem:[%s7626_s4 + $0x498] sm:$0xff] }
 0x651   :  { %2081 = vmatpush.msra.mxu3 %v2047_v47  ;;  %v4122_v47 = vld [vmem:[%s7626_s4 + $0x3a0] sm:$0xff]  ;;  %v4166_v48 = vld [vmem:[%s7626_s4 + $0x4a8] sm:$0xf] }
 0x653   :  { %2082 = vmatpush.msra.mxu3 %v2044_v49  ;;  %v4065_v49 = vld [vmem:[%s7627_s5 + $0x58] sm:$0xff] }
 0x654   :  { %v1967_v10 = vpop.f32.mrf.mxu3  ;;  %4026 = vmatmul.msk.f32.vlgmr.msra.gmra.mxu3 %vm2054_vm3, %v4022_v9  ;;  %v4165_v9 = vld [vmem:[%s7626_s4 + $0x4a0] sm:$0xff] }
 0x655   :  { %v1968_v52 = vadd.f32 %v1967_v10, %v1944_v15  ;;  %2243 = vmatpush.msrb.mxu3 %v2210_v45  ;;  %v4128_v15 = vld [vmem:[%s7626_s4 + $0x3d0] sm:$0xff]  ;;  %v4162_v10 = vld [vmem:[%s7626_s4 + $0x488] sm:$0xff] }
 0x656   :  { %v4163_v45 = vld [vmem:[%s7626_s4 + $0x490] sm:$0xff] }
 0x657   :  { %2244 = vmatpush.msrb.mxu3 %v2207_v22  ;;  %2122 = vmatpush.msrb.mxu1 %v1968_v52  ;;  %v4161_v22 = vld [vmem:[%s7626_s4 + $0x480] sm:$0xff]  ;;  %v4160_v52 = vld [vmem:[%s7626_s4 + $0x478] sm:$0xff] }
 0x659   :  { %2416 = vmatpush.msra.mxu3 %v4121_v58  ;;  %2123 = vmatpush.msrb.mxu1 %v1965_v11  ;;  %v4159_v58 = vld [vmem:[%s7626_s4 + $0x470] sm:$0xff]  ;;  %v4158_v11 = vld [vmem:[%s7626_s4 + $0x468] sm:$0xff] }
 0x65a   :  { %4030 = vmatmul.msk.f32.vlgmr.msrb.gmra.mxu1 %vm2054_vm3, %v1970_v59  ;;  %v4202_v59 = vld [vmem:[%s7626_s4 + $0x570] sm:$0xf] }
 0x65b   :  { %2417 = vmatpush.msra.mxu3 %v4120_v63  ;;  %2291 = vmatpush.msra.mxu1 %v4085_v41  ;;  %v4201_v63 = vld [vmem:[%s7626_s4 + $0x568] sm:$0xff]  ;;  %v4200_v41 = vld [vmem:[%s7626_s4 + $0x560] sm:$0xff] }
 0x65c   :  { %4027 = vmatmul.msk.f32.gmra.mxu3 %vm2054_vm3, %v4023_v0  ;;  %v4199_v0 = vld [vmem:[%s7626_s4 + $0x558] sm:$0xff] }
 0x65d   :  { %2292 = vmatpush.msra.mxu1 %v4084_v51  ;;  %2418 = vmatpush.msra.mxu3 %v4119_v1  ;;  %v4198_v51 = vld [vmem:[%s7626_s4 + $0x550] sm:$0xff]  ;;  %v4197_v1 = vld [vmem:[%s7626_s4 + $0x548] sm:$0xff] }
 0x65f   :  { %2293 = vmatpush.msra.mxu1 %v4083_v60  ;;  %2419 = vmatpush.msra.mxu3 %v4118_v8  ;;  %v4196_v60 = vld [vmem:[%s7626_s4 + $0x540] sm:$0xff]  ;;  %v4195_v8 = vld [vmem:[%s7626_s4 + $0x538] sm:$0xff] }
 0x661   :  { %2294 = vmatpush.msra.mxu1 %v4082_v13  ;;  %2420 = vmatpush.msra.mxu3 %v4117_v32  ;;  %v4194_v13 = vld [vmem:[%s7626_s4 + $0x530] sm:$0xff] }
 0x662   :  { %4031 = vmatmul.msk.f32.gmra.mxu1 %vm2054_vm3, %v1971_v16 }
 0x663   :  { %2295 = vmatpush.msra.mxu1 %v4081_v17  ;;  %2421 = vmatpush.msra.mxu3 %v4116_v19 }
 0x664   :  { %4028 = vmatmul.msk.f32.gmra.mxu3 %vm2054_vm3, %v4024_v23 }
 0x665   :  { %2296 = vmatpush.msra.mxu1 %v4080_v24  ;;  %2422 = vmatpush.msra.mxu3 %v4115_v25 }
 0x667   :  { %2297 = vmatpush.msra.mxu1 %v4079_v56  ;;  %2423 = vmatpush.msra.mxu3 %v4114_v12 }
 0x669   :  { %2298 = vmatpush.msra.mxu1 %v4078_v37  ;;  %2424 = vmatpush.msra.mxu3 %v4113_v2 }
 0x66a   :  { %4032 = vmatmul.msk.f32.gmra.mxu1 %vm2054_vm3, %v1972_v34 }
 0x66b   :  { %2299 = vmatpush.msra.mxu1 %v4077_v26  ;;  %2425 = vmatpush.msra.mxu3 %v4112_v6  ;;  %v2331_v26 = vpop.f32.mrf.mxu0 }
 0x66c   :  { %4029 = vmatmul.msk.f32.gmra.mxu3 %vm2054_vm3, %v4025_v29 }
 0x66d   :  { %2300 = vmatpush.msra.mxu1 %v4076_v55  ;;  %2426 = vmatpush.msra.mxu3 %v4111_v7 }
 0x66f   :  { %2301 = vmatpush.msra.mxu1 %v4075_v53  ;;  %2427 = vmatpush.msra.mxu3 %v4110_v30 }
 0x671   :  { %2302 = vmatpush.msra.mxu1 %v4074_v31  ;;  %2428 = vmatpush.msra.mxu3 %v4109_v42 }
 0x672   :  { %4033 = vmatmul.msk.f32.gmra.mxu1 %vm2054_vm3, %v1973_v27 }
 0x673   :  { %2303 = vmatpush.msra.mxu1 %v4073_v36  ;;  %2429 = vmatpush.msra.mxu3 %v4108_v62  ;;  %v2334_v53 = vpop.f32.mrf.mxu0  ;;  %v4098_v36 = vld [vmem:[%s7627_s5 + $0x60] sm:$0xff] }
 0x674   :  { %4066 = vmatmul.msk.f32.vlgmr.msrb.gmra.mxu3 %vm2054_vm3, %v4062_v38  ;;  %v4157_v62 = vld [vmem:[%s7626_s4 + $0x460] sm:$0xff]  ;;  %v4156_v38 = vld [vmem:[%s7626_s4 + $0x458] sm:$0xff] }
 0x675   :  { %2304 = vmatpush.msra.mxu1 %v4072_v61  ;;  %2430 = vmatpush.msra.mxu3 %v4107_v57 }
 0x677   :  { %2305 = vmatpush.msra.mxu1 %v4071_v35  ;;  %2431 = vmatpush.msra.mxu3 %v4106_v4  ;;  %v4155_v35 = vld [vmem:[%s7626_s4 + $0x450] sm:$0xff]  ;;  %v4154_v4 = vld [vmem:[%s7626_s4 + $0x448] sm:$0xff] }
 0x679   :  { %2306 = vmatpush.msra.mxu1 %v4070_v44  ;;  %v4099_v44 = vld [vmem:[%s7627_s5 + $0x68] sm:$0xff] }
 0x67a   :  { %2307 = vmatmul.f32.vlgmr.msra.gmra.mxu1 %v6595_v39 }
 0x67b   :  { %4131 = vmatpush.msk.msrb.mxu1 %vm1920_vm1, %v4130_v18  ;;  %v4153_v18 = vld [vmem:[%s7626_s4 + $0x440] sm:$0xff] }
 0x67c   :  { %4067 = vmatmul.msk.f32.gmra.mxu3 %vm2054_vm3, %v4063_v5 }
 0x67d   :  { %2447 = vmatpush.msrb.mxu1 %v4129_v3  ;;  %v4152_v3 = vld [vmem:[%s7626_s4 + $0x438] sm:$0xff] }
 0x67f   :  { %2448 = vmatpush.msrb.mxu1 %v4128_v15 }
 0x681   :  { %2449 = vmatpush.msrb.mxu1 %v4127_v20  ;;  %v4151_v20 = vld [vmem:[%s7626_s4 + $0x430] sm:$0xff] }
 0x682   :  { %2310 = vmatmul.f32.gmra.mxu1 %v6611_v33 }
 0x683   :  { %2450 = vmatpush.msrb.mxu1 %v4126_v21  ;;  %v4150_v21 = vld [vmem:[%s7626_s4 + $0x428] sm:$0xff] }
 0x684   :  { %4068 = vmatmul.msk.f32.gmra.mxu3 %vm2054_vm3, %v4064_v54  ;;  %v4149_v54 = vld [vmem:[%s7626_s4 + $0x420] sm:$0xff] }
 0x685   :  { %2451 = vmatpush.msrb.mxu1 %v4125_v43  ;;  %v4100_v43 = vld [vmem:[%s7627_s5 + $0x70] sm:$0xff] }
 0x687   :  { %2452 = vmatpush.msrb.mxu1 %v4124_v40 }
 0x689   :  { %2453 = vmatpush.msrb.mxu1 %v4123_v46  ;;  %v4148_v46 = vld [vmem:[%s7626_s4 + $0x418] sm:$0xff] }
 0x68b   :  { %2454 = vmatpush.msrb.mxu1 %v4122_v47 }
 0x68c   :  { %4132 = vmatmul.msk.f32.vlgmr.msrb.gmra.mxu1 %vm1913_vm2, %v6714_v14  ;;  %4069 = vmatmul.msk.f32.gmra.mxu3 %vm2054_vm3, %v4065_v49  ;;  %v4146_v49 = vld [vmem:[%s7626_s4 + $0x408] sm:$0xff] }
 0x68d   :  { %4167 = vmatpush.msk.msra.mxu1 %vm1920_vm1, %v4166_v48  ;;  %v4147_v48 = vld [vmem:[%s7626_s4 + $0x410] sm:$0xff] }
 0x68f   :  { %2572 = vmatpush.msra.mxu1 %v4165_v9  ;;  %v4101_v9 = vld [vmem:[%s7627_s5 + $0x78] sm:$0xff] }
 0x691   :  { %2573 = vmatpush.msra.mxu1 %v4164_v50  ;;  %v4145_v50 = vld [vmem:[%s7626_s4 + $0x400] sm:$0xff] }
 0x693   :  { %2574 = vmatpush.msra.mxu1 %v4163_v45  ;;  %v4144_v45 = vld [vmem:[%s7626_s4 + $0x3f8] sm:$0xff] }
 0x694   :  { %4133 = vmatmul.msk.f32.gmra.mxu1 %vm1913_vm2, %v6724_v28  ;;  %2432 = vmatmul.f32.vlgmr.msra.gmra.mxu3 %v6595_v39 }
 0x695   :  { %2575 = vmatpush.msra.mxu1 %v4162_v10 }
 0x697   :  { %2576 = vmatpush.msra.mxu1 %v4161_v22 }
 0x699   :  { %2577 = vmatpush.msra.mxu1 %v4160_v52 }
 0x69b   :  { %2578 = vmatpush.msra.mxu1 %v4159_v58  ;;  %v4143_v58 = vld [vmem:[%s7626_s4 + $0x3f0] sm:$0xff] }
 0x69c   :  { %2435 = vmatmul.f32.gmra.mxu3 %v6611_v33 }
 0x69d   :  { %2579 = vmatpush.msra.mxu1 %v4158_v11 }
 0x69e   :  { %4168 = vmatmul.msk.f32.vlgmr.msra.gmra.mxu1 %vm1913_vm2, %v6714_v14 }
 0x69f   :  { %4203 = vmatpush.msk.msrb.mxu1 %vm1920_vm1, %v4202_v59  ;;  %v4142_v59 = vld [vmem:[%s7626_s4 + $0x3e8] sm:$0xff] }
 0x6a1   :  { %2697 = vmatpush.msrb.mxu1 %v4201_v63  ;;  %v4134_v63 = vld [vmem:[%s7627_s5 + $0x80] sm:$0xff] }
 0x6a3   :  { %2698 = vmatpush.msrb.mxu1 %v4200_v41  ;;  %v4193_v41 = vld [vmem:[%s7626_s4 + $0x528] sm:$0xff] }
 0x6a5   :  { %2699 = vmatpush.msrb.mxu1 %v4199_v0  ;;  %v4192_v0 = vld [vmem:[%s7626_s4 + $0x520] sm:$0xff] }
 0x6a6   :  { %4169 = vmatmul.msk.f32.gmra.mxu1 %vm1913_vm2, %v6724_v28 }
 0x6a7   :  { %2700 = vmatpush.msrb.mxu1 %v4198_v51  ;;  %v4191_v51 = vld [vmem:[%s7626_s4 + $0x518] sm:$0xff] }
 0x6a9   :  { %2701 = vmatpush.msrb.mxu1 %v4197_v1  ;;  %v4190_v1 = vld [vmem:[%s7626_s4 + $0x510] sm:$0xff] }
 0x6ab   :  { %2702 = vmatpush.msrb.mxu1 %v4196_v60  ;;  %v4135_v60 = vld [vmem:[%s7627_s5 + $0x88] sm:$0xff] }
 0x6ad   :  { %2703 = vmatpush.msrb.mxu1 %v4195_v8  ;;  %v4189_v8 = vld [vmem:[%s7626_s4 + $0x508] sm:$0xff] }
 0x6af   :  { %2704 = vmatpush.msrb.mxu1 %v4194_v13  ;;  %v4188_v13 = vld [vmem:[%s7626_s4 + $0x500] sm:$0xff] }
 0x6b0   :  { %4204 = vmatmul.msk.f32.vlgmr.msrb.gmra.mxu1 %vm1913_vm2, %v6714_v14 }
 0x6b8   :  { %4205 = vmatmul.msk.f32.gmra.mxu1 %vm1913_vm2, %v6724_v28 }
 0x6d7   :  { %v2084_v32 = vpop.f32.mrf.mxu3  ;;  %v2125_v16 = vpop.f32.mrf.mxu1 }
 0x6d8   :  { %v2126_v17 = vadd.f32 %v2125_v16, %v2084_v32  ;;  %v4187_v32 = vld [vmem:[%s7626_s4 + $0x4f8] sm:$0xff]  ;;  %v4186_v16 = vld [vmem:[%s7626_s4 + $0x4f0] sm:$0xff] }
 0x6df   :  { %v2087_v19 = vpop.f32.mrf.mxu3  ;;  %v2128_v23 = vpop.f32.mrf.mxu1 }
 0x6e0   :  { %v2129_v24 = vadd.f32 %v2128_v23, %v2087_v19  ;;  %v4185_v19 = vld [vmem:[%s7626_s4 + $0x4e8] sm:$0xff]  ;;  %v4184_v23 = vld [vmem:[%s7626_s4 + $0x4e0] sm:$0xff] }
 0x6e7   :  { %v2090_v25 = vpop.f32.mrf.mxu3  ;;  %v2131_v56 = vpop.f32.mrf.mxu1 }
 0x6e8   :  { %v2132_v12 = vadd.f32 %v2131_v56, %v2090_v25  ;;  %v4182_v25 = vld [vmem:[%s7626_s4 + $0x4d0] sm:$0xff]  ;;  %v4137_v56 = vld [vmem:[%s7627_s5 + $0x98] sm:$0xff] }
 0x6ef   :  { %v2093_v37 = vpop.f32.mrf.mxu3  ;;  %v2134_v2 = vpop.f32.mrf.mxu1 }
 0x6f0   :  { %v2135_v34 = vadd.f32 %v2134_v2, %v2093_v37  ;;  %v4180_v37 = vld [vmem:[%s7626_s4 + $0x4c0] sm:$0xff]  ;;  %v4179_v2 = vld [vmem:[%s7626_s4 + $0x4b8] sm:$0xff] }
 0x6f7   :  { %v2246_v6 = vpop.f32.mrf.mxu3  ;;  %v2308_v55 = vpop.f32.mrf.mxu1 }
 0x6f8   :  { %v6980_v29 = vadd.f32 %v2246_v6, %v2126_v17  ;;  %v2332_v27 = vadd.f32 %v2331_v26, %v2308_v55  ;;  %v4136_v17 = vld [vmem:[%s7627_s5 + $0x90] sm:$0xff]  ;;  %v4238_v26 = vld [vmem:[%s7626_s4 + $0x638] sm:$0xf]  ;;  %v4236_v55 = vld [vmem:[%s7626_s4 + $0x628] sm:$0xff] }
 0x6f9   :  { %v4237_v6 = vld [vmem:[%s7626_s4 + $0x630] sm:$0xff] }
 0x6ff   :  { %v2249_v7 = vpop.f32.mrf.mxu3  ;;  %v2311_v31 = vpop.f32.mrf.mxu1 }
 0x700   :  { %v6982_v30 = vadd.f32 %v2249_v7, %v2129_v24  ;;  %v2335_v42 = vadd.f32 %v2334_v53, %v2311_v31  ;;  %v4183_v24 = vld [vmem:[%s7626_s4 + $0x4d8] sm:$0xff]  ;;  %v4235_v7 = vld [vmem:[%s7626_s4 + $0x620] sm:$0xff]  ;;  %v4233_v31 = vld [vmem:[%s7626_s4 + $0x610] sm:$0xff] }
 0x701   :  { %v4234_v53 = vld [vmem:[%s7626_s4 + $0x618] sm:$0xff] }
 0x702   :  { %2368 = vmatpush.msrb.mxu2 %v2335_v42  ;;  %v4232_v42 = vld [vmem:[%s7626_s4 + $0x608] sm:$0xff] }
 0x704   :  { %2369 = vmatpush.msrb.mxu2 %v2332_v27  ;;  %v4231_v27 = vld [vmem:[%s7626_s4 + $0x600] sm:$0xff] }
 0x705   :  { %4102 = vmatmul.msk.f32.vlgmr.msrb.gmra.mxu2 %vm2054_vm3, %v4098_v36  ;;  %v4230_v36 = vld [vmem:[%s7626_s4 + $0x5f8] sm:$0xff] }
 0x706   :  { %2541 = vmatpush.msra.mxu2 %v4157_v62  ;;  %v4274_v62 = vld [vmem:[%s7626_s4 + $0x700] sm:$0xf] }
 0x707   :  { %v2252_v61 = vpop.f32.mrf.mxu3 }
 0x708   :  { %v6994_v57 = vadd.f32 %v2252_v61, %v2132_v12  ;;  %2542 = vmatpush.msra.mxu2 %v4156_v38  ;;  %v4181_v12 = vld [vmem:[%s7626_s4 + $0x4c8] sm:$0xff]  ;;  %v4273_v38 = vld [vmem:[%s7626_s4 + $0x6f8] sm:$0xff]  ;;  %v4272_v61 = vld [vmem:[%s7626_s4 + $0x6f0] sm:$0xff] }
 0x709   :  { %v2456_v40 = vpop.f32.mrf.mxu1 }
 0x70a   :  { %2543 = vmatpush.msra.mxu2 %v4155_v35  ;;  %v4271_v35 = vld [vmem:[%s7626_s4 + $0x6e8] sm:$0xff] }
 0x70c   :  { %2544 = vmatpush.msra.mxu2 %v4154_v4  ;;  %v4270_v4 = vld [vmem:[%s7626_s4 + $0x6e0] sm:$0xff] }
 0x70d   :  { %4103 = vmatmul.msk.f32.gmra.mxu2 %vm2054_vm3, %v4099_v44  ;;  %v4269_v44 = vld [vmem:[%s7626_s4 + $0x6d8] sm:$0xff] }
 0x70e   :  { %2545 = vmatpush.msra.mxu2 %v4153_v18  ;;  %v4268_v18 = vld [vmem:[%s7626_s4 + $0x6d0] sm:$0xff] }
 0x70f   :  { %v2255_v5 = vpop.f32.mrf.mxu3 }
 0x710   :  { %v7012_v15 = vadd.f32 %v2255_v5, %v2135_v34  ;;  %2546 = vmatpush.msra.mxu2 %v4152_v3  ;;  %v4178_v34 = vld [vmem:[%s7626_s4 + $0x4b0] sm:$0xff]  ;;  %v4267_v3 = vld [vmem:[%s7626_s4 + $0x6c8] sm:$0xff]  ;;  %v4266_v5 = vld [vmem:[%s7626_s4 + $0x6c0] sm:$0xff] }
 0x711   :  { %v2459_v10 = vpop.f32.mrf.mxu1 }
 0x712   :  { %2547 = vmatpush.msra.mxu2 %v4151_v20 }
 0x714   :  { %2548 = vmatpush.msra.mxu2 %v4150_v21 }
 0x715   :  { %4104 = vmatmul.msk.f32.gmra.mxu2 %vm2054_vm3, %v4100_v43 }
 0x716   :  { %2549 = vmatpush.msra.mxu2 %v4149_v54 }
 0x717   :  { %v2433_v47 = vpop.f32.mrf.mxu3 }
 0x718   :  { %2550 = vmatpush.msra.mxu2 %v4148_v46  ;;  %v2457_v11 = vadd.f32 %v2456_v40, %v2433_v47 }
 0x71a   :  { %2551 = vmatpush.msra.mxu2 %v4147_v48 }
 0x71c   :  { %2552 = vmatpush.msra.mxu2 %v4146_v49 }
 0x71d   :  { %4105 = vmatmul.msk.f32.gmra.mxu2 %vm2054_vm3, %v4101_v9 }
 0x71e   :  { %2553 = vmatpush.msra.mxu2 %v4145_v50  ;;  %v2581_v50 = vpop.f32.mrf.mxu1 }
 0x71f   :  { %v2436_v22 = vpop.f32.mrf.mxu3 }
 0x720   :  { %v2460_v52 = vadd.f32 %v2459_v10, %v2436_v22  ;;  %2554 = vmatpush.msra.mxu2 %v4144_v45 }
 0x722   :  { %2493 = vmatpush.msrb.mxu0 %v2460_v52  ;;  %2555 = vmatpush.msra.mxu2 %v4143_v58 }
 0x724   :  { %2494 = vmatpush.msrb.mxu0 %v2457_v11  ;;  %2556 = vmatpush.msra.mxu2 %v4142_v59  ;;  %v4228_v11 = vld [vmem:[%s7626_s4 + $0x5e8] sm:$0xff]  ;;  %v4227_v59 = vld [vmem:[%s7626_s4 + $0x5e0] sm:$0xff] }
 0x725   :  { %4138 = vmatmul.msk.f32.vlgmr.msrb.gmra.mxu0 %vm2054_vm3, %v4134_v63  ;;  %2557 = vmatmul.f32.vlgmr.msra.gmra.mxu2 %v6595_v39 }
 0x726   :  { %2666 = vmatpush.msra.mxu0 %v4193_v41 }
 0x728   :  { %2667 = vmatpush.msra.mxu0 %v4192_v0  ;;  %v4226_v0 = vld [vmem:[%s7626_s4 + $0x5d8] sm:$0xff] }
 0x72a   :  { %2668 = vmatpush.msra.mxu0 %v4191_v51  ;;  %v4171_v51 = vld [vmem:[%s7627_s5 + $0xa8] sm:$0xff] }
 0x72c   :  { %2669 = vmatpush.msra.mxu0 %v4190_v1  ;;  %v4225_v1 = vld [vmem:[%s7626_s4 + $0x5d0] sm:$0xff] }
 0x72d   :  { %4139 = vmatmul.msk.f32.gmra.mxu0 %vm2054_vm3, %v4135_v60  ;;  %2560 = vmatmul.f32.gmra.mxu2 %v6611_v33  ;;  %v4224_v60 = vld [vmem:[%s7626_s4 + $0x5c8] sm:$0xff] }
 0x72e   :  { %2670 = vmatpush.msra.mxu0 %v4189_v8 }
 0x730   :  { %2671 = vmatpush.msra.mxu0 %v4188_v13  ;;  %v4223_v13 = vld [vmem:[%s7626_s4 + $0x5c0] sm:$0xff] }
 0x732   :  { %2672 = vmatpush.msra.mxu0 %v4187_v32 }
 0x734   :  { %2673 = vmatpush.msra.mxu0 %v4186_v16  ;;  %v4222_v16 = vld [vmem:[%s7626_s4 + $0x5b8] sm:$0xff] }
 0x735   :  { %4140 = vmatmul.msk.f32.gmra.mxu0 %vm2054_vm3, %v4136_v17  ;;  %v4172_v17 = vld [vmem:[%s7627_s5 + $0xb0] sm:$0xff] }
 0x736   :  { %2674 = vmatpush.msra.mxu0 %v4185_v19  ;;  %v4221_v19 = vld [vmem:[%s7626_s4 + $0x5b0] sm:$0xff] }
 0x738   :  { %2675 = vmatpush.msra.mxu0 %v4184_v23  ;;  %v4220_v23 = vld [vmem:[%s7626_s4 + $0x5a8] sm:$0xff] }
 0x73a   :  { %2676 = vmatpush.msra.mxu0 %v4183_v24  ;;  %v4219_v24 = vld [vmem:[%s7626_s4 + $0x5a0] sm:$0xff] }
 0x73c   :  { %2677 = vmatpush.msra.mxu0 %v4182_v25 }
 0x73d   :  { %4141 = vmatmul.msk.f32.gmra.mxu0 %vm2054_vm3, %v4137_v56 }
 0x73e   :  { %2678 = vmatpush.msra.mxu0 %v4181_v12  ;;  %v4218_v12 = vld [vmem:[%s7626_s4 + $0x598] sm:$0xff] }
 0x740   :  { %2679 = vmatpush.msra.mxu0 %v4180_v37 }
 0x742   :  { %2680 = vmatpush.msra.mxu0 %v4179_v2  ;;  %v4173_v2 = vld [vmem:[%s7627_s5 + $0xb8] sm:$0xff] }
 0x744   :  { %2681 = vmatpush.msra.mxu0 %v4178_v34  ;;  %v4217_v34 = vld [vmem:[%s7626_s4 + $0x590] sm:$0xff] }
 0x745   :  { %2682 = vmatmul.f32.vlgmr.msra.gmra.mxu0 %v6595_v39 }
 0x746   :  { %4239 = vmatpush.msk.msrb.mxu0 %vm1920_vm1, %v4238_v26 }
 0x748   :  { %2822 = vmatpush.msrb.mxu0 %v4237_v6  ;;  %v4206_v6 = vld [vmem:[%s7627_s5 + $0xc0] sm:$0xff] }
 0x74a   :  { %2823 = vmatpush.msrb.mxu0 %v4236_v55  ;;  %v4216_v55 = vld [vmem:[%s7626_s4 + $0x588] sm:$0xff] }
 0x74c   :  { %2824 = vmatpush.msrb.mxu0 %v4235_v7  ;;  %v4265_v7 = vld [vmem:[%s7626_s4 + $0x6b8] sm:$0xff] }
 0x74d   :  { %2685 = vmatmul.f32.gmra.mxu0 %v6611_v33 }
 0x74e   :  { %2825 = vmatpush.msrb.mxu0 %v4234_v53  ;;  %v4215_v53 = vld [vmem:[%s7626_s4 + $0x580] sm:$0xff] }
 0x750   :  { %2826 = vmatpush.msrb.mxu0 %v4233_v31  ;;  %v4264_v31 = vld [vmem:[%s7626_s4 + $0x6b0] sm:$0xff] }
 0x752   :  { %2827 = vmatpush.msrb.mxu0 %v4232_v42  ;;  %v4214_v42 = vld [vmem:[%s7626_s4 + $0x578] sm:$0xff] }
 0x754   :  { %2828 = vmatpush.msrb.mxu0 %v4231_v27  ;;  %v4263_v27 = vld [vmem:[%s7626_s4 + $0x6a8] sm:$0xff] }
 0x756   :  { %2829 = vmatpush.msrb.mxu0 %v4230_v36  ;;  %v4262_v36 = vld [vmem:[%s7626_s4 + $0x6a0] sm:$0xff] }
 0x757   :  { %4240 = vmatmul.msk.f32.vlgmr.msrb.gmra.mxu0 %vm1913_vm2, %v6714_v14 }
 0x758   :  { %4275 = vmatpush.msk.msra.mxu0 %vm1920_vm1, %v4274_v62  ;;  %v4207_v62 = vld [vmem:[%s7627_s5 + $0xc8] sm:$0xff]  ;;  %vm3109_vm1 = vmor %vm3108_vm15, %vm3107_vm14  ;;  %vm3179_vm15 = vcmask 517344  }
 0x75a   :  { %2947 = vmatpush.msra.mxu0 %v4273_v38  ;;  %v4261_v38 = vld [vmem:[%s7626_s4 + $0x698] sm:$0xff] }
 0x75c   :  { %2948 = vmatpush.msra.mxu0 %v4272_v61  ;;  %v4260_v61 = vld [vmem:[%s7626_s4 + $0x690] sm:$0xff] }
 0x75e   :  { %2949 = vmatpush.msra.mxu0 %v4271_v35  ;;  %v4259_v35 = vld [vmem:[%s7626_s4 + $0x688] sm:$0xff] }
 0x75f   :  { %4241 = vmatmul.msk.f32.gmra.mxu0 %vm1913_vm2, %v6724_v28 }
 0x760   :  { %2950 = vmatpush.msra.mxu0 %v4270_v4  ;;  %v4258_v4 = vld [vmem:[%s7626_s4 + $0x680] sm:$0xff] }
 0x762   :  { %2951 = vmatpush.msra.mxu0 %v4269_v44  ;;  %v4208_v44 = vld [vmem:[%s7627_s5 + $0xd0] sm:$0xff] }
 0x764   :  { %2952 = vmatpush.msra.mxu0 %v4268_v18  ;;  %v4257_v18 = vld [vmem:[%s7626_s4 + $0x678] sm:$0xff] }
 0x766   :  { %2953 = vmatpush.msra.mxu0 %v4267_v3  ;;  %v4256_v3 = vld [vmem:[%s7626_s4 + $0x670] sm:$0xff] }
 0x768   :  { %2954 = vmatpush.msra.mxu0 %v4266_v5  ;;  %v4255_v5 = vld [vmem:[%s7626_s4 + $0x668] sm:$0xff] }
 0x769   :  { %4276 = vmatmul.msk.f32.vlgmr.msra.gmra.mxu0 %vm1913_vm2, %v6714_v14 }
 0x771   :  { %4277 = vmatmul.msk.f32.gmra.mxu0 %vm1913_vm2, %v6724_v28  ;;  %v2584_v28 = vpop.f32.mrf.mxu1  ;;  %vm3115_vm2 = vcmask 550144  }
 0x779   :  { %v2706_v8 = vpop.f32.mrf.mxu1 }
 0x781   :  { %v2709_v25 = vpop.f32.mrf.mxu1 }
 0x788   :  { %v2371_v20 = vpop.f32.mrf.mxu2 }
 0x789   :  { %v2383_v21 = vadd.f32 %v2371_v20, %v6980_v29  ;;  %v4254_v20 = vld [vmem:[%s7626_s4 + $0x660] sm:$0xff] }
 0x790   :  { %v2374_v43 = vpop.f32.mrf.mxu2 }
 0x791   :  { %v2384_v54 = vadd.f32 %v2374_v43, %v6982_v30  ;;  %v4253_v43 = vld [vmem:[%s7626_s4 + $0x658] sm:$0xff] }
 0x798   :  { %v2377_v40 = vpop.f32.mrf.mxu2 }
 0x799   :  { %v2385_v46 = vadd.f32 %v2377_v40, %v6994_v57  ;;  %v4170_v57 = vld [vmem:[%s7627_s5 + $0xa0] sm:$0xff]  ;;  %v4251_v40 = vld [vmem:[%s7626_s4 + $0x648] sm:$0xff] }
 0x7a0   :  { %v2380_v47 = vpop.f32.mrf.mxu2 }
 0x7a1   :  { %v2386_v48 = vadd.f32 %v2380_v47, %v7012_v15  ;;  %v4229_v15 = vld [vmem:[%s7626_s4 + $0x5f0] sm:$0xff] }
 0x7a2   :  { %v2496_v49 = vpop.f32.mrf.mxu0 }
 0x7a3   :  { %v7188_v9 = vadd.f32 %v2496_v49, %v2383_v21  ;;  %v4209_v21 = vld [vmem:[%s7627_s5 + $0xd8] sm:$0xff] }
 0x7a8   :  { %v2558_v14 = vpop.f32.mrf.mxu2 }
 0x7a9   :  { %v2582_v30 = vadd.f32 %v2581_v50, %v2558_v14 }
 0x7aa   :  { %v2499_v45 = vpop.f32.mrf.mxu0 }
 0x7ab   :  { %v7190_v10 = vadd.f32 %v2499_v45, %v2384_v54  ;;  %v4252_v54 = vld [vmem:[%s7626_s4 + $0x650] sm:$0xff] }
 0x7b0   :  { %v2561_v22 = vpop.f32.mrf.mxu2 }
 0x7b1   :  { %v2585_v29 = vadd.f32 %v2584_v28, %v2561_v22 }
 0x7b2   :  { %v2502_v52 = vpop.f32.mrf.mxu0 }
 0x7b3   :  { %v7192_v58 = vadd.f32 %v2502_v52, %v2385_v46  ;;  %2618 = vmatpush.msrb.mxu3 %v2585_v29  ;;  %v4250_v46 = vld [vmem:[%s7626_s4 + $0x640] sm:$0xff]  ;;  %s4343_s4 = smov 72  }
 0x7b5   :  { %2619 = vmatpush.msrb.mxu3 %v2582_v30 }
 0x7b6   :  { %4174 = vmatmul.msk.f32.vlgmr.msrb.gmra.mxu3 %vm2054_vm3, %v4170_v57 }
 0x7b7   :  { %2791 = vmatpush.msra.mxu3 %v4229_v15 }
 0x7b9   :  { %2792 = vmatpush.msra.mxu3 %v4228_v11 }
 0x7ba   :  { %v2505_v63 = vpop.f32.mrf.mxu0 }
 0x7bb   :  { %v7207_v41 = vadd.f32 %v2505_v63, %v2386_v48  ;;  %2793 = vmatpush.msra.mxu3 %v4227_v59 }
 0x7bd   :  { %2794 = vmatpush.msra.mxu3 %v4226_v0 }
 0x7be   :  { %4175 = vmatmul.msk.f32.gmra.mxu3 %vm2054_vm3, %v4171_v51  ;;  %v4243_v51 = vld [vmem:[%s7627_s5 + $0xe8] sm:$0xff] }
 0x7bf   :  { %2795 = vmatpush.msra.mxu3 %v4225_v1  ;;  %v3012_v1 = vld [vmem:[%s7628_s6] sm:$0xff] }
 0x7c0   :  { %3018 = vperm.xlu1 %4306, %v3012_v1  }
 0x7c1   :  { %2796 = vmatpush.msra.mxu3 %v4224_v60 }
 0x7c2   :  { %v2683_v32 = vpop.f32.mrf.mxu0 }
 0x7c3   :  { %2797 = vmatpush.msra.mxu3 %v4223_v13  ;;  %v2707_v26 = vadd.f32 %v2706_v8, %v2683_v32  ;;  %v4244_v13 = vld [vmem:[%s7627_s5 + $0xf0] sm:$0xff]  ;;  %v3013_v32 = vld [vmem:[%s7628_s6 + $0x8] sm:$0xff] }
 0x7c5   :  { %2798 = vmatpush.msra.mxu3 %v4222_v16  ;;  %v3014_v16 = vld [vmem:[%s7628_s6 + $0x10] sm:$0xff] }
 0x7c6   :  { %4176 = vmatmul.msk.f32.gmra.mxu3 %vm2054_vm3, %v4172_v17  ;;  %3028 = vperm.xlu2 %4307, %v3014_v16   ;;  %v3230_v16 = vld [vmem:[%s7629_s7 + $0x178] sm:$0xff] }
 0x7c7   :  { %2799 = vmatpush.msra.mxu3 %v4221_v19 }
 0x7c8   :  { %3023 = vperm.xlu1 %4306, %v3013_v32   ;;  %v3214_v32 = vld [vmem:[%s7629_s7 + $0xf8] sm:$0xff] }
 0x7c9   :  { %2800 = vmatpush.msra.mxu3 %v4220_v23  ;;  %3296 = vmatpush.msrb.mxu0 %v3214_v32  ;;  %v3252_v32 = vld [vmem:[%s7629_s7 + $0x228] sm:$0xff] }
 0x7ca   :  { %v2686_v56 = vpop.f32.mrf.mxu0 }
 0x7cb   :  { %v2710_v37 = vadd.f32 %v2709_v25, %v2686_v56  ;;  %2801 = vmatpush.msra.mxu3 %v4219_v24  ;;  %v4245_v24 = vld [vmem:[%s7627_s5 + $0xf8] sm:$0xff]  ;;  %v4278_v56 = vld [vmem:[%s7627_s5 + $0x100] sm:$0xff] }
 0x7cd   :  { %2743 = vmatpush.msrb.mxu2 %v2710_v37  ;;  %2802 = vmatpush.msra.mxu3 %v4218_v12  ;;  %v3015_v12 = vld [vmem:[%s7628_s6 + $0x18] sm:$0xff]  ;;  %v4279_v37 = vld [vmem:[%s7627_s5 + $0x108] sm:$0xff]  ;;  %s4342_s6 = smov 36  }
 0x7ce   :  { %4177 = vmatmul.msk.f32.gmra.mxu3 %vm2054_vm3, %v4173_v2  ;;  %3033 = vperm.xlu2 %4307, %v3015_v12   ;;  %v4280_v2 = vld [vmem:[%s7627_s5 + $0x110] sm:$0xff]  ;;  %v3212_v12 = vld [vmem:[%s7629_s7 + $0xe8] sm:$0xff] }
 0x7cf   :  { %2744 = vmatpush.msrb.mxu2 %v2707_v26  ;;  %2803 = vmatpush.msra.mxu3 %v4217_v34  ;;  %v4281_v34 = vld [vmem:[%s7627_s5 + $0x118] sm:$0xff] }
 0x7d0   :  { %4210 = vmatmul.msk.f32.vlgmr.msrb.gmra.mxu2 %vm2054_vm3, %v4206_v6 }
 0x7d1   :  { %2804 = vmatpush.msra.mxu3 %v4216_v55  ;;  %2916 = vmatpush.msra.mxu2 %v4265_v7 }
 0x7d3   :  { %2805 = vmatpush.msra.mxu3 %v4215_v53  ;;  %2917 = vmatpush.msra.mxu2 %v4264_v31 }
 0x7d4   :  { %v2831_v30 = vpop.f32.mrf.mxu0 }
 0x7d5   :  { %2806 = vmatpush.msra.mxu3 %v4214_v42  ;;  %2918 = vmatpush.msra.mxu2 %v4263_v27 }
 0x7d6   :  { %2807 = vmatmul.f32.vlgmr.msra.gmra.mxu3 %v6595_v39 }
 0x7d7   :  { %2919 = vmatpush.msra.mxu2 %v4262_v36 }
 0x7d8   :  { %4211 = vmatmul.msk.f32.gmra.mxu2 %vm2054_vm3, %v4207_v62 }
 0x7d9   :  { %2920 = vmatpush.msra.mxu2 %v4261_v38 }
 0x7db   :  { %2921 = vmatpush.msra.mxu2 %v4260_v61 }
 0x7dc   :  { %v2834_v11 = vpop.f32.mrf.mxu0 }
 0x7dd   :  { %2922 = vmatpush.msra.mxu2 %v4259_v35 }
 0x7de   :  { %2810 = vmatmul.f32.gmra.mxu3 %v6611_v33 }
 0x7df   :  { %2923 = vmatpush.msra.mxu2 %v4258_v4 }
 0x7e0   :  { %4212 = vmatmul.msk.f32.gmra.mxu2 %vm2054_vm3, %v4208_v44 }
 0x7e1   :  { %2924 = vmatpush.msra.mxu2 %v4257_v18 }
 0x7e3   :  { %2925 = vmatpush.msra.mxu2 %v4256_v3 }
 0x7e5   :  { %2926 = vmatpush.msra.mxu2 %v4255_v5 }
 0x7e6   :  { %v2956_v60 = vpop.f32.mrf.mxu0 }
 0x7e7   :  { %2927 = vmatpush.msra.mxu2 %v4254_v20 }
 0x7e8   :  { %4213 = vmatmul.msk.f32.gmra.mxu2 %vm2054_vm3, %v4209_v21 }
 0x7e9   :  { %2928 = vmatpush.msra.mxu2 %v4253_v43 }
 0x7eb   :  { %2929 = vmatpush.msra.mxu2 %v4252_v54 }
 0x7ed   :  { %2930 = vmatpush.msra.mxu2 %v4251_v40 }
 0x7ee   :  { %v2959_v17 = vpop.f32.mrf.mxu0 }
 0x7ef   :  { %2931 = vmatpush.msra.mxu2 %v4250_v46 }
 0x7f0   :  { %2932 = vmatmul.f32.vlgmr.msra.gmra.mxu2 %v6595_v39 }
 0x7f1   :  { %3316 = vmatpush.msrb.mxu2 %v3230_v16 }
 0x7f8   :  { %2935 = vmatmul.f32.gmra.mxu2 %v6611_v33 }
 0x820   :  { %v3029_v43 = vpop.permute.xlu2 %3028 }
 0x832   :  { %v3019_v7 = vpop.permute.xlu1 %3018 }
 0x839   :  { %v2621_v47 = vpop.f32.mrf.mxu3 }
 0x83a   :  { %v2633_v48 = vadd.f32 %v2621_v47, %v7188_v9  ;;  %v3024_v61 = vpop.permute.xlu1 %3023 }
 0x841   :  { %v2624_v49 = vpop.f32.mrf.mxu3 }
 0x842   :  { %v2634_v50 = vadd.f32 %v2624_v49, %v7190_v10  ;;  %v4242_v10 = vld [vmem:[%s7627_s5 + $0xe0] sm:$0xff]  ;;  %s4341_s5 = smov 16  }
 0x849   :  { %v2627_v14 = vpop.f32.mrf.mxu3 }
 0x84a   :  { %v2635_v45 = vadd.f32 %v2627_v14, %v7192_v58 }
 0x851   :  { %v2630_v28 = vpop.f32.mrf.mxu3 }
 0x852   :  { %v2636_v22 = vadd.f32 %v2630_v28, %v7207_v41 }
 0x853   :  { %v2746_v29 = vpop.f32.mrf.mxu2 }
 0x854   :  { %v2758_v52 = vadd.f32 %v2746_v29, %v2633_v48 }
 0x859   :  { %v2808_v57 = vpop.f32.mrf.mxu3 }
 0x85a   :  { %v2832_v9 = vadd.f32 %v2831_v30, %v2808_v57 }
 0x85b   :  { %v2749_v15 = vpop.f32.mrf.mxu2 }
 0x85c   :  { %v2759_v39 = vadd.f32 %v2749_v15, %v2634_v50 }
 0x861   :  { %v2811_v33 = vpop.f32.mrf.mxu3 }
 0x862   :  { %v2835_v59 = vadd.f32 %v2834_v11, %v2811_v33 }
 0x863   :  { %v2752_v63 = vpop.f32.mrf.mxu2 }
 0x864   :  { %v2760_v0 = vadd.f32 %v2752_v63, %v2635_v45  ;;  %2868 = vmatpush.msra.mxu1 %v2835_v59 }
 0x866   :  { %2869 = vmatpush.msra.mxu1 %v2832_v9 }
 0x867   :  { %4246 = vmatmul.msk.f32.vlgmr.msra.gmra.mxu1 %vm2054_vm3, %v4242_v10 }
 0x86b   :  { %v2755_v58 = vpop.f32.mrf.mxu2 }
 0x86c   :  { %v7336_v41 = vadd.f32 %v2755_v58, %v2636_v22  ;;  %v3034_v22 = vpop.permute.xlu2 %3033 }
 0x86f   :  { %4247 = vmatmul.msk.f32.gmra.mxu1 %vm2054_vm3, %v4243_v51  ;;  %v3197_v51 = vld [vmem:[%s7629_s7 + $0x70] sm:$0xff] }
 0x873   :  { %v2933_v8 = vpop.f32.mrf.mxu2 }
 0x874   :  { %v2957_v25 = vadd.f32 %v2956_v60, %v2933_v8  ;;  %v3196_v60 = vld [vmem:[%s7629_s7 + $0x68] sm:$0xff] }
 0x877   :  { %4248 = vmatmul.msk.f32.gmra.mxu1 %vm2054_vm3, %v4244_v13  ;;  %v3195_v13 = vld [vmem:[%s7629_s7 + $0x60] sm:$0xff] }
 0x87b   :  { %v2936_v19 = vpop.f32.mrf.mxu2 }
 0x87c   :  { %v2960_v23 = vadd.f32 %v2959_v17, %v2936_v19  ;;  %v3246_v17 = vld [vmem:[%s7629_s7 + $0x1f8] sm:$0xff] }
 0x87d   :  { %v3194_v19 = vld [vmem:[%s7629_s7 + $0x58] sm:$0xff] }
 0x87e   :  { %2993 = vmatpush.msrb.mxu3 %v2960_v23  ;;  %v3213_v23 = vld [vmem:[%s7629_s7 + $0xf0] sm:$0xff] }
 0x87f   :  { %4249 = vmatmul.msk.f32.gmra.mxu1 %vm2054_vm3, %v4245_v24  ;;  %v3229_v24 = vld [vmem:[%s7629_s7 + $0x170] sm:$0xff]  ;;  %3297 = vmatpush.msrb.mxu0 %v3213_v23 }
 0x880   :  { %2994 = vmatpush.msrb.mxu3 %v2957_v25  ;;  %v3245_v25 = vld [vmem:[%s7629_s7 + $0x1f0] sm:$0xff]  ;;  %3317 = vmatpush.msrb.mxu2 %v3229_v24  ;;  %v3231_v24 = vld [vmem:[%s7629_s7 + $0x180] sm:$0xff] }
 0x881   :  { %4282 = vmatmul.msk.f32.vlgmr.msrb.gmra.mxu3 %vm2054_vm3, %v4278_v56  ;;  %v3193_v56 = vld [vmem:[%s7629_s7 + $0x50] sm:$0xff]  ;;  %3298 = vmatpush.msrb.mxu0 %v3212_v12  ;;  %v3250_v12 = vld [vmem:[%s7629_s7 + $0x218] sm:$0xff] }
 0x882   :  { %3336 = vmatpush.msra.mxu3 %v3246_v17  ;;  %v3199_v17 = vld [vmem:[%s7629_s7 + $0x80] sm:$0xff] }
 0x884   :  { %3337 = vmatpush.msra.mxu3 %v3245_v25  ;;  %v3251_v25 = vld [vmem:[%s7629_s7 + $0x220] sm:$0xff] }
 0x889   :  { %4283 = vmatmul.msk.f32.gmra.mxu3 %vm2054_vm3, %v4279_v37  ;;  %v3228_v37 = vld [vmem:[%s7629_s7 + $0x168] sm:$0xff] }
 0x88a   :  { %3318 = vmatpush.msrb.mxu2 %v3228_v37  ;;  %v3249_v37 = vld [vmem:[%s7629_s7 + $0x210] sm:$0xff] }
 0x891   :  { %4284 = vmatmul.msk.f32.gmra.mxu3 %vm2054_vm3, %v4280_v2  ;;  %v3244_v2 = vld [vmem:[%s7629_s7 + $0x1e8] sm:$0xff] }
 0x892   :  { %3338 = vmatpush.msra.mxu3 %v3244_v2  ;;  %v3248_v2 = vld [vmem:[%s7629_s7 + $0x208] sm:$0xff] }
 0x899   :  { %4285 = vmatmul.msk.f32.gmra.mxu3 %vm2054_vm3, %v4281_v34  ;;  %v3192_v34 = vld [vmem:[%s7629_s7 + $0x48] sm:$0xff]  ;;  %vm3123_vm3 = vcmask 845344  }
 0x8e4   :  { %v2871_v26 = vpop.f32.mrf.mxu1 }
 0x8e5   :  { %v2883_v6 = vadd.f32 %v2871_v26, %v2758_v52 }
 0x8ec   :  { %v2874_v42 = vpop.f32.mrf.mxu1 }
 0x8ed   :  { %v2884_v36 = vadd.f32 %v2874_v42, %v2759_v39  ;;  %v3226_v42 = vld [vmem:[%s7629_s7 + $0x158] sm:$0xff] }
 0x8f4   :  { %v2877_v18 = vpop.f32.mrf.mxu1 }
 0x8f5   :  { %v2885_v5 = vadd.f32 %v2877_v18, %v2760_v0  ;;  %v3240_v18 = vld [vmem:[%s7629_s7 + $0x1c8] sm:$0xff] }
 0x8fc   :  { %v2880_v50 = vpop.f32.mrf.mxu1 }
 0x8fd   :  { %v2886_v45 = vadd.f32 %v2880_v50, %v7336_v41  ;;  %v3198_v41 = vld [vmem:[%s7629_s7 + $0x78] sm:$0xff] }
 0x8fe   :  { %3276 = vmatpush.msrb.mxu1 %v3198_v41  ;;  %v3186_v50 = vld [vmem:[%s7629_s7 + $0x18] sm:$0xff]  ;;  %v3217_v41 = vld [vmem:[%s7629_s7 + $0x110] sm:$0xff] }
 0x900   :  { %3277 = vmatpush.msrb.mxu1 %v3197_v51  ;;  %v3233_v51 = vld [vmem:[%s7629_s7 + $0x190] sm:$0xff] }
 0x902   :  { %3278 = vmatpush.msrb.mxu1 %v3196_v60  ;;  %v3200_v60 = vld [vmem:[%s7629_s7 + $0x88] sm:$0xff] }
 0x904   :  { %v2996_v55 = vpop.f32.mrf.mxu3  ;;  %3279 = vmatpush.msrb.mxu1 %v3195_v13  ;;  %v3232_v13 = vld [vmem:[%s7629_s7 + $0x188] sm:$0xff] }
 0x905   :  { %v3008_v53 = vadd.f32 %v2996_v55, %v2883_v6  ;;  %v3211_v6 = vld [vmem:[%s7629_s7 + $0xe0] sm:$0xff] }
 0x906   :  { %3280 = vmatpush.msrb.mxu1 %v3194_v19  ;;  %v3227_v55 = vld [vmem:[%s7629_s7 + $0x160] sm:$0xff]  ;;  %3299 = vmatpush.msrb.mxu0 %v3211_v6 }
 0x907   :  { %v3036_v31 = vadd.f32 %v3019_v7, %v3008_v53  ;;  %v3243_v7 = vld [vmem:[%s7629_s7 + $0x1e0] sm:$0xff]  ;;  %3319 = vmatpush.msrb.mxu2 %v3227_v55 }
 0x908   :  { %3281 = vmatpush.msrb.mxu1 %v3193_v56  ;;  %v3191_v53 = vld [vmem:[%s7629_s7 + $0x40] sm:$0xff]  ;;  %3339 = vmatpush.msra.mxu3 %v3243_v7 }
 0x909   :  { %v3040_v27 = vmax.f32 %v3036_v31, 0.0  ;;  %v3210_v31 = vld [vmem:[%s7629_s7 + $0xd8] sm:$0xff]  ;;  %3320 = vmatpush.msrb.mxu2 %v3226_v42  ;;  %v3215_v19 = vld [vmem:[%s7629_s7 + $0x100] sm:$0xff] }
 0x90a   :  { %3282 = vmatpush.msrb.mxu1 %v3192_v34  ;;  %3300 = vmatpush.msrb.mxu0 %v3210_v31  ;;  %v3247_v55 = vld [vmem:[%s7629_s7 + $0x200] sm:$0xff] }
 0x90b   :  { %3047 = vst.sshfl [vmem:[#allocation1] sm:$0xff pattern:$0x73625140] %v3040_v27 }
 0x90c   :  { %v2999_v62 = vpop.f32.mrf.mxu3  ;;  %3045 = vst.msk [vmem:[#allocation2] sm:$0x3] %vm3044_vm4, %v3040_v27  ;;  %3283 = vmatpush.msrb.mxu1 %v3191_v53  ;;  %vm3134_vm4 = vcmask 1042240  }
 0x90d   :  { %v3009_v38 = vadd.f32 %v2999_v62, %v2884_v36  ;;  %v3190_v36 = vld [vmem:[%s7629_s7 + $0x38] sm:$0xff]  ;;  %v3209_v62 = vld [vmem:[%s7629_s7 + $0xd0] sm:$0xff] }
 0x90e   :  { %3284 = vmatpush.msrb.mxu1 %v3190_v36  ;;  %3301 = vmatpush.msrb.mxu0 %v3209_v62 }
 0x90f   :  { %v3037_v35 = vadd.f32 %v3024_v61, %v3009_v38  ;;  %v3225_v38 = vld [vmem:[%s7629_s7 + $0x150] sm:$0xff] }
 0x910   :  { %v3241_v61 = vld [vmem:[%s7629_s7 + $0x1d0] sm:$0xff]  ;;  %3321 = vmatpush.msrb.mxu2 %v3225_v38 }
 0x911   :  { %v3041_v4 = vmax.f32 %v3037_v35, 0.0  ;;  %v3189_v35 = vld [vmem:[%s7629_s7 + $0x30] sm:$0xff] }
 0x912   :  { %v3049_v44 = vld [vmem:[#allocation1 + $0x1] ss:$4 sm:$0xff]  ;;  %3285 = vmatpush.msrb.mxu1 %v3189_v35 }
 0x913   :  { %3055 = vst.sshfl [vmem:[#allocation1] sm:$0xff pattern:$0x73625140] %v3040_v27  ;;  %3077 = vrot.lane.b32.xlu0 %v3041_v4, %s4341_s5  ;;  %3050 = vrot.lane.b32.xlu1 %v3049_v44, %s4342_s6  ;;  %v3224_v44 = vld [vmem:[%s7629_s7 + $0x148] sm:$0xff] }
 0x914   :  { %v3002_v3 = vpop.f32.mrf.mxu3  ;;  %3322 = vmatpush.msrb.mxu2 %v3224_v44  ;;  %v3380_v44 = vld [vmem:[%s7631_s9 + $0x18] sm:$0xff] }
 0x915   :  { %v3010_v20 = vadd.f32 %v3002_v3, %v2885_v5  ;;  %v3188_v3 = vld [vmem:[%s7629_s7 + $0x28] sm:$0xff] }
 0x916   :  { %3286 = vmatpush.msrb.mxu1 %v3188_v3  ;;  %v3378_v3 = vld [vmem:[%s7631_s9 + $0x8] sm:$0xff] }
 0x917   :  { %v3038_v54 = vadd.f32 %v3029_v43, %v3010_v20  ;;  %v3223_v43 = vld [vmem:[%s7629_s7 + $0x140] sm:$0xff] }
 0x918   :  { %3323 = vmatpush.msrb.mxu2 %v3223_v43 }
 0x919   :  { %v3042_v40 = vmax.f32 %v3038_v54, 0.0  ;;  %v3239_v54 = vld [vmem:[%s7629_s7 + $0x1c0] sm:$0xff] }
 0x91a   :  { %v3057_v21 = vld [vmem:[#allocation1 + $0x2] ss:$4 sm:$0xff] }
 0x91b   :  { %3063 = vst.sshfl [vmem:[#allocation1] sm:$0xff pattern:$0x73625140] %v3040_v27  ;;  %3058 = vrot.lane.b32.xlu2 %v3057_v21, %s4343_s4  ;;  %v3242_v27 = vld [vmem:[%s7629_s7 + $0x1d8] sm:$0xff]  ;;  %v3207_v21 = vld [vmem:[%s7629_s7 + $0xc0] sm:$0xff] }
 0x91c   :  { %v3005_v14 = vpop.f32.mrf.mxu3  ;;  %3340 = vmatpush.msra.mxu3 %v3242_v27 }
 0x91d   :  { %v3011_v28 = vadd.f32 %v3005_v14, %v2886_v45  ;;  %v3205_v14 = vld [vmem:[%s7629_s7 + $0xb0] sm:$0xff] }
 0x91e   :  { %3341 = vmatpush.msra.mxu3 %v3241_v61  ;;  %v3221_v45 = vld [vmem:[%s7629_s7 + $0x130] sm:$0xff] }
 0x91f   :  { %v3039_v52 = vadd.f32 %v3034_v22, %v3011_v28  ;;  %v3237_v28 = vld [vmem:[%s7629_s7 + $0x1b0] sm:$0xff] }
 0x920   :  { %3342 = vmatpush.msra.mxu3 %v3240_v18  ;;  %v3185_v22 = vld [vmem:[%s7629_s7 + $0x10] sm:$0xff] }
 0x921   :  { %v3043_v30 = vmax.f32 %v3039_v52, 0.0  ;;  %v3204_v52 = vld [vmem:[%s7629_s7 + $0xa8] sm:$0xff]  ;;  %v3379_v18 = vld [vmem:[%s7631_s9 + $0x10] sm:$0xff] }
 0x922   :  { %v3065_v46 = vld [vmem:[#allocation1 + $0x3] ss:$4 sm:$0xff]  ;;  %3343 = vmatpush.msra.mxu3 %v3239_v54 }
 0x923   :  { %3082 = vst.sshfl [vmem:[#allocation1] sm:$0xff pattern:$0x73625140] %v3041_v4  ;;  %3112 = vrot.lane.b32.xlu2 %v3042_v40, %s4344_s18  ;;  %3066 = vrot.lane.b32.xlu0 %v3065_v46, %s4345_s19  ;;  %v3187_v46 = vld [vmem:[%s7629_s7 + $0x20] sm:$0xff] }
 0x924   :  { %3287 = vmatpush.msrb.mxu1 %v3187_v46 }
 0x926   :  { %3288 = vmatpush.msrb.mxu1 %v3186_v50 }
 0x928   :  { %3289 = vmatpush.msrb.mxu1 %v3185_v22 }
 0x92a   :  { %v3084_v47 = vld [vmem:[#allocation1 + $0x1] ss:$4 sm:$0xff] }
 0x92b   :  { %3090 = vst.sshfl [vmem:[#allocation1] sm:$0xff pattern:$0x73625140] %v3041_v4  ;;  %3085 = vrot.lane.b32.xlu2 %v3084_v47, %s4346_s20  ;;  %v3206_v47 = vld [vmem:[%s7629_s7 + $0xb8] sm:$0xff] }
 0x932   :  { %v3092_v48 = vld [vmem:[#allocation1 + $0x2] ss:$4 sm:$0xff] }
 0x933   :  { %3093 = vrot.lane.b32.xlu0 %v3092_v48, %s4347_s21  ;;  %3098 = vst.sshfl [vmem:[#allocation1] sm:$0xff pattern:$0x73625140] %v3041_v4  ;;  %v3208_v4 = vld [vmem:[%s7629_s7 + $0xc8] sm:$0xff]  ;;  %v3222_v48 = vld [vmem:[%s7629_s7 + $0x138] sm:$0xff] }
 0x934   :  { %3302 = vmatpush.msrb.mxu0 %v3208_v4  ;;  %3324 = vmatpush.msrb.mxu2 %v3222_v48 }
 0x936   :  { %3303 = vmatpush.msrb.mxu0 %v3207_v21  ;;  %3325 = vmatpush.msrb.mxu2 %v3221_v45 }
 0x938   :  { %3304 = vmatpush.msrb.mxu0 %v3206_v47 }
 0x93a   :  { %v3100_v49 = vld [vmem:[#allocation1 + $0x3] ss:$4 sm:$0xff]  ;;  %3305 = vmatpush.msrb.mxu0 %v3205_v14 }
 0x93b   :  { %3101 = vrot.lane.b32.xlu1 %v3100_v49, %s4348_s22  ;;  %3117 = vst.sshfl [vmem:[#allocation1] sm:$0xff pattern:$0x73625140] %v3042_v40  ;;  %v3238_v49 = vld [vmem:[%s7629_s7 + $0x1b8] sm:$0xff] }
 0x93c   :  { %3344 = vmatpush.msra.mxu3 %v3238_v49  ;;  %3306 = vmatpush.msrb.mxu0 %v3204_v52 }
 0x93e   :  { %3345 = vmatpush.msra.mxu3 %v3237_v28  ;;  %v4309_v28 = vld [vmem:[%s7632_s10] ss:$0 sm:$0xff] }
 0x942   :  { %v3119_v29 = vld [vmem:[#allocation1 + $0x1] ss:$4 sm:$0xff] }
 0x943   :  { %3120 = vrot.lane.b32.xlu0 %v3119_v29, %s4349_s23  ;;  %3125 = vst.sshfl [vmem:[#allocation1] sm:$0xff pattern:$0x73625140] %v3042_v40 }
 0x94a   :  { %v3127_v57 = vld [vmem:[#allocation1 + $0x2] ss:$4 sm:$0xff] }
 0x94b   :  { %3147 = vrot.lane.b32.xlu0 %v3043_v30, %s4350_s24  ;;  %3128 = vrot.lane.b32.xlu1 %v3127_v57, %s4351_s0  ;;  %3138 = vst.sshfl [vmem:[#allocation1] sm:$0xff pattern:$0x73625140] %v3042_v40  ;;  %v3236_v57 = vld [vmem:[%s7629_s7 + $0x1a8] sm:$0xff] }
 0x94c   :  { %3346 = vmatpush.msra.mxu3 %v3236_v57 }
 0x952   :  { %v3140_v15 = vld [vmem:[#allocation1 + $0x3] ss:$4 sm:$0xff] }
 0x953   :  { %3141 = vrot.lane.b32.xlu1 %v3140_v15, %s4352_s25  ;;  %3152 = vst.sshfl [vmem:[#allocation1] sm:$0xff pattern:$0x73625140] %v3043_v30  ;;  %v3184_v15 = vld [vmem:[%s7629_s7 + $0x8] sm:$0xff] }
 0x954   :  { %3290 = vmatpush.msrb.mxu1 %v3184_v15 }
 0x95a   :  { %v3154_v39 = vld [vmem:[#allocation1 + $0x1] ss:$4 sm:$0xff] }
 0x95b   :  { %3155 = vrot.lane.b32.xlu1 %v3154_v39, %s4353_s26  ;;  %3160 = vst.sshfl [vmem:[#allocation1] sm:$0xff pattern:$0x73625140] %v3043_v30  ;;  %v3203_v39 = vld [vmem:[%s7629_s7 + $0xa0] sm:$0xff] }
 0x95c   :  { %3307 = vmatpush.msrb.mxu0 %v3203_v39 }
 0x962   :  { %v3162_v11 = vld [vmem:[#allocation1 + $0x2] ss:$4 sm:$0xff] }
 0x963   :  { %3163 = vrot.lane.b32.xlu2 %v3162_v11, %s4354_s27  ;;  %3173 = vst.sshfl [vmem:[#allocation1] sm:$0xff pattern:$0x73625140] %v3043_v30  ;;  %v3220_v30 = vld [vmem:[%s7629_s7 + $0x128] sm:$0xff]  ;;  %v3219_v11 = vld [vmem:[%s7629_s7 + $0x120] sm:$0xff]  ;;  %s4356_s27 = smov [#allocation3]  }
 0x964   :  { %3326 = vmatpush.msrb.mxu2 %v3220_v30 }
 0x966   :  { %3327 = vmatpush.msrb.mxu2 %v3219_v11 }
 0x96a   :  { %v3175_v33 = vld [vmem:[#allocation1 + $0x3] ss:$4 sm:$0xff] }
 0x96b   :  { %3176 = vrot.lane.b32.xlu2 %v3175_v33, %s4355_s28  ;;  %v3235_v33 = vld [vmem:[%s7629_s7 + $0x1a0] sm:$0xff]  ;;  %s3416_s28 = sshll.u32 %s4356_s27, 4  ;;  %s3417_s28 = int_to_ptr.vmem [resolvable:$true] %s3416_s28 }
 0x96c   :  { %3347 = vmatpush.msra.mxu3 %v3235_v33 }
 0x975   :  { %v3059_v63 = vpop.permute.xlu2 %3058 }
 0x97d   :  { %v7379_v0 = vpop.permute.xlu2 %3112 }
 0x985   :  { %v3051_v59 = vpop.permute.xlu1 %3050  ;;  %v3078_v9 = vpop.permute.xlu0 %3077 }
 0x986   :  { %3054 = vst.msk [vmem:[#allocation2] sm:$0x3] %vm3053_vm5, %v3051_v59  ;;  %v3086_v8 = vpop.permute.xlu2 %3085  ;;  %v3183_v59 = vld [vmem:[%s7629_s7] sm:$0xff]  ;;  %vm3135_vm5 = vcmask 93186  }
 0x987   :  { %3062 = vst.msk [vmem:[#allocation2] sm:$0x3] %vm3061_vm6, %v3059_v63  ;;  %v3202_v63 = vld [vmem:[%s7629_s7 + $0x98] sm:$0xff]  ;;  %3291 = vmatpush.msrb.mxu1 %v3183_v59  ;;  %vm3131_vm6 = vcmask 850944   ;;  %vm3136_vm7 = vmor %vm3135_vm5, %vm3134_vm4 }
 0x988   :  { %3308 = vmatpush.msrb.mxu0 %v3202_v63 }
 0x995   :  { %v3067_v10 = vpop.permute.xlu0 %3066 }
 0x996   :  { %v3068_v58 = vrot.slane %v3067_v10, 6 }
 0x998   :  { %v3070_v1 = vsel %vm3069_vm9, %v3068_v58, %v3067_v10  ;;  %v3254_v10 = vld [vmem:[%s7629_s7 + $0x238] sm:$0xff]  ;;  %v3201_v58 = vld [vmem:[%s7629_s7 + $0x90] sm:$0xff]  ;;  %vm3150_vm9 = vcmask 681344  }
 0x999   :  { %3075 = vst.msk [vmem:[#allocation2] sm:$0xf] %vm3074_vm10, %v3070_v1  ;;  %v3253_v1 = vld [vmem:[%s7629_s7 + $0x230] sm:$0xff]  ;;  %3364 = vmatpush.msra.mxu1 %v3254_v10  ;;  %3309 = vmatpush.msrb.mxu0 %v3201_v58  ;;  %vm3169_vm10 = vcmask 1042368  }
 0x99a   :  { %3081 = vst.msk [vmem:[#allocation2 + $0x2] sm:$0x3] %vm3080_vm11, %v3078_v9  ;;  %v3218_v9 = vld [vmem:[%s7629_s7 + $0x118] sm:$0xff]  ;;  %vm3170_vm11 = vcmask 224258  }
 0x99b   :  { %3089 = vst.msk [vmem:[#allocation2 + $0x2] sm:$0x3] %vm3088_vm12, %v3086_v8  ;;  %3328 = vmatpush.msrb.mxu2 %v3218_v9  ;;  %v3216_v8 = vld [vmem:[%s7629_s7 + $0x108] sm:$0xff]  ;;  %3365 = vmatpush.msra.mxu1 %v3253_v1  ;;  %vm3166_vm12 = vcmask 982016   ;;  %vm3171_vm14 = vmor %vm3170_vm11, %vm3169_vm10 }
 0x99c   :  { %3310 = vmatpush.msrb.mxu0 %v3200_v60 }
 0x99d   :  { %3329 = vmatpush.msrb.mxu2 %v3217_v41  ;;  %3366 = vmatpush.msra.mxu1 %v3252_v32 }
 0x99e   :  { %3311 = vmatpush.msrb.mxu0 %v3199_v17 }
 0x99f   :  { %3330 = vmatpush.msrb.mxu2 %v3216_v8  ;;  %3367 = vmatpush.msra.mxu1 %v3251_v25 }
 0x9a0   :  { %3401 = vmatpush.msra.mxu0 %v3380_v44 }
 0x9a1   :  { %3331 = vmatpush.msrb.mxu2 %v3215_v19  ;;  %3368 = vmatpush.msra.mxu1 %v3250_v12 }
 0x9a2   :  { %3402 = vmatpush.msra.mxu0 %v3379_v18 }
 0x9a3   :  { %3369 = vmatpush.msra.mxu1 %v3249_v37 }
 0x9a4   :  { %3403 = vmatpush.msra.mxu0 %v3378_v3 }
 0x9a5   :  { %v3094_v26 = vpop.permute.xlu0 %3093  ;;  %3370 = vmatpush.msra.mxu1 %v3248_v2 }
 0x9a6   :  { %3097 = vst.msk [vmem:[#allocation2 + $0x2] sm:$0x3] %vm3096_vm13, %v3094_v26  ;;  %vm3158_vm13 = vcmask 976544  }
 0x9a7   :  { %3371 = vmatpush.msra.mxu1 %v3247_v55 }
 0x9ad   :  { %v3102_v5 = vpop.permute.xlu1 %3101 }
 0x9ae   :  { %v3103_v20 = vrot.slane %v3102_v5, 6 }
 0x9b0   :  { %v3105_v40 = vsel %vm3104_vm0, %v3103_v20, %v3102_v5  ;;  %vm3273_vm0 = vcmask 523264   ;;  %v3377_v5 = vld [vmem:[%s7631_s9] sm:$0xff] }
 0x9b1   :  { %3110 = vst.msk [vmem:[#allocation2 + $0x2] sm:$0xf] %vm3109_vm1, %v3105_v40  ;;  %3404 = vmatpush.msra.mxu0 %v3377_v5  ;;  %v4308_v20 = vld [vmem:[%s7630_s8] ss:$0 sm:$0xff]  ;;  %vm3385_vm1 = vcmask 261120  }
 0x9b2   :  { %3116 = vst.msk [vmem:[#allocation2 + $0x4] sm:$0x3] %vm3115_vm2, %v7379_v0  ;;  %v3234_v0 = vld [vmem:[%s7629_s7 + $0x198] sm:$0xff]  ;;  %vm3409_vm2 = vcmask 25600  }
 0x9b3   :  { %3348 = vmatpush.msra.mxu3 %v3234_v0 }
 0x9b5   :  { %v3121_v29 = vpop.permute.xlu0 %3120  ;;  %3349 = vmatpush.msra.mxu3 %v3233_v51 }
 0x9b6   :  { %3124 = vst.msk [vmem:[#allocation2 + $0x4] sm:$0x3] %vm3123_vm3, %v3121_v29 }
 0x9b7   :  { %3350 = vmatpush.msra.mxu3 %v3232_v13 }
 0x9b9   :  { %3351 = vmatpush.msra.mxu3 %v3231_v24 }
 0x9bd   :  { %v3129_v16 = vpop.permute.xlu1 %3128  ;;  %v3164_v34 = vpop.permute.xlu2 %3163 }
 0x9be   :  { %v3130_v23 = vrot.slane %v3129_v16, 6  ;;  %v3148_v6 = vpop.permute.xlu0 %3147  ;;  %v3165_v7 = vrot.slane %v3164_v34, 6 }
 0x9c0   :  { %v3132_v56 = vsel %vm3131_vm6, %v3130_v23, %v3129_v16  ;;  %v3167_v31 = vsel %vm3166_vm12, %v3165_v7, %v3164_v34 }
 0x9c1   :  { %3137 = vst.msk [vmem:[#allocation2 + $0x4] sm:$0xf] %vm3136_vm7, %v3132_v56 }
 0x9c5   :  { %v3142_v26 = vpop.permute.xlu1 %3141  ;;  %v3177_v42 = vpop.permute.xlu2 %3176 }
 0x9c6   :  { %3145 = vst.msk [vmem:[#allocation2 + $0x6] sm:$0x3] %vm3144_vm8, %v3142_v26 }
 0x9c7   :  { %3151 = vst.msk [vmem:[#allocation2 + $0x6] sm:$0x3] %vm3150_vm9, %v3148_v6 }
 0x9cd   :  { %v3156_v53 = vpop.permute.xlu1 %3155 }
 0x9ce   :  { %3159 = vst.msk [vmem:[#allocation2 + $0x6] sm:$0x3] %vm3158_vm13, %v3156_v53 }
 0x9cf   :  { %3172 = vst.msk [vmem:[#allocation2 + $0x6] sm:$0xf] %vm3171_vm14, %v3167_v31 }
 0x9d0   :  { %3180 = vst.msk [vmem:[#allocation2 + $0x8] sm:$0x3] %vm3179_vm15, %v3177_v42 }
 0x9d6   :  { %v3181_v27 = vld [vmem:[#allocation2] sm:$0xff] }
 0x9d7   :  { %v3182_v36 = vld [vmem:[#allocation2 + $0x8] sm:$0x3]  ;;  %3261 = vst [vmem:[#allocation1] ss:$4 sm:$0xff] %v3181_v27 }
 0x9d8   :  { %3263 = vst [vmem:[#allocation1 + $0x20] ss:$4 sm:$0xff] %v3182_v36 }
 0x9de   :  { %v3264_v62 = vld.sshfl [vmem:[#allocation1] sm:$0xff pattern:$0x73625140]  ;;  %v3265_v38 = vld.sshfl [vmem:[#allocation1 + $0x8] sm:$0xff pattern:$0x73625140] }
 0x9df   :  { %3292 = vmatmul.f32.vlgmr.msrb.gmra.mxu1 %v3264_v62  ;;  %3312 = vmatmul.f32.vlgmr.msrb.gmra.mxu0 %v3265_v38  ;;  %v3266_v61 = vld.sshfl [vmem:[#allocation1 + $0x10] sm:$0xff pattern:$0x73625140]  ;;  %v3267_v35 = vld.sshfl [vmem:[#allocation1 + $0x18] sm:$0xff pattern:$0x73625140] }
 0x9e0   :  { %3332 = vmatmul.f32.vlgmr.msrb.gmra.mxu2 %v3266_v61  ;;  %3352 = vmatmul.f32.vlgmr.msra.gmra.mxu3 %v3267_v35  ;;  %v3268_v4 = vld.sshfl [vmem:[#allocation1 + $0x20] sm:$0xff pattern:$0x73625140] }
 0x9e7   :  { %4286 = vmatmul.msk.f32.vlgmr.msra.gmra.mxu1 %vm3273_vm0, %v3268_v4 }
 0xa5c   :  { %v3293_v21 = vpop.f32.mrf.mxu1  ;;  %v3313_v54 = vpop.f32.mrf.mxu0 }
 0xa5d   :  { %v3294_v43 = vadd.f32 %v4308_v20, %v3293_v21 }
 0xa5f   :  { %v3314_v40 = vadd.f32 %v3313_v54, %v3294_v43 }
 0xa63   :  { %v3333_v46 = vpop.f32.mrf.mxu2  ;;  %v3353_v48 = vpop.f32.mrf.mxu3 }
 0xa64   :  { %v3334_v47 = vadd.f32 %v3333_v46, %v3314_v40  ;;  %v3373_v50 = vpop.f32.mrf.mxu1 }
 0xa66   :  { %v3354_v49 = vadd.f32 %v3353_v48, %v3334_v47 }
 0xa68   :  { %v3374_v14 = vadd.f32 %v3373_v50, %v3354_v49 }
 0xa6a   :  { %v3376_v45 = vmax.f32 %v3374_v14, 0.0 }
 0xa6c   :  { %4287 = vmatmul.msk.f32.vlgmr.msra.gmra.mxu0 %vm3385_vm1, %v3376_v45 }
 0xae9   :  { %v3406_v22 = vpop.f32.mrf.mxu0 }
 0xaea   :  { %v3407_v29 = vadd.f32 %v4309_v28, %v3406_v22 }
 0xaec   :  { %3410 = vst.msk [vmem:[#allocation3] sm:$0x3] %vm3409_vm2, %v3407_v29 }
 0xaed   :  { %3421 = dma.vmem_to_hbm [thread:$0]  %s3417_s28, 32, %s3419_s30, [#allocation4]  }
 0xaee   :  { %4338 = dma.done.wait [#allocation4], 32  }
 0xaef   :  { %4339 = vsyncadd [#allocation4], 4294967264 }
 0xaf0   :  { %3426 = vsyncpa [#allocation4], 1 }

</bundles_post_ra>
